<compile_context>
chip_gen: v5e
topology: v5e:2x2
jax: 0.10.0
libtpu: 0.0.40
codegen_flags: <defaults>
</compile_context>

<pallas_src>
import jax
import jax.numpy as jnp
from jax.experimental import pallas as pl

# ---- model configuration (from the PyTorch module) ---------------------------------
B, T = 2, 8                    # small example shapes
D_SPEECH = 768                 # self.speech_dim
D_TEXT = 768                   # self.text_dim
CONV_OUT = 128                 # energy_extractor out_channels
CONV_K = 5                     # kernel_size (padding=2)
H1, H2 = 256, 128              # pause_detector hidden sizes
CONCEPT_RANGE = (0.0, 1.0)     # pause ratio; range[0] >= 0 -> relu + clamp branch

PACKED_K = CONV_K * D_SPEECH   # 3840 — K dim of the fused conv-mean matmul

KERNEL_PARAM_ORDER = ["wcq", "wc_scale", "bc", "w1", "b1", "w2", "b2", "w3", "b3"]


# ---- kernel -------------------------------------------------------------------------
def pause_ratio_kernel(speech_ref, text_ref,
                       wcq_ref, wc_scale_ref, bc_ref,
                       w1_ref, b1_ref,
                       w2_ref, b2_ref,
                       w3_ref, b3_ref,
                       out_ref):
    x = speech_ref[...]                         # [B, T, 768] f32
    t = x.shape[1]

    # --- mean-over-time of Conv1d(768->128,k=5,pad=2) as ONE K=3840 matmul.
    #     lhs rows pair with the packed weight blocks [Wsum, -(W3+W4), -W4, -W0, -(W0+W1)]
    #     (already sign-folded and /T); all pieces are 768-wide -> lane-aligned concat.
    s_full = jnp.sum(x, axis=1)                 # [B, 768] f32 (time sum, full precision)
    lhs = jnp.concatenate(
        [s_full, x[:, 0, :], x[:, 1, :], x[:, t - 2, :], x[:, t - 1, :]],
        axis=-1).astype(jnp.bfloat16)           # [B, 3840]

    # dequantize int8 packed conv weight by cast; per-output-column scale is applied to
    # the f32 accumulator (scale depends only on the output column, so it commutes).
    wc_bf16 = wcq_ref[...].astype(jnp.float32).astype(jnp.bfloat16)     # [3840, 128]
    acc = jnp.dot(lhs, wc_bf16, preferred_element_type=jnp.float32)     # [B, 128] f32
    avg_energy = acc * wc_scale_ref[...] + bc_ref[...]                  # [B, 128]

    # --- pause_detector MLP; cat([avg_energy, text]) is a cheap lane-aligned concat,
    #     then ONE K=896 matmul. Dropout is identity at inference. -----------------------
    combined = jnp.concatenate(
        [avg_energy.astype(jnp.bfloat16), text_ref[...].astype(jnp.bfloat16)],
        axis=-1)                                                        # [B, 896]
    h1 = jnp.maximum(
        jnp.dot(combined, w1_ref[...], preferred_element_type=jnp.float32)
        + b1_ref[...], 0.0)                                             # [B, 256]

    h2 = jnp.maximum(
        jnp.dot(h1.astype(jnp.bfloat16), w2_ref[...],
                preferred_element_type=jnp.float32) + b2_ref[...], 0.0)  # [B, 128]

    # final Linear(128, 1) as multiply + lane-reduce (avoids an N=1 MXU matmul)
    y = jnp.sum(h2 * w3_ref[...], axis=-1, keepdims=True) + b3_ref[...]  # [B, 1]

    # concept activation: range[0] >= 0 -> relu then clamp; clip(0,1) covers both.
    out_ref[...] = jnp.clip(y, CONCEPT_RANGE[0], CONCEPT_RANGE[1])


# ---- weight prep: PyTorch layout -> packed kernel layout -----------------------------
def prepare_params(p, t_len):
    assert t_len >= 2, "edge-corrected conv mean requires T >= 2"
    w = p["conv_w"]                                   # [128, 768, 5]
    taps = [w[:, :, k].T for k in range(CONV_K)]      # 5 x [768, 128]  (in, out)
    wsum = taps[0] + taps[1] + taps[2] + taps[3] + taps[4]
    wc = jnp.concatenate(
        [wsum,
         -(taps[3] + taps[4]),     # pairs with x[:, 0]
         -taps[4],                 # pairs with x[:, 1]
         -taps[0],                 # pairs with x[:, T-2]
         -(taps[0] + taps[1])],    # pairs with x[:, T-1]
        axis=0) / float(t_len)                        # [3840, 128] f32, 1/T folded in

    # int8 symmetric per-output-column quantization (dominant HBM byte saver).
    col_amax = jnp.maximum(jnp.max(jnp.abs(wc), axis=0, keepdims=True), 1e-12)  # [1,128]
    wc_scale = (col_amax / 127.0).astype(jnp.float32)
    wcq = jnp.clip(jnp.round(wc / wc_scale), -127.0, 127.0).astype(jnp.int8)

    return dict(
        wcq=wcq,                                              # [3840, 128] int8
        wc_scale=wc_scale,                                    # [1, 128]   f32
        bc=p["conv_b"].reshape(1, -1).astype(jnp.float32),
        w1=p["w1"].T.astype(jnp.bfloat16),                    # [896, 256] (single matmul)
        b1=p["b1"].reshape(1, -1).astype(jnp.float32),
        w2=p["w2"].T.astype(jnp.bfloat16),                    # [256, 128]
        b2=p["b2"].reshape(1, -1).astype(jnp.float32),
        w3=p["w3"].astype(jnp.float32),                       # [1, 128] (tiny, keep f32)
        b3=p["b3"].reshape(1, -1).astype(jnp.float32),        # [1, 1]
    )


# ---- wrapper --------------------------------------------------------------------------
def pause_ratio_forward(speech, text, packed):
    """speech: [B, T, 768] f32, text: [B, 768] f32 -> [B, 1] f32."""
    b_, _, _ = speech.shape
    args = [speech, text] + [packed[k] for k in KERNEL_PARAM_ORDER]

    flops = 2 * b_ * (PACKED_K * CONV_OUT                    # fused conv-mean matmul
                      + (CONV_OUT + D_TEXT) * H1             # Linear(896,256)
                      + H1 * H2                              # Linear(256,128)
                      + H2)                                   # Linear(128,1)
    bytes_accessed = sum(int(a.size) * a.dtype.itemsize for a in args) + b_ * 4

    return pl.pallas_call(
        pause_ratio_kernel,
        out_shape=jax.ShapeDtypeStruct((b_, 1), jnp.float32),
        # no grid: single invocation, whole-array VMEM blocks (weights read exactly once)
        cost_estimate=pl.CostEstimate(flops=flops, transcendentals=0,
                                      bytes_accessed=bytes_accessed),
    )(*args)


# ---- deterministic synthetic parameters (shapes from the module __init__) -------------
def init_params(seed=0):
    key = jax.random.PRNGKey(seed)

    def nxt():
        nonlocal key
        key, sub = jax.random.split(key)
        return sub

    p = {}
    p["conv_w"] = jax.random.normal(nxt(), (CONV_OUT, D_SPEECH, CONV_K), jnp.float32) * 0.02
    p["conv_b"] = jax.random.normal(nxt(), (CONV_OUT,), jnp.float32) * 0.02
    p["w1"] = jax.random.normal(nxt(), (H1, CONV_OUT + D_TEXT), jnp.float32) * 0.02
    p["b1"] = jax.random.normal(nxt(), (H1,), jnp.float32) * 0.02
    p["w2"] = jax.random.normal(nxt(), (H2, H1), jnp.float32) * 0.02
    p["b2"] = jax.random.normal(nxt(), (H2,), jnp.float32) * 0.02
    p["w3"] = jax.random.normal(nxt(), (1, H2), jnp.float32) * 0.02
    p["b3"] = jnp.full((1,), 0.2, jnp.float32)   # keeps outputs strictly inside (0,1)
    return p


# ---- plain-JAX reference (full f32) ----------------------------------------------------
def reference(speech, text, p):
    with jax.default_matmul_precision("highest"):
        lhs = jnp.transpose(speech, (0, 2, 1))                        # [B, 768, T]
        y = jax.lax.conv_general_dilated(
            lhs, p["conv_w"], window_strides=(1,), padding=[(2, 2)],
            dimension_numbers=("NCH", "OIH", "NCH"))                  # [B, 128, T]
        y = y + p["conv_b"][None, :, None]
        avg_energy = jnp.mean(y, axis=2)                              # [B, 128]
        combined = jnp.concatenate([avg_energy, text], axis=-1)       # [B, 896]
        h1 = jax.nn.relu(combined @ p["w1"].T + p["b1"])
        h2 = jax.nn.relu(h1 @ p["w2"].T + p["b2"])
        out = h2 @ p["w3"].T + p["b3"]
    return jnp.clip(jax.nn.relu(out), CONCEPT_RANGE[0], CONCEPT_RANGE[1])


if __name__ == "__main__":
    key = jax.random.PRNGKey(0)
    ks, kt = jax.random.split(key)
    speech = jax.random.normal(ks, (B, T, D_SPEECH), jnp.float32)
    text = jax.random.normal(kt, (B, D_TEXT), jnp.float32)

    params = init_params(seed=0)
    packed = prepare_params(params, T)

    out = jax.block_until_ready(pause_ratio_forward(speech, text, packed))
    ref = jax.block_until_ready(reference(speech, text, params))

    assert out.shape == (B, 1), out.shape
    assert jnp.allclose(out, ref, atol=3e-2, rtol=3e-2), (out, ref)
    print("KERNEL_OK")
</pallas_src>

<mosaic_0001>
module attributes {stable_mosaic.version = 11 : i64} {
  func.func @pause_ratio_kernel(%arg0: memref<2x8x768xf32, #tpu.memory_space<vmem>>, %arg1: memref<2x768xf32, #tpu.memory_space<vmem>>, %arg2: memref<3840x128xi8, #tpu.memory_space<vmem>>, %arg3: memref<1x128xf32, #tpu.memory_space<vmem>>, %arg4: memref<1x128xf32, #tpu.memory_space<vmem>>, %arg5: memref<896x256xbf16, #tpu.memory_space<vmem>>, %arg6: memref<1x256xf32, #tpu.memory_space<vmem>>, %arg7: memref<256x128xbf16, #tpu.memory_space<vmem>>, %arg8: memref<1x128xf32, #tpu.memory_space<vmem>>, %arg9: memref<1x128xf32, #tpu.memory_space<vmem>>, %arg10: memref<1x1xf32, #tpu.memory_space<vmem>>, %arg11: memref<2x1xf32, #tpu.memory_space<vmem>>) attributes {dimension_semantics = [], scalar_prefetch = 0 : i64, scratch_operands = 0 : i64, tpu.core_type = #tpu.core_type<tc>} {
    %c0 = arith.constant 0 : index
    %c0_0 = arith.constant 0 : index
    %c0_1 = arith.constant 0 : index
    %0 = vector.load %arg0[%c0, %c0_0, %c0_1] : memref<2x8x768xf32, #tpu.memory_space<vmem>>, vector<2x8x768xf32>
    %cst = arith.constant dense<0.000000e+00> : vector<2x768xf32>
    %1 = vector.multi_reduction <add>, %0, %cst [1] : vector<2x8x768xf32> to vector<2x768xf32>
    %2 = vector.extract_strided_slice %0 {offsets = [0, 0, 0], sizes = [2, 1, 768], strides = [1, 1, 1]} : vector<2x8x768xf32> to vector<2x1x768xf32>
    %3 = vector.shape_cast %2 : vector<2x1x768xf32> to vector<2x768xf32>
    %4 = vector.extract_strided_slice %0 {offsets = [0, 1, 0], sizes = [2, 1, 768], strides = [1, 1, 1]} : vector<2x8x768xf32> to vector<2x1x768xf32>
    %5 = vector.shape_cast %4 : vector<2x1x768xf32> to vector<2x768xf32>
    %6 = vector.extract_strided_slice %0 {offsets = [0, 6, 0], sizes = [2, 1, 768], strides = [1, 1, 1]} : vector<2x8x768xf32> to vector<2x1x768xf32>
    %7 = vector.shape_cast %6 : vector<2x1x768xf32> to vector<2x768xf32>
    %8 = vector.extract_strided_slice %0 {offsets = [0, 7, 0], sizes = [2, 1, 768], strides = [1, 1, 1]} : vector<2x8x768xf32> to vector<2x1x768xf32>
    %9 = vector.shape_cast %8 : vector<2x1x768xf32> to vector<2x768xf32>
    %10 = tpu.concatenate %1, %3, %5, %7, %9 in 1 : vector<2x768xf32>, vector<2x768xf32>, vector<2x768xf32>, vector<2x768xf32>, vector<2x768xf32> -> vector<2x3840xf32>
    %11 = arith.truncf %10 : vector<2x3840xf32> to vector<2x3840xbf16>
    %c0_2 = arith.constant 0 : index
    %c0_3 = arith.constant 0 : index
    %12 = vector.load %arg2[%c0_2, %c0_3] : memref<3840x128xi8, #tpu.memory_space<vmem>>, vector<3840x128xi8>
    %13 = arith.sitofp %12 : vector<3840x128xi8> to vector<3840x128xf32>
    %14 = arith.truncf %13 : vector<3840x128xf32> to vector<3840x128xbf16>
    %cst_4 = arith.constant dense<0.000000e+00> : vector<2x128xf32>
    %15 = tpu.matmul %11, %14, %cst_4 {dimension_numbers = #tpu.dot_dimension_numbers<[1], [0], [0], [1], [0, 0, 1, 1], [], []>} : vector<2x3840xbf16>, vector<3840x128xbf16>, vector<2x128xf32> -> vector<2x128xf32>
    %c0_5 = arith.constant 0 : index
    %c0_6 = arith.constant 0 : index
    %16 = vector.load %arg3[%c0_5, %c0_6] : memref<1x128xf32, #tpu.memory_space<vmem>>, vector<1x128xf32>
    %17 = vector.broadcast %16 : vector<1x128xf32> to vector<2x128xf32>
    %18 = arith.mulf %15, %17 : vector<2x128xf32>
    %c0_7 = arith.constant 0 : index
    %c0_8 = arith.constant 0 : index
    %19 = vector.load %arg4[%c0_7, %c0_8] : memref<1x128xf32, #tpu.memory_space<vmem>>, vector<1x128xf32>
    %20 = vector.broadcast %19 : vector<1x128xf32> to vector<2x128xf32>
    %21 = arith.addf %18, %20 : vector<2x128xf32>
    %22 = arith.truncf %21 : vector<2x128xf32> to vector<2x128xbf16>
    %c0_9 = arith.constant 0 : index
    %c0_10 = arith.constant 0 : index
    %23 = vector.load %arg1[%c0_9, %c0_10] : memref<2x768xf32, #tpu.memory_space<vmem>>, vector<2x768xf32>
    %24 = arith.truncf %23 : vector<2x768xf32> to vector<2x768xbf16>
    %25 = tpu.concatenate %22, %24 in 1 : vector<2x128xbf16>, vector<2x768xbf16> -> vector<2x896xbf16>
    %c0_11 = arith.constant 0 : index
    %c0_12 = arith.constant 0 : index
    %26 = vector.load %arg5[%c0_11, %c0_12] : memref<896x256xbf16, #tpu.memory_space<vmem>>, vector<896x256xbf16>
    %cst_13 = arith.constant dense<0.000000e+00> : vector<2x256xf32>
    %27 = tpu.matmul %25, %26, %cst_13 {dimension_numbers = #tpu.dot_dimension_numbers<[1], [0], [0], [1], [0, 0, 1, 1], [], []>} : vector<2x896xbf16>, vector<896x256xbf16>, vector<2x256xf32> -> vector<2x256xf32>
    %c0_14 = arith.constant 0 : index
    %c0_15 = arith.constant 0 : index
    %28 = vector.load %arg6[%c0_14, %c0_15] : memref<1x256xf32, #tpu.memory_space<vmem>>, vector<1x256xf32>
    %29 = vector.broadcast %28 : vector<1x256xf32> to vector<2x256xf32>
    %30 = arith.addf %27, %29 : vector<2x256xf32>
    %cst_16 = arith.constant 0.000000e+00 : f32
    %31 = vector.broadcast %cst_16 : f32 to vector<2x256xf32>
    %32 = arith.maximumf %30, %31 : vector<2x256xf32>
    %33 = arith.truncf %32 : vector<2x256xf32> to vector<2x256xbf16>
    %c0_17 = arith.constant 0 : index
    %c0_18 = arith.constant 0 : index
    %34 = vector.load %arg7[%c0_17, %c0_18] : memref<256x128xbf16, #tpu.memory_space<vmem>>, vector<256x128xbf16>
    %cst_19 = arith.constant dense<0.000000e+00> : vector<2x128xf32>
    %35 = tpu.matmul %33, %34, %cst_19 {dimension_numbers = #tpu.dot_dimension_numbers<[1], [0], [0], [1], [0, 0, 1, 1], [], []>} : vector<2x256xbf16>, vector<256x128xbf16>, vector<2x128xf32> -> vector<2x128xf32>
    %c0_20 = arith.constant 0 : index
    %c0_21 = arith.constant 0 : index
    %36 = vector.load %arg8[%c0_20, %c0_21] : memref<1x128xf32, #tpu.memory_space<vmem>>, vector<1x128xf32>
    %37 = vector.broadcast %36 : vector<1x128xf32> to vector<2x128xf32>
    %38 = arith.addf %35, %37 : vector<2x128xf32>
    %cst_22 = arith.constant 0.000000e+00 : f32
    %39 = vector.broadcast %cst_22 : f32 to vector<2x128xf32>
    %40 = arith.maximumf %38, %39 : vector<2x128xf32>
    %c0_23 = arith.constant 0 : index
    %c0_24 = arith.constant 0 : index
    %41 = vector.load %arg9[%c0_23, %c0_24] : memref<1x128xf32, #tpu.memory_space<vmem>>, vector<1x128xf32>
    %42 = vector.broadcast %41 : vector<1x128xf32> to vector<2x128xf32>
    %43 = arith.mulf %40, %42 : vector<2x128xf32>
    %cst_25 = arith.constant dense<0.000000e+00> : vector<2xf32>
    %44 = vector.multi_reduction <add>, %43, %cst_25 [1] : vector<2x128xf32> to vector<2xf32>
    %45 = vector.shape_cast %44 : vector<2xf32> to vector<2x1xf32>
    %c0_26 = arith.constant 0 : index
    %c0_27 = arith.constant 0 : index
    %46 = vector.load %arg10[%c0_26, %c0_27] : memref<1x1xf32, #tpu.memory_space<vmem>>, vector<1x1xf32>
    %47 = vector.broadcast %46 : vector<1x1xf32> to vector<2x1xf32>
    %48 = arith.addf %45, %47 : vector<2x1xf32>
    %cst_28 = arith.constant 0.000000e+00 : f32
    %cst_29 = arith.constant 1.000000e+00 : f32
    %49 = vector.broadcast %cst_28 : f32 to vector<2x1xf32>
    %50 = arith.maximumf %49, %48 : vector<2x1xf32>
    %51 = vector.broadcast %cst_29 : f32 to vector<2x1xf32>
    %52 = arith.minimumf %51, %50 : vector<2x1xf32>
    %c0_30 = arith.constant 0 : index
    %c0_31 = arith.constant 0 : index
    %53 = vector.load %arg11[%c0_30, %c0_31] : memref<2x1xf32, #tpu.memory_space<vmem>>, vector<2x1xf32>
    tpu.vector_store %arg11[%c0_30, %c0_31], %52 {strides = array<i32>} : memref<2x1xf32, #tpu.memory_space<vmem>>, vector<2x1xf32>,
    return
  }
}

</mosaic_0001>

<bundles_post_ra>
// kernel: tpu_custom_call.1
= control target key start
LH: loop header
LB: loop body
LE: loop exit
PB: predicated region body
PF: predicated region fallthrough
CT: control target
= control target key end

     0   :  { %s4512_s0 = inlined_call_operand.hbm [shape: f32[2,8,768], index: 0, kind: input, shape index: {}]   ;;  %s4513_s1 = inlined_call_operand.hbm [shape: f32[2,768], index: 1, kind: input, shape index: {}]   ;;  %s4514_s2 = inlined_call_operand.hbm [shape: s8[3840,128], index: 2, kind: input, shape index: {}]   ;;  %s4515_s3 = inlined_call_operand.vmem [shape: f32[1,128], index: 3, kind: input, shape index: {}]   ;;  %s4516_s4 = inlined_call_operand.vmem [shape: f32[1,128], index: 4, kind: input, shape index: {}]   ;;  %s4517_s5 = inlined_call_operand.hbm [shape: bf16[896,256], index: 5, kind: input, shape index: {}]   ;;  %s4518_s6 = inlined_call_operand.vmem [shape: f32[1,256], index: 6, kind: input, shape index: {}]   ;;  %s4519_s7 = inlined_call_operand.hbm [shape: bf16[256,128], index: 7, kind: input, shape index: {}]   ;;  %s4520_s8 = inlined_call_operand.vmem [shape: f32[1,128], index: 8, kind: input, shape index: {}]   ;;  %s4521_s9 = inlined_call_operand.vmem [shape: f32[1,128], index: 9, kind: input, shape index: {}]   ;;  %s4522_s10 = inlined_call_operand.<no memory space> [shape: f32[1,1], index: 10, kind: input, shape index: {}]   ;;  %s4523_s11 = inlined_call_operand.vmem [shape: f32[2,1], index: 11, kind: output, shape index: {}]  }
   0x1   :  { %v16_v0 = vstv %s4522_s10 }
   0x2   :  { %17 = vst [vmem:[#allocation2] sm:$0x1] %v16_v0 }
   0x3   :  { %18 = vsyncpa [#allocation4], 0 }
   0x4   :  { %19 = vsyncpa [#allocation6], 0  ;;  %s39_s21 = sshll.u32 %s4513_s1, 4  ;;  %s40_s21 = int_to_ptr.hbm [resolvable:$true] %s39_s21 }
   0x5   :  { %20 = vsyncpa [#allocation9], 0  ;;  %s3969_s22 = smov [#allocation5]   ;;  %s66_s26 = sshll.u32 %s4517_s5, 4  ;;  %s67_s26 = int_to_ptr.hbm [resolvable:$true] %s66_s26 }
   0x6   :  { %s41_s23 = sshll.u32 %s3969_s22, 4  ;;  %s3970_s27 = smov [#allocation8]   ;;  %s42_s23 = int_to_ptr.vmem [resolvable:$true] %s41_s23 }
   0x7   :  { %44 = dma.hbm_to_vmem [thread:$0]  %s40_s21, 192, %s42_s23, [#allocation6]  }
   0x8   :  { %s68_s10 = sshll.u32 %s3970_s27, 4  ;;  %s25_s30 = sshll.u32 %s4512_s0, 4  ;;  %s69_s10 = int_to_ptr.vmem [resolvable:$true] %s68_s10  ;;  %s26_s30 = int_to_ptr.hbm [resolvable:$true] %s25_s30 }
   0x9   :  { %s3971_s1 = smov 128   ;;  %s3972_s12 = smov 8  }
   0xa   :  { %74 = dma.hbm_to_vmem [thread:$0]  %s67_s26, 14336, %s69_s10, [#allocation9], %s3971_s1, %s3971_s1, %s3972_s12  }
   0xb   :  { %s3973_s13 = smov [#allocation3]   ;;  %s49_s17 = sshll.u32 %s4514_s2, 4  ;;  %s50_s17 = int_to_ptr.hbm [resolvable:$true] %s49_s17 }
   0xc   :  { %s27_s14 = sshll.u32 %s3973_s13, 4  ;;  %s3974_s5 = smov 768   ;;  %s28_s14 = int_to_ptr.vmem [resolvable:$true] %s27_s14 }
   0xd   :  { %s3975_s18 = smov 48   ;;  %s3976_s19 = smov [#allocation7]  }
   0xe   :  { %33 = dma.hbm_to_vmem [thread:$0]  %s26_s30, 1536, %s28_s14, [#allocation4], %s3974_s5, %s3974_s5, %s3975_s18  }
   0xf   :  { %s51_s20 = sshll.u32 %s3976_s19, 4  ;;  %s81_s22 = sshll.u32 %s4519_s7, 4  ;;  %s52_s20 = int_to_ptr.vmem [resolvable:$true] %s51_s20  ;;  %s82_s22 = int_to_ptr.hbm [resolvable:$true] %s81_s22 }
  0x10   :  { %57 = dma.hbm_to_vmem [thread:$0]  %s50_s17, 15360, %s52_s20, [#allocation6], %s3971_s1, %s3971_s1, %s3972_s12  }
  0x11   :  { %s3977_s23 = smov [#allocation10]   ;;  %s3978_s25 = smov 64  }
  0x12   :  { %s83_s24 = sshll.u32 %s3977_s23, 4  ;;  %s3979_s26 = smov 4   ;;  %s84_s24 = int_to_ptr.vmem [resolvable:$true] %s83_s24 }
  0x13   :  { %89 = dma.hbm_to_vmem [thread:$0]  %s82_s22, 2048, %s84_s24, [#allocation9], %s3978_s25, %s3978_s25, %s3979_s26  }
  0x14   :  { %3963 = dma.done.wait [#allocation4], 1536  }
  0x15   :  { %3964 = vsyncadd [#allocation4], 4294965760 }
  0x16   :  { %3965 = dma.done.wait [#allocation6], 15552  }
  0x17   :  { %3966 = vsyncadd [#allocation6], 4294951744 }
  0x18   :  { %3967 = dma.done.wait [#allocation9], 16384  }
  0x19   :  { %3968 = vsyncadd [#allocation9], 4294950912  ;;  %v354_v1 = vld [vmem:[#allocation7 + $0x18] sm:$0xff]  ;;  %v353_v25 = vld [vmem:[#allocation7 + $0x10] sm:$0xff]  ;;  %vm212_vm0 = vcmask 1041409   ;;  %vm3143_vm1 = vcmask 1041408  }
  0x1a   :  { %v358_v2 = vld [vmem:[#allocation7 + $0x38] sm:$0xff]  ;;  %v485_v4 = vunpack.c.2.s8 %v354_v1  ;;  %v486_v5 = vunpack.c.3.s8 %v354_v1  ;;  %v483_v23 = vunpack.c.0.s8 %v354_v1  ;;  %v484_v24 = vunpack.c.1.s8 %v354_v1  ;;  %v357_v38 = vld [vmem:[#allocation7 + $0x30] sm:$0xff] }
  0x1b   :  { %v362_v3 = vld [vmem:[#allocation7 + $0x58] sm:$0xff]  ;;  %v501_v6 = vunpack.c.2.s8 %v358_v2  ;;  %v502_v7 = vunpack.c.3.s8 %v358_v2  ;;  %v499_v28 = vunpack.c.0.s8 %v358_v2  ;;  %v500_v29 = vunpack.c.1.s8 %v358_v2  ;;  %v361_v43 = vld [vmem:[#allocation7 + $0x50] sm:$0xff] }
  0x1c   :  { %v366_v8 = vld [vmem:[#allocation7 + $0x78] sm:$0xff]  ;;  %v517_v9 = vunpack.c.2.s8 %v362_v3  ;;  %v518_v10 = vunpack.c.3.s8 %v362_v3  ;;  %v965_v13 = vcvt.s32.f32 %v485_v4  ;;  %v966_v14 = vcvt.s32.f32 %v486_v5  ;;  %v365_v48 = vld [vmem:[#allocation7 + $0x70] sm:$0xff] }
  0x1d   :  { %v533_v11 = vunpack.c.2.s8 %v366_v8  ;;  %v534_v12 = vunpack.c.3.s8 %v366_v8  ;;  %v981_v15 = vcvt.s32.f32 %v501_v6  ;;  %v982_v16 = vcvt.s32.f32 %v502_v7 }
  0x1e   :  { %v997_v17 = vcvt.s32.f32 %v517_v9  ;;  %v998_v18 = vcvt.s32.f32 %v518_v10  ;;  %v1438_v21 = vpack.c.bf16 %v966_v14, %v965_v13  ;;  %v963_v30 = vcvt.s32.f32 %v483_v23  ;;  %v352_v9 = vld [vmem:[#allocation7 + $0x8] sm:$0xff] }
  0x1f   :  { %v1013_v19 = vcvt.s32.f32 %v533_v11  ;;  %v1014_v20 = vcvt.s32.f32 %v534_v12  ;;  %v1446_v22 = vpack.c.bf16 %v982_v16, %v981_v15  ;;  %v964_v31 = vcvt.s32.f32 %v484_v24  ;;  %v360_v23 = vld [vmem:[#allocation7 + $0x48] sm:$0xff] }
  0x20   :  { %v1454_v26 = vpack.c.bf16 %v998_v18, %v997_v17  ;;  %1671 = vmatpush.bf16.msra.mxu0 %v1438_v21  ;;  %v515_v32 = vunpack.c.0.s8 %v362_v3  ;;  %v516_v33 = vunpack.c.1.s8 %v362_v3  ;;  %v979_v34 = vcvt.s32.f32 %v499_v28  ;;  %v356_v18 = vld [vmem:[#allocation7 + $0x28] sm:$0xff] }
  0x21   :  { %v1462_v27 = vpack.c.bf16 %v1014_v20, %v1013_v19  ;;  %1684 = vmatpush.bf16.msra.mxu1 %v1446_v22  ;;  %v980_v35 = vcvt.s32.f32 %v500_v29  ;;  %v531_v36 = vunpack.c.0.s8 %v366_v8  ;;  %v532_v37 = vunpack.c.1.s8 %v366_v8  ;;  %v364_v28 = vld [vmem:[#allocation7 + $0x68] sm:$0xff] }
  0x22   :  { %1697 = vmatpush.bf16.msra.mxu2 %v1454_v26  ;;  %v1437_v39 = vpack.c.bf16 %v964_v31, %v963_v30  ;;  %v995_v40 = vcvt.s32.f32 %v515_v32  ;;  %v996_v41 = vcvt.s32.f32 %v516_v33  ;;  %v481_v42 = vunpack.c.2.s8 %v353_v25 }
  0x23   :  { %1710 = vmatpush.bf16.msra.mxu3 %v1462_v27  ;;  %v1445_v44 = vpack.c.bf16 %v980_v35, %v979_v34  ;;  %v1011_v45 = vcvt.s32.f32 %v531_v36  ;;  %v1012_v46 = vcvt.s32.f32 %v532_v37  ;;  %v482_v47 = vunpack.c.3.s8 %v353_v25 }
  0x24   :  { %1672 = vmatpush.bf16.msra.mxu0 %v1437_v39  ;;  %v1453_v49 = vpack.c.bf16 %v996_v41, %v995_v40  ;;  %v961_v50 = vcvt.s32.f32 %v481_v42  ;;  %v497_v51 = vunpack.c.2.s8 %v357_v38  ;;  %v498_v52 = vunpack.c.3.s8 %v357_v38 }
  0x25   :  { %1685 = vmatpush.bf16.msra.mxu1 %v1445_v44  ;;  %v1461_v53 = vpack.c.bf16 %v1012_v46, %v1011_v45  ;;  %v962_v54 = vcvt.s32.f32 %v482_v47  ;;  %v513_v55 = vunpack.c.2.s8 %v361_v43  ;;  %v514_v56 = vunpack.c.3.s8 %v361_v43 }
  0x26   :  { %1698 = vmatpush.bf16.msra.mxu2 %v1453_v49  ;;  %v977_v57 = vcvt.s32.f32 %v497_v51  ;;  %v978_v58 = vcvt.s32.f32 %v498_v52  ;;  %v529_v59 = vunpack.c.2.s8 %v365_v48  ;;  %v530_v60 = vunpack.c.3.s8 %v365_v48 }
  0x27   :  { %1711 = vmatpush.bf16.msra.mxu3 %v1461_v53  ;;  %v1436_v61 = vpack.c.bf16 %v962_v54, %v961_v50  ;;  %v993_v62 = vcvt.s32.f32 %v513_v55  ;;  %v994_v63 = vcvt.s32.f32 %v514_v56  ;;  %v479_v0 = vunpack.c.0.s8 %v353_v25  ;;  %v351_v53 = vld [vmem:[#allocation7] sm:$0xff] }
  0x28   :  { %v1444_v1 = vpack.c.bf16 %v978_v58, %v977_v57  ;;  %v1009_v2 = vcvt.s32.f32 %v529_v59  ;;  %v1010_v3 = vcvt.s32.f32 %v530_v60  ;;  %v480_v4 = vunpack.c.1.s8 %v353_v25 }
  0x29   :  { %1673 = vmatpush.bf16.msra.mxu0 %v1436_v61  ;;  %v1452_v5 = vpack.c.bf16 %v994_v63, %v993_v62  ;;  %v959_v6 = vcvt.s32.f32 %v479_v0  ;;  %v495_v7 = vunpack.c.0.s8 %v357_v38  ;;  %v496_v8 = vunpack.c.1.s8 %v357_v38  ;;  %v355_v62 = vld [vmem:[#allocation7 + $0x20] sm:$0xff] }
  0x2a   :  { %1686 = vmatpush.bf16.msra.mxu1 %v1444_v1  ;;  %v1460_v10 = vpack.c.bf16 %v1010_v3, %v1009_v2  ;;  %v960_v11 = vcvt.s32.f32 %v480_v4  ;;  %v511_v12 = vunpack.c.0.s8 %v361_v43  ;;  %v512_v13 = vunpack.c.1.s8 %v361_v43  ;;  %v359_v3 = vld [vmem:[#allocation7 + $0x40] sm:$0xff] }
  0x2b   :  { %1699 = vmatpush.bf16.msra.mxu2 %v1452_v5  ;;  %v975_v14 = vcvt.s32.f32 %v495_v7  ;;  %v976_v15 = vcvt.s32.f32 %v496_v8  ;;  %v527_v16 = vunpack.c.0.s8 %v365_v48  ;;  %v528_v17 = vunpack.c.1.s8 %v365_v48  ;;  %v4058_v8 = vld [vmem:[#allocation7 + $0x60] sm:$0xff] }
  0x2c   :  { %1712 = vmatpush.bf16.msra.mxu3 %v1460_v10  ;;  %v1435_v19 = vpack.c.bf16 %v960_v11, %v959_v6  ;;  %v991_v20 = vcvt.s32.f32 %v511_v12  ;;  %v992_v21 = vcvt.s32.f32 %v512_v13  ;;  %v477_v22 = vunpack.c.2.s8 %v352_v9 }
  0x2d   :  { %v1443_v24 = vpack.c.bf16 %v976_v15, %v975_v14  ;;  %v1007_v25 = vcvt.s32.f32 %v527_v16  ;;  %v1008_v26 = vcvt.s32.f32 %v528_v17  ;;  %v478_v27 = vunpack.c.3.s8 %v352_v9 }
  0x2e   :  { %1674 = vmatpush.bf16.msra.mxu0 %v1435_v19  ;;  %v1451_v29 = vpack.c.bf16 %v992_v21, %v991_v20  ;;  %v957_v30 = vcvt.s32.f32 %v477_v22  ;;  %v493_v31 = vunpack.c.2.s8 %v356_v18  ;;  %v494_v32 = vunpack.c.3.s8 %v356_v18 }
  0x2f   :  { %1687 = vmatpush.bf16.msra.mxu1 %v1443_v24  ;;  %v1459_v33 = vpack.c.bf16 %v1008_v26, %v1007_v25  ;;  %v958_v34 = vcvt.s32.f32 %v478_v27  ;;  %v509_v35 = vunpack.c.2.s8 %v360_v23  ;;  %v510_v36 = vunpack.c.3.s8 %v360_v23 }
  0x30   :  { %1700 = vmatpush.bf16.msra.mxu2 %v1451_v29  ;;  %v973_v37 = vcvt.s32.f32 %v493_v31  ;;  %v974_v38 = vcvt.s32.f32 %v494_v32  ;;  %v525_v39 = vunpack.c.2.s8 %v364_v28  ;;  %v526_v40 = vunpack.c.3.s8 %v364_v28  ;;  %v370_v29 = vld [vmem:[#allocation7 + $0x98] sm:$0xff] }
  0x31   :  { %1713 = vmatpush.bf16.msra.mxu3 %v1459_v33  ;;  %v1434_v41 = vpack.c.bf16 %v958_v34, %v957_v30  ;;  %v989_v42 = vcvt.s32.f32 %v509_v35  ;;  %v990_v43 = vcvt.s32.f32 %v510_v36  ;;  %v475_v44 = vunpack.c.0.s8 %v352_v9  ;;  %v374_v34 = vld [vmem:[#allocation7 + $0xb8] sm:$0xff] }
  0x32   :  { %v1442_v45 = vpack.c.bf16 %v974_v38, %v973_v37  ;;  %v1005_v46 = vcvt.s32.f32 %v525_v39  ;;  %v1006_v47 = vcvt.s32.f32 %v526_v40  ;;  %v476_v48 = vunpack.c.1.s8 %v352_v9 }
  0x33   :  { %1675 = vmatpush.bf16.msra.mxu0 %v1434_v41  ;;  %v1450_v49 = vpack.c.bf16 %v990_v43, %v989_v42  ;;  %v955_v50 = vcvt.s32.f32 %v475_v44  ;;  %v491_v51 = vunpack.c.0.s8 %v356_v18  ;;  %v492_v52 = vunpack.c.1.s8 %v356_v18  ;;  %v378_v43 = vld [vmem:[#allocation7 + $0xd8] sm:$0xff] }
  0x34   :  { %1688 = vmatpush.bf16.msra.mxu1 %v1442_v45  ;;  %v1458_v54 = vpack.c.bf16 %v1006_v47, %v1005_v46  ;;  %v956_v55 = vcvt.s32.f32 %v476_v48  ;;  %v507_v56 = vunpack.c.0.s8 %v360_v23  ;;  %v508_v57 = vunpack.c.1.s8 %v360_v23 }
  0x35   :  { %1701 = vmatpush.bf16.msra.mxu2 %v1450_v49  ;;  %v971_v58 = vcvt.s32.f32 %v491_v51  ;;  %v972_v59 = vcvt.s32.f32 %v492_v52  ;;  %v523_v60 = vunpack.c.0.s8 %v364_v28  ;;  %v524_v61 = vunpack.c.1.s8 %v364_v28  ;;  %v382_v52 = vld [vmem:[#allocation7 + $0xf8] sm:$0xff] }
  0x36   :  { %1714 = vmatpush.bf16.msra.mxu3 %v1458_v54  ;;  %v1433_v63 = vpack.c.bf16 %v956_v55, %v955_v50  ;;  %v987_v0 = vcvt.s32.f32 %v507_v56  ;;  %v988_v1 = vcvt.s32.f32 %v508_v57  ;;  %v473_v2 = vunpack.c.2.s8 %v351_v53 }
  0x37   :  { %v1441_v4 = vpack.c.bf16 %v972_v59, %v971_v58  ;;  %v1003_v5 = vcvt.s32.f32 %v523_v60  ;;  %v1004_v6 = vcvt.s32.f32 %v524_v61  ;;  %v474_v7 = vunpack.c.3.s8 %v351_v53 }
  0x38   :  { %1676 = vmatpush.bf16.msra.mxu0 %v1433_v63  ;;  %v1449_v9 = vpack.c.bf16 %v988_v1, %v987_v0  ;;  %v953_v10 = vcvt.s32.f32 %v473_v2  ;;  %v489_v11 = vunpack.c.2.s8 %v355_v62  ;;  %v490_v12 = vunpack.c.3.s8 %v355_v62 }
  0x39   :  { %1689 = vmatpush.bf16.msra.mxu1 %v1441_v4  ;;  %v1457_v13 = vpack.c.bf16 %v1004_v6, %v1003_v5  ;;  %v954_v14 = vcvt.s32.f32 %v474_v7  ;;  %v505_v15 = vunpack.c.2.s8 %v359_v3  ;;  %v506_v16 = vunpack.c.3.s8 %v359_v3 }
  0x3a   :  { %1702 = vmatpush.bf16.msra.mxu2 %v1449_v9  ;;  %v969_v17 = vcvt.s32.f32 %v489_v11  ;;  %v970_v18 = vcvt.s32.f32 %v490_v12  ;;  %v521_v19 = vunpack.c.2.s8 %v4058_v8  ;;  %v522_v20 = vunpack.c.3.s8 %v4058_v8 }
  0x3b   :  { %1715 = vmatpush.bf16.msra.mxu3 %v1457_v13  ;;  %v1432_v21 = vpack.c.bf16 %v954_v14, %v953_v10  ;;  %v985_v22 = vcvt.s32.f32 %v505_v15  ;;  %v986_v23 = vcvt.s32.f32 %v506_v16  ;;  %v471_v24 = vunpack.c.0.s8 %v351_v53 }
  0x3c   :  { %v1440_v25 = vpack.c.bf16 %v970_v18, %v969_v17  ;;  %v1001_v26 = vcvt.s32.f32 %v521_v19  ;;  %v1002_v27 = vcvt.s32.f32 %v522_v20  ;;  %v472_v28 = vunpack.c.1.s8 %v351_v53 }
  0x3d   :  { %1677 = vmatpush.bf16.msra.mxu0 %v1432_v21  ;;  %v1448_v30 = vpack.c.bf16 %v986_v23, %v985_v22  ;;  %v951_v31 = vcvt.s32.f32 %v471_v24  ;;  %v487_v32 = vunpack.c.0.s8 %v355_v62  ;;  %v488_v33 = vunpack.c.1.s8 %v355_v62  ;;  %v373_v22 = vld [vmem:[#allocation7 + $0xb0] sm:$0xff] }
  0x3e   :  { %1690 = vmatpush.bf16.msra.mxu1 %v1440_v25  ;;  %v1456_v35 = vpack.c.bf16 %v1002_v27, %v1001_v26  ;;  %v952_v36 = vcvt.s32.f32 %v472_v28  ;;  %v503_v37 = vunpack.c.0.s8 %v359_v3  ;;  %v504_v38 = vunpack.c.1.s8 %v359_v3  ;;  %v377_v27 = vld [vmem:[#allocation7 + $0xd0] sm:$0xff] }
  0x3f   :  { %1703 = vmatpush.bf16.msra.mxu2 %v1448_v30  ;;  %v967_v39 = vcvt.s32.f32 %v487_v32  ;;  %v968_v40 = vcvt.s32.f32 %v488_v33  ;;  %v549_v41 = vunpack.c.2.s8 %v370_v29  ;;  %v550_v42 = vunpack.c.3.s8 %v370_v29  ;;  %v381_v32 = vld [vmem:[#allocation7 + $0xf0] sm:$0xff] }
  0x40   :  { %1716 = vmatpush.bf16.msra.mxu3 %v1456_v35  ;;  %v1431_v44 = vpack.c.bf16 %v952_v36, %v951_v31  ;;  %v983_v45 = vcvt.s32.f32 %v503_v37  ;;  %v984_v46 = vcvt.s32.f32 %v504_v38  ;;  %v565_v47 = vunpack.c.2.s8 %v374_v34 }
  0x41   :  { %v1439_v48 = vpack.c.bf16 %v968_v40, %v967_v39  ;;  %v1029_v49 = vcvt.s32.f32 %v549_v41  ;;  %v1030_v50 = vcvt.s32.f32 %v550_v42  ;;  %v566_v51 = vunpack.c.3.s8 %v374_v34 }
  0x42   :  { %1678 = vmatpush.bf16.msra.mxu0 %v1431_v44  ;;  %v1447_v53 = vpack.c.bf16 %v984_v46, %v983_v45  ;;  %v1045_v54 = vcvt.s32.f32 %v565_v47  ;;  %v581_v55 = vunpack.c.2.s8 %v378_v43  ;;  %v582_v56 = vunpack.c.3.s8 %v378_v43 }
  0x43   :  { %1691 = vmatpush.bf16.msra.mxu1 %v1439_v48  ;;  %v1470_v57 = vpack.c.bf16 %v1030_v50, %v1029_v49  ;;  %v1046_v58 = vcvt.s32.f32 %v566_v51  ;;  %v519_v59 = vunpack.c.0.s8 %v4058_v8  ;;  %v520_v60 = vunpack.c.1.s8 %v4058_v8  ;;  %v369_v8 = vld [vmem:[#allocation7 + $0x90] sm:$0xff] }
  0x44   :  { %1704 = vmatpush.bf16.msra.mxu2 %v1447_v53  ;;  %v1061_v61 = vcvt.s32.f32 %v581_v55  ;;  %v1062_v62 = vcvt.s32.f32 %v582_v56  ;;  %v597_v63 = vunpack.c.2.s8 %v382_v52  ;;  %v598_v0 = vunpack.c.3.s8 %v382_v52 }
  0x45   :  { %v1478_v1 = vpack.c.bf16 %v1046_v58, %v1045_v54  ;;  %v999_v2 = vcvt.s32.f32 %v519_v59  ;;  %v1000_v3 = vcvt.s32.f32 %v520_v60  ;;  %v547_v4 = vunpack.c.0.s8 %v370_v29 }
  0x46   :  { %1723 = vmatpush.bf16.msrb.mxu0 %v1470_v57  ;;  %v1486_v5 = vpack.c.bf16 %v1062_v62, %v1061_v61  ;;  %v1077_v6 = vcvt.s32.f32 %v597_v63  ;;  %v1078_v7 = vcvt.s32.f32 %v598_v0  ;;  %v548_v9 = vunpack.c.1.s8 %v370_v29  ;;  %v4064_v57 = vld [vmem:[#allocation7 + $0x88] sm:$0xff] }
  0x47   :  { %1736 = vmatpush.bf16.msrb.mxu1 %v1478_v1  ;;  %v1455_v10 = vpack.c.bf16 %v1000_v3, %v999_v2  ;;  %v1027_v11 = vcvt.s32.f32 %v547_v4  ;;  %v563_v12 = vunpack.c.0.s8 %v374_v34  ;;  %v564_v13 = vunpack.c.1.s8 %v374_v34  ;;  %v4066_v2 = vld [vmem:[#allocation7 + $0xa8] sm:$0xff] }
  0x48   :  { %1749 = vmatpush.bf16.msrb.mxu2 %v1486_v5  ;;  %v1494_v14 = vpack.c.bf16 %v1078_v7, %v1077_v6  ;;  %v1028_v15 = vcvt.s32.f32 %v548_v9  ;;  %v579_v16 = vunpack.c.0.s8 %v378_v43  ;;  %v580_v17 = vunpack.c.1.s8 %v378_v43  ;;  %v4069_v7 = vld [vmem:[#allocation7 + $0xc8] sm:$0xff] }
  0x49   :  { %1717 = vmatpush.bf16.msra.mxu3 %v1455_v10  ;;  %v1043_v18 = vcvt.s32.f32 %v563_v12  ;;  %v1044_v19 = vcvt.s32.f32 %v564_v13  ;;  %v595_v20 = vunpack.c.0.s8 %v382_v52  ;;  %v596_v21 = vunpack.c.1.s8 %v382_v52  ;;  %v4072_v13 = vld [vmem:[#allocation3 + $0x10] sm:$0xff] }
  0x4a   :  { %v1469_v23 = vpack.c.bf16 %v1028_v15, %v1027_v11  ;;  %v1059_v24 = vcvt.s32.f32 %v579_v16  ;;  %v1060_v25 = vcvt.s32.f32 %v580_v17  ;;  %v545_v26 = vunpack.c.2.s8 %v369_v8 }
  0x4b   :  { %v1477_v28 = vpack.c.bf16 %v1044_v19, %v1043_v18  ;;  %v1075_v29 = vcvt.s32.f32 %v595_v20  ;;  %v1076_v30 = vcvt.s32.f32 %v596_v21  ;;  %v546_v31 = vunpack.c.3.s8 %v369_v8 }
  0x4c   :  { %1724 = vmatpush.bf16.msrb.mxu0 %v1469_v23  ;;  %v1485_v33 = vpack.c.bf16 %v1060_v25, %v1059_v24  ;;  %v1025_v34 = vcvt.s32.f32 %v545_v26  ;;  %v561_v35 = vunpack.c.2.s8 %v373_v22  ;;  %v562_v36 = vunpack.c.3.s8 %v373_v22 }
  0x4d   :  { %1762 = vmatpush.bf16.msrb.mxu3 %v1494_v14  ;;  %1737 = vmatpush.bf16.msrb.mxu1 %v1477_v28  ;;  %v1493_v37 = vpack.c.bf16 %v1076_v30, %v1075_v29  ;;  %v1026_v38 = vcvt.s32.f32 %v546_v31  ;;  %v577_v39 = vunpack.c.2.s8 %v377_v27  ;;  %v578_v40 = vunpack.c.3.s8 %v377_v27  ;;  %v4086_v28 = vld [vmem:[#allocation3 + $0x30] sm:$0xff] }
  0x4e   :  { %1750 = vmatpush.bf16.msrb.mxu2 %v1485_v33  ;;  %v1041_v41 = vcvt.s32.f32 %v561_v35  ;;  %v1042_v42 = vcvt.s32.f32 %v562_v36  ;;  %v593_v43 = vunpack.c.2.s8 %v381_v32  ;;  %v594_v44 = vunpack.c.3.s8 %v381_v32 }
  0x4f   :  { %v1468_v45 = vpack.c.bf16 %v1026_v38, %v1025_v34  ;;  %v1057_v46 = vcvt.s32.f32 %v577_v39  ;;  %v1058_v47 = vcvt.s32.f32 %v578_v40  ;;  %v543_v48 = vunpack.c.0.s8 %v369_v8 }
  0x50   :  { %v1476_v49 = vpack.c.bf16 %v1042_v42, %v1041_v41  ;;  %v1073_v50 = vcvt.s32.f32 %v593_v43  ;;  %v1074_v51 = vcvt.s32.f32 %v594_v44  ;;  %v544_v52 = vunpack.c.1.s8 %v369_v8  ;;  %v4074_v8 = vld [vmem:[#allocation3 + $0x40] sm:$0xff] }
  0x51   :  { %1763 = vmatpush.bf16.msrb.mxu3 %v1493_v37  ;;  %1725 = vmatpush.bf16.msrb.mxu0 %v1468_v45  ;;  %v1484_v53 = vpack.c.bf16 %v1058_v47, %v1057_v46  ;;  %v1023_v54 = vcvt.s32.f32 %v543_v48  ;;  %v559_v55 = vunpack.c.0.s8 %v373_v22  ;;  %v560_v56 = vunpack.c.1.s8 %v373_v22  ;;  %v4080_v22 = vld [vmem:[#allocation7 + $0xe8] sm:$0xff]  ;;  %v4093_v37 = vld [vmem:[#allocation3 + $0x48] sm:$0xff] }
  0x52   :  { %1738 = vmatpush.bf16.msrb.mxu1 %v1476_v49  ;;  %v1492_v58 = vpack.c.bf16 %v1074_v51, %v1073_v50  ;;  %v1024_v59 = vcvt.s32.f32 %v544_v52  ;;  %v575_v60 = vunpack.c.0.s8 %v377_v27  ;;  %v576_v61 = vunpack.c.1.s8 %v377_v27  ;;  %v4084_v27 = vld [vmem:[#allocation3] sm:$0xff] }
  0x53   :  { %1751 = vmatpush.bf16.msrb.mxu2 %v1484_v53  ;;  %v1039_v62 = vcvt.s32.f32 %v559_v55  ;;  %v1040_v63 = vcvt.s32.f32 %v560_v56  ;;  %v591_v0 = vunpack.c.0.s8 %v381_v32  ;;  %v592_v1 = vunpack.c.1.s8 %v381_v32  ;;  %v4088_v32 = vld [vmem:[#allocation3 + $0x18] sm:$0xff] }
  0x54   :  { %v1467_v3 = vpack.c.bf16 %v1024_v59, %v1023_v54  ;;  %v1055_v4 = vcvt.s32.f32 %v575_v60  ;;  %v1056_v5 = vcvt.s32.f32 %v576_v61  ;;  %v541_v6 = vunpack.c.2.s8 %v4064_v57 }
  0x55   :  { %1764 = vmatpush.bf16.msrb.mxu3 %v1492_v58  ;;  %v1475_v9 = vpack.c.bf16 %v1040_v63, %v1039_v62  ;;  %v1071_v10 = vcvt.s32.f32 %v591_v0  ;;  %v1072_v11 = vcvt.s32.f32 %v592_v1  ;;  %v542_v12 = vunpack.c.3.s8 %v4064_v57 }
  0x56   :  { %1726 = vmatpush.bf16.msrb.mxu0 %v1467_v3  ;;  %v1483_v14 = vpack.c.bf16 %v1056_v5, %v1055_v4  ;;  %v1021_v15 = vcvt.s32.f32 %v541_v6  ;;  %v557_v16 = vunpack.c.2.s8 %v4066_v2  ;;  %v558_v17 = vunpack.c.3.s8 %v4066_v2 }
  0x57   :  { %1739 = vmatpush.bf16.msrb.mxu1 %v1475_v9  ;;  %v1491_v18 = vpack.c.bf16 %v1072_v11, %v1071_v10  ;;  %v1022_v19 = vcvt.s32.f32 %v542_v12  ;;  %v573_v20 = vunpack.c.2.s8 %v4069_v7  ;;  %v574_v21 = vunpack.c.3.s8 %v4069_v7 }
  0x58   :  { %1752 = vmatpush.bf16.msrb.mxu2 %v1483_v14  ;;  %v1037_v23 = vcvt.s32.f32 %v557_v16  ;;  %v1038_v24 = vcvt.s32.f32 %v558_v17  ;;  %v140_v25 = vrot.slane %v4072_v13, 4  ;;  %v176_v26 = vrot.slane %v4074_v8, 4 }
  0x59   :  { %1765 = vmatpush.bf16.msrb.mxu3 %v1491_v18  ;;  %v1466_v29 = vpack.c.bf16 %v1022_v19, %v1021_v15  ;;  %v1053_v30 = vcvt.s32.f32 %v573_v20  ;;  %v1054_v31 = vcvt.s32.f32 %v574_v21  ;;  %v589_v36 = vunpack.c.2.s8 %v4080_v22  ;;  %v4109_v18 = vld [vmem:[#allocation3 + $0x8] sm:$0xff] }
  0x5a   :  { %v1474_v33 = vpack.c.bf16 %v1038_v24, %v1037_v23  ;;  %v141_v34 = vadd.f32 %v140_v25, %v4072_v13  ;;  %v177_v35 = vadd.f32 %v176_v26, %v4074_v8  ;;  %v590_v39 = vunpack.c.3.s8 %v4080_v22  ;;  %v4111_v24 = vld [vmem:[#allocation3 + $0x38] sm:$0xff] }
  0x5b   :  { %1727 = vmatpush.bf16.msrb.mxu0 %v1466_v29  ;;  %v1482_v38 = vpack.c.bf16 %v1054_v31, %v1053_v30  ;;  %v128_v40 = vrot.slane %v4084_v27, 4  ;;  %v164_v41 = vrot.slane %v4086_v28, 4  ;;  %v1069_v44 = vcvt.s32.f32 %v589_v36 }
  0x5c   :  { %1740 = vmatpush.bf16.msrb.mxu1 %v1474_v33  ;;  %v142_v42 = vrot.slane %v141_v34, 2  ;;  %v178_v43 = vrot.slane %v177_v35, 2  ;;  %v146_v45 = vrot.slane %v4088_v32, 4  ;;  %v1070_v46 = vcvt.s32.f32 %v590_v39 }
  0x5d   :  { %1753 = vmatpush.bf16.msrb.mxu2 %v1482_v38  ;;  %v129_v47 = vadd.f32 %v128_v40, %v4084_v27  ;;  %v165_v48 = vadd.f32 %v164_v41, %v4086_v28  ;;  %v182_v49 = vrot.slane %v4093_v37, 4  ;;  %v539_v53 = vunpack.c.0.s8 %v4064_v57 }
  0x5e   :  { %v143_v50 = vadd.f32 %v142_v42, %v141_v34  ;;  %v179_v51 = vadd.f32 %v178_v43, %v177_v35  ;;  %v147_v52 = vadd.f32 %v146_v45, %v4088_v32  ;;  %v1490_v54 = vpack.c.bf16 %v1070_v46, %v1069_v44  ;;  %v367_v35 = vld [vmem:[#allocation7 + $0x80] sm:$0xff] }
  0x5f   :  { %v130_v55 = vrot.slane %v129_v47, 2  ;;  %v166_v56 = vrot.slane %v165_v48, 2  ;;  %v183_v58 = vadd.f32 %v182_v49, %v4093_v37  ;;  %v540_v62 = vunpack.c.1.s8 %v4064_v57  ;;  %v371_v45 = vld [vmem:[#allocation7 + $0xa0] sm:$0xff] }
  0x60   :  { %v144_v59 = vrot.slane %v143_v50, 1  ;;  %v180_v60 = vrot.slane %v179_v51, 1  ;;  %v148_v61 = vrot.slane %v147_v52, 2  ;;  %1766 = vmatpush.bf16.msrb.mxu3 %v1490_v54  ;;  %v1019_v3 = vcvt.s32.f32 %v539_v53  ;;  %v375_v49 = vld [vmem:[#allocation7 + $0xc0] sm:$0xff] }
  0x61   :  { %v131_v63 = vadd.f32 %v130_v55, %v129_v47  ;;  %v167_v0 = vadd.f32 %v166_v56, %v165_v48  ;;  %v184_v1 = vrot.slane %v183_v58, 2  ;;  %v1020_v9 = vcvt.s32.f32 %v540_v62 }
  0x62   :  { %v145_v4 = vadd.f32 %v144_v59, %v143_v50  ;;  %v181_v5 = vadd.f32 %v180_v60, %v179_v51  ;;  %v149_v6 = vadd.f32 %v148_v61, %v147_v52  ;;  %v555_v14 = vunpack.c.0.s8 %v4066_v2 }
  0x63   :  { %v132_v10 = vrot.slane %v131_v63, 1  ;;  %v168_v11 = vrot.slane %v167_v0, 1  ;;  %v185_v12 = vadd.f32 %v184_v1, %v183_v58  ;;  %v1465_v17 = vpack.c.bf16 %v1020_v9, %v1019_v3 }
  0x64   :  { %v215_v15 = vsel %vm212_vm0, %v181_v5, %v145_v4  ;;  %v150_v16 = vrot.slane %v149_v6, 1  ;;  %v556_v57 = vunpack.c.1.s8 %v4066_v2  ;;  %v1035_v26 = vcvt.s32.f32 %v555_v14 }
  0x65   :  { %v323_v19 = vpack.c.bf16 %v215_v15, %v215_v15  ;;  %v133_v20 = vadd.f32 %v132_v10, %v131_v63  ;;  %v169_v21 = vadd.f32 %v168_v11, %v167_v0  ;;  %v186_v23 = vrot.slane %v185_v12, 1  ;;  %1728 = vmatpush.bf16.msrb.mxu0 %v1465_v17  ;;  %v4123_v63 = vld [vmem:[#allocation7 + $0xe0] sm:$0xff] }
  0x66   :  { %v151_v25 = vadd.f32 %v150_v16, %v149_v6  ;;  %v1036_v29 = vcvt.s32.f32 %v556_v57  ;;  %v571_v30 = vunpack.c.0.s8 %v4069_v7  ;;  %v572_v2 = vunpack.c.1.s8 %v4069_v7 }
  0x67   :  { %1705 = vmatmul.bf16.vlgmr.msra.gmra.mxu2 %v323_v19  ;;  %v213_v31 = vsel %vm212_vm0, %v169_v21, %v133_v20  ;;  %v187_v33 = vadd.f32 %v186_v23, %v185_v12  ;;  %v134_v34 = vrot.slane %v4109_v18, 4  ;;  %v170_v40 = vrot.slane %v4111_v24, 4 }
  0x68   :  { %v321_v36 = vpack.c.bf16 %v213_v31, %v213_v31  ;;  %v1473_v38 = vpack.c.bf16 %v1036_v29, %v1035_v26  ;;  %v1051_v39 = vcvt.s32.f32 %v571_v30  ;;  %v1052_v42 = vcvt.s32.f32 %v572_v2  ;;  %v386_v31 = vld [vmem:[#allocation7 + $0x118] sm:$0xff] }
  0x69   :  { %v216_v41 = vsel %vm212_vm0, %v187_v33, %v151_v25  ;;  %v135_v43 = vadd.f32 %v134_v34, %v4109_v18  ;;  %v587_v44 = vunpack.c.0.s8 %v4080_v22  ;;  %v171_v7 = vadd.f32 %v170_v40, %v4111_v24 }
  0x6a   :  { %1679 = vmatmul.bf16.vlgmr.msra.gmra.mxu0 %v321_v36  ;;  %v324_v46 = vpack.c.bf16 %v216_v41, %v216_v41  ;;  %1741 = vmatpush.bf16.msrb.mxu1 %v1473_v38  ;;  %v588_v47 = vunpack.c.1.s8 %v4080_v22  ;;  %v537_v48 = vunpack.c.2.s8 %v367_v35  ;;  %v1481_v50 = vpack.c.bf16 %v1052_v42, %v1051_v39  ;;  %v390_v38 = vld [vmem:[#allocation7 + $0x138] sm:$0xff] }
  0x6b   :  { %v136_v51 = vrot.slane %v135_v43, 2  ;;  %v1067_v52 = vcvt.s32.f32 %v587_v44  ;;  %v538_v53 = vunpack.c.3.s8 %v367_v35  ;;  %v172_v54 = vrot.slane %v171_v7, 2  ;;  %v4128_v39 = vld [vmem:[#allocation7 + $0x158] sm:$0xff] }
  0x6c   :  { %1718 = vmatmul.bf16.vlgmr.msra.gmra.mxu3 %v324_v46  ;;  %v1068_v55 = vcvt.s32.f32 %v588_v47  ;;  %v1017_v56 = vcvt.s32.f32 %v537_v48  ;;  %v553_v58 = vunpack.c.2.s8 %v371_v45  ;;  %1754 = vmatpush.bf16.msrb.mxu2 %v1481_v50  ;;  %v554_v61 = vunpack.c.3.s8 %v371_v45 }
  0x6d   :  { %v137_v59 = vadd.f32 %v136_v51, %v135_v43  ;;  %v1018_v60 = vcvt.s32.f32 %v538_v53  ;;  %v569_v62 = vunpack.c.2.s8 %v375_v49  ;;  %v173_v0 = vadd.f32 %v172_v54, %v171_v7 }
  0x6e   :  { %v1489_v22 = vpack.c.bf16 %v1068_v55, %v1067_v52  ;;  %v1033_v1 = vcvt.s32.f32 %v553_v58  ;;  %v570_v3 = vunpack.c.3.s8 %v375_v49  ;;  %v1034_v6 = vcvt.s32.f32 %v554_v61 }
  0x6f   :  { %v138_v4 = vrot.slane %v137_v59, 1  ;;  %v1464_v5 = vpack.c.bf16 %v1018_v60, %v1017_v56  ;;  %v1049_v9 = vcvt.s32.f32 %v569_v62  ;;  %v174_v10 = vrot.slane %v173_v0, 1 }
  0x70   :  { %1767 = vmatpush.bf16.msrb.mxu3 %v1489_v22  ;;  %v1050_v11 = vcvt.s32.f32 %v570_v3  ;;  %v585_v12 = vunpack.c.2.s8 %v4123_v63  ;;  %v586_v14 = vunpack.c.3.s8 %v4123_v63  ;;  %v1472_v16 = vpack.c.bf16 %v1034_v6, %v1033_v1 }
  0x71   :  { %v139_v15 = vadd.f32 %v138_v4, %v137_v59  ;;  %1729 = vmatpush.bf16.msrb.mxu0 %v1464_v5  ;;  %v535_v17 = vunpack.c.0.s8 %v367_v35  ;;  %v536_v57 = vunpack.c.1.s8 %v367_v35  ;;  %v175_v19 = vadd.f32 %v174_v10, %v173_v0 }
  0x72   :  { %v1480_v20 = vpack.c.bf16 %v1050_v11, %v1049_v9  ;;  %v1065_v21 = vcvt.s32.f32 %v585_v12  ;;  %v1066_v23 = vcvt.s32.f32 %v586_v14  ;;  %1742 = vmatpush.bf16.msrb.mxu1 %v1472_v16  ;;  %v551_v29 = vunpack.c.0.s8 %v371_v45  ;;  %v4143_v16 = vld [vmem:[#allocation3 + $0x50] sm:$0xff] }
  0x73   :  { %v1015_v25 = vcvt.s32.f32 %v535_v17  ;;  %v1016_v26 = vcvt.s32.f32 %v536_v57  ;;  %v552_v30 = vunpack.c.1.s8 %v371_v45  ;;  %v214_v33 = vsel %vm212_vm0, %v175_v19, %v139_v15  ;;  %v4141_v15 = vld [vmem:[#allocation3 + $0x20] sm:$0xff] }
  0x74   :  { %1755 = vmatpush.bf16.msrb.mxu2 %v1480_v20  ;;  %v1488_v2 = vpack.c.bf16 %v1066_v23, %v1065_v21  ;;  %v567_v34 = vunpack.c.0.s8 %v375_v49  ;;  %v568_v36 = vunpack.c.1.s8 %v375_v49  ;;  %v322_v35 = vpack.c.bf16 %v214_v33, %v214_v33  ;;  %v4131_v49 = vld [vmem:[#allocation7 + $0x178] sm:$0xff] }
  0x75   :  { %v1463_v40 = vpack.c.bf16 %v1016_v26, %v1015_v25  ;;  %v1031_v41 = vcvt.s32.f32 %v551_v29  ;;  %v1032_v42 = vcvt.s32.f32 %v552_v30  ;;  %v613_v46 = vunpack.c.2.s8 %v386_v31 }
  0x76   :  { %1768 = vmatpush.bf16.msrb.mxu3 %v1488_v2  ;;  %v1047_v43 = vcvt.s32.f32 %v567_v34  ;;  %v1048_v44 = vcvt.s32.f32 %v568_v36  ;;  %v614_v7 = vunpack.c.3.s8 %v386_v31  ;;  %1692 = vmatmul.bf16.vlgmr.msra.gmra.mxu1 %v322_v35  ;;  %v629_v47 = vunpack.c.2.s8 %v390_v38 }
  0x77   :  { %1730 = vmatpush.bf16.msrb.mxu0 %v1463_v40  ;;  %v1471_v45 = vpack.c.bf16 %v1032_v42, %v1031_v41  ;;  %v630_v48 = vunpack.c.3.s8 %v390_v38  ;;  %v645_v50 = vunpack.c.2.s8 %v4128_v39  ;;  %v1093_v52 = vcvt.s32.f32 %v613_v46  ;;  %v4157_v42 = vld [vmem:[#allocation7 + $0x110] sm:$0xff] }
  0x78   :  { %v1479_v51 = vpack.c.bf16 %v1048_v44, %v1047_v43  ;;  %v1094_v53 = vcvt.s32.f32 %v614_v7  ;;  %v646_v54 = vunpack.c.3.s8 %v4128_v39  ;;  %v1109_v55 = vcvt.s32.f32 %v629_v47  ;;  %v4163_v7 = vld [vmem:[#allocation7 + $0x130] sm:$0xff] }
  0x79   :  { %1743 = vmatpush.bf16.msrb.mxu1 %v1471_v45  ;;  %v1110_v56 = vcvt.s32.f32 %v630_v48  ;;  %v1125_v58 = vcvt.s32.f32 %v645_v50  ;;  %v583_v59 = vunpack.c.0.s8 %v4123_v63  ;;  %v584_v62 = vunpack.c.1.s8 %v4123_v63 }
  0x7a   :  { %1756 = vmatpush.bf16.msrb.mxu2 %v1479_v51  ;;  %v1502_v60 = vpack.c.bf16 %v1094_v53, %v1093_v52  ;;  %v1126_v61 = vcvt.s32.f32 %v646_v54  ;;  %v661_v0 = vunpack.c.2.s8 %v4131_v49  ;;  %v662_v3 = vunpack.c.3.s8 %v4131_v49 }
  0x7b   :  { %v1510_v22 = vpack.c.bf16 %v1110_v56, %v1109_v55  ;;  %v1063_v1 = vcvt.s32.f32 %v583_v59  ;;  %v237_v4 = vrot.slane %v4086_v28, 7  ;;  %v1064_v6 = vcvt.s32.f32 %v584_v62 }
  0x7c   :  { %1775 = vmatpush.bf16.msra.mxu0 %v1502_v60  ;;  %v1518_v5 = vpack.c.bf16 %v1126_v61, %v1125_v58  ;;  %v1141_v9 = vcvt.s32.f32 %v661_v0  ;;  %v611_v10 = vunpack.c.0.s8 %v386_v31  ;;  %v1142_v11 = vcvt.s32.f32 %v662_v3  ;;  %v393_v58 = vld [vmem:[#allocation7 + $0x150] sm:$0xff] }
  0x7d   :  { %1788 = vmatpush.bf16.msra.mxu1 %v1510_v22  ;;  %v238_v12 = vsel %vm212_vm0, %v237_v4, %v4084_v27  ;;  %v612_v14 = vunpack.c.1.s8 %v386_v31  ;;  %v627_v63 = vunpack.c.0.s8 %v390_v38  ;;  %v1487_v17 = vpack.c.bf16 %v1064_v6, %v1063_v1  ;;  %v4149_v31 = vld [vmem:[#allocation3 + $0x28] sm:$0xff] }
  0x7e   :  { %1801 = vmatpush.bf16.msra.mxu2 %v1518_v5  ;;  %v327_v57 = vpack.c.bf16 %v238_v12, %v238_v12  ;;  %v1091_v28 = vcvt.s32.f32 %v611_v10  ;;  %v628_v19 = vunpack.c.1.s8 %v390_v38  ;;  %v1526_v20 = vpack.c.bf16 %v1142_v11, %v1141_v9  ;;  %v397_v10 = vld [vmem:[#allocation7 + $0x170] sm:$0xff] }
  0x7f   :  { %v1092_v21 = vcvt.s32.f32 %v612_v14  ;;  %v1107_v23 = vcvt.s32.f32 %v627_v63  ;;  %v643_v25 = vunpack.c.0.s8 %v4128_v39  ;;  %1769 = vmatpush.bf16.msrb.mxu3 %v1487_v17  ;;  %v644_v27 = vunpack.c.1.s8 %v4128_v39  ;;  %v4155_v39 = vld [vmem:[#allocation3 + $0x58] sm:$0xff] }
  0x80   :  { %1757 = vmatmul.bf16.vlgmr.msrb.gmra.mxu2 %v327_v57  ;;  %v1108_v26 = vcvt.s32.f32 %v628_v19  ;;  %v152_v29 = vrot.slane %v4141_v15, 4  ;;  %v188_v30 = vrot.slane %v4143_v16, 4  ;;  %v239_v34 = vrot.slane %v4111_v24, 7 }
  0x81   :  { %v1501_v33 = vpack.c.bf16 %v1092_v21, %v1091_v28  ;;  %v1123_v2 = vcvt.s32.f32 %v643_v25  ;;  %v659_v36 = vunpack.c.0.s8 %v4131_v49  ;;  %v1124_v35 = vcvt.s32.f32 %v644_v27 }
  0x82   :  { %v1509_v38 = vpack.c.bf16 %v1108_v26, %v1107_v23  ;;  %v153_v40 = vadd.f32 %v152_v29, %v4141_v15  ;;  %v189_v41 = vadd.f32 %v188_v30, %v4143_v16  ;;  %v240_v43 = vsel %vm212_vm0, %v239_v34, %v4109_v18 }
  0x83   :  { %1814 = vmatpush.bf16.msra.mxu3 %v1526_v20  ;;  %1776 = vmatpush.bf16.msra.mxu0 %v1501_v33  ;;  %v660_v44 = vunpack.c.1.s8 %v4131_v49  ;;  %v1139_v46 = vcvt.s32.f32 %v659_v36  ;;  %v158_v24 = vrot.slane %v4149_v31, 4  ;;  %v1517_v45 = vpack.c.bf16 %v1124_v35, %v1123_v2 }
  0x84   :  { %1789 = vmatpush.bf16.msra.mxu1 %v1509_v38  ;;  %v154_v47 = vrot.slane %v153_v40, 2  ;;  %v190_v48 = vrot.slane %v189_v41, 2  ;;  %v328_v50 = vpack.c.bf16 %v240_v43, %v240_v43  ;;  %v194_v53 = vrot.slane %v4155_v39, 4 }
  0x85   :  { %v1140_v51 = vcvt.s32.f32 %v660_v44  ;;  %v159_v52 = vadd.f32 %v158_v24, %v4149_v31  ;;  %v609_v54 = vunpack.c.2.s8 %v4157_v42  ;;  %1802 = vmatpush.bf16.msra.mxu2 %v1517_v45  ;;  %v610_v55 = vunpack.c.3.s8 %v4157_v42  ;;  %v384_v45 = vld [vmem:[#allocation7 + $0x108] sm:$0xff] }
  0x86   :  { %v155_v18 = vadd.f32 %v154_v47, %v153_v40  ;;  %v191_v49 = vadd.f32 %v190_v48, %v189_v41  ;;  %1770 = vmatmul.bf16.vlgmr.msrb.gmra.mxu3 %v328_v50  ;;  %v625_v56 = vunpack.c.2.s8 %v4163_v7  ;;  %v195_v61 = vadd.f32 %v194_v53, %v4155_v39 }
  0x87   :  { %v1525_v59 = vpack.c.bf16 %v1140_v51, %v1139_v46  ;;  %v160_v60 = vrot.slane %v159_v52, 2  ;;  %v1089_v62 = vcvt.s32.f32 %v609_v54  ;;  %v1090_v1 = vcvt.s32.f32 %v610_v55 }
  0x88   :  { %v156_v0 = vrot.slane %v155_v18, 1  ;;  %v192_v22 = vrot.slane %v191_v49, 1  ;;  %v626_v3 = vunpack.c.3.s8 %v4163_v7  ;;  %v196_v5 = vrot.slane %v195_v61, 2 }
  0x89   :  { %1815 = vmatpush.bf16.msra.mxu3 %v1525_v59  ;;  %v161_v4 = vadd.f32 %v160_v60, %v159_v52  ;;  %v1105_v6 = vcvt.s32.f32 %v625_v56  ;;  %v641_v9 = vunpack.c.2.s8 %v393_v58  ;;  %v1500_v14 = vpack.c.bf16 %v1090_v1, %v1089_v62  ;;  %v388_v52 = vld [vmem:[#allocation7 + $0x128] sm:$0xff] }
  0x8a   :  { %v157_v11 = vadd.f32 %v156_v0, %v155_v18  ;;  %v193_v12 = vadd.f32 %v192_v22, %v191_v49  ;;  %v1106_v63 = vcvt.s32.f32 %v626_v3  ;;  %v197_v57 = vadd.f32 %v196_v5, %v195_v61  ;;  %v392_v49 = vld [vmem:[#allocation7 + $0x148] sm:$0xff] }
  0x8b   :  { %v162_v17 = vrot.slane %v161_v4, 1  ;;  %v642_v28 = vunpack.c.3.s8 %v393_v58  ;;  %v1121_v19 = vcvt.s32.f32 %v641_v9  ;;  %1777 = vmatpush.bf16.msra.mxu0 %v1500_v14  ;;  %v657_v23 = vunpack.c.2.s8 %v397_v10  ;;  %v396_v22 = vld [vmem:[#allocation7 + $0x168] sm:$0xff] }
  0x8c   :  { %v217_v20 = vsel %vm212_vm0, %v193_v12, %v157_v11  ;;  %v1508_v21 = vpack.c.bf16 %v1106_v63, %v1105_v6  ;;  %v658_v25 = vunpack.c.3.s8 %v397_v10  ;;  %v198_v29 = vrot.slane %v197_v57, 1 }
  0x8d   :  { %v325_v26 = vpack.c.bf16 %v217_v20, %v217_v20  ;;  %v163_v27 = vadd.f32 %v162_v17, %v161_v4  ;;  %v1122_v30 = vcvt.s32.f32 %v642_v28  ;;  %v1137_v33 = vcvt.s32.f32 %v657_v23 }
  0x8e   :  { %1790 = vmatpush.bf16.msra.mxu1 %v1508_v21  ;;  %v1138_v2 = vcvt.s32.f32 %v658_v25  ;;  %v607_v34 = vunpack.c.0.s8 %v4157_v42  ;;  %v608_v36 = vunpack.c.1.s8 %v4157_v42  ;;  %v199_v38 = vadd.f32 %v198_v29, %v197_v57 }
  0x8f   :  { %1731 = vmatmul.bf16.vlgmr.msrb.gmra.mxu0 %v325_v26  ;;  %v1516_v35 = vpack.c.bf16 %v1122_v30, %v1121_v19  ;;  %v623_v40 = vunpack.c.0.s8 %v4163_v7  ;;  %v624_v41 = vunpack.c.1.s8 %v4163_v7  ;;  %v639_v24 = vunpack.c.0.s8 %v393_v58 }
  0x90   :  { %v1524_v43 = vpack.c.bf16 %v1138_v2, %v1137_v33  ;;  %v1087_v44 = vcvt.s32.f32 %v607_v34  ;;  %v1088_v46 = vcvt.s32.f32 %v608_v36  ;;  %v218_v47 = vsel %vm212_vm0, %v199_v38, %v163_v27  ;;  %v383_v33 = vld [vmem:[#allocation7 + $0x100] sm:$0xff] }
  0x91   :  { %1803 = vmatpush.bf16.msra.mxu2 %v1516_v35  ;;  %v1103_v48 = vcvt.s32.f32 %v623_v40  ;;  %v1104_v50 = vcvt.s32.f32 %v624_v41  ;;  %v640_v51 = vunpack.c.1.s8 %v393_v58  ;;  %v326_v42 = vpack.c.bf16 %v218_v47, %v218_v47  ;;  %v387_v35 = vld [vmem:[#allocation7 + $0x120] sm:$0xff] }
  0x92   :  { %1816 = vmatpush.bf16.msra.mxu3 %v1524_v43  ;;  %v1499_v53 = vpack.c.bf16 %v1088_v46, %v1087_v44  ;;  %v1119_v54 = vcvt.s32.f32 %v639_v24  ;;  %v655_v18 = vunpack.c.0.s8 %v397_v10  ;;  %v656_v56 = vunpack.c.1.s8 %v397_v10 }
  0x93   :  { %v1507_v55 = vpack.c.bf16 %v1104_v50, %v1103_v48  ;;  %v1120_v7 = vcvt.s32.f32 %v640_v51  ;;  %v605_v59 = vunpack.c.2.s8 %v384_v45  ;;  %1744 = vmatmul.bf16.vlgmr.msrb.gmra.mxu1 %v326_v42  ;;  %v606_v61 = vunpack.c.3.s8 %v384_v45  ;;  %v391_v48 = vld [vmem:[#allocation7 + $0x140] sm:$0xff] }
  0x94   :  { %1778 = vmatpush.bf16.msra.mxu0 %v1499_v53  ;;  %v1135_v60 = vcvt.s32.f32 %v655_v18  ;;  %v621_v62 = vunpack.c.2.s8 %v388_v52  ;;  %v622_v0 = vunpack.c.3.s8 %v388_v52  ;;  %v1136_v1 = vcvt.s32.f32 %v656_v56  ;;  %v4178_v53 = vld [vmem:[#allocation7 + $0x160] sm:$0xff] }
  0x95   :  { %1791 = vmatpush.bf16.msra.mxu1 %v1507_v55  ;;  %v1515_v58 = vpack.c.bf16 %v1120_v7, %v1119_v54  ;;  %v1085_v3 = vcvt.s32.f32 %v605_v59  ;;  %v637_v4 = vunpack.c.2.s8 %v392_v49  ;;  %v1086_v5 = vcvt.s32.f32 %v606_v61 }
  0x96   :  { %v1101_v6 = vcvt.s32.f32 %v621_v62  ;;  %v1102_v9 = vcvt.s32.f32 %v622_v0  ;;  %v638_v11 = vunpack.c.3.s8 %v392_v49  ;;  %v1523_v12 = vpack.c.bf16 %v1136_v1, %v1135_v60 }
  0x97   :  { %1804 = vmatpush.bf16.msra.mxu2 %v1515_v58  ;;  %v1117_v10 = vcvt.s32.f32 %v637_v4  ;;  %v653_v14 = vunpack.c.2.s8 %v396_v22  ;;  %v654_v63 = vunpack.c.3.s8 %v396_v22  ;;  %v1498_v17 = vpack.c.bf16 %v1086_v5, %v1085_v3 }
  0x98   :  { %v1506_v57 = vpack.c.bf16 %v1102_v9, %v1101_v6  ;;  %v1118_v28 = vcvt.s32.f32 %v638_v11  ;;  %v603_v19 = vunpack.c.0.s8 %v384_v45  ;;  %1817 = vmatpush.bf16.msra.mxu3 %v1523_v12  ;;  %v604_v23 = vunpack.c.1.s8 %v384_v45  ;;  %v4182_v12 = vld [vmem:[#allocation7 + $0x198] sm:$0xff] }
  0x99   :  { %v1133_v20 = vcvt.s32.f32 %v653_v14  ;;  %v1134_v21 = vcvt.s32.f32 %v654_v63  ;;  %v619_v25 = vunpack.c.0.s8 %v388_v52  ;;  %1779 = vmatpush.bf16.msra.mxu0 %v1498_v17  ;;  %v620_v29 = vunpack.c.1.s8 %v388_v52 }
  0x9a   :  { %1792 = vmatpush.bf16.msra.mxu1 %v1506_v57  ;;  %v1514_v26 = vpack.c.bf16 %v1118_v28, %v1117_v10  ;;  %v1083_v27 = vcvt.s32.f32 %v603_v19  ;;  %v635_v30 = vunpack.c.0.s8 %v392_v49  ;;  %v1084_v34 = vcvt.s32.f32 %v604_v23  ;;  %v4184_v57 = vld [vmem:[#allocation7 + $0x1b8] sm:$0xff] }
  0x9b   :  { %v1522_v2 = vpack.c.bf16 %v1134_v21, %v1133_v20  ;;  %v1099_v36 = vcvt.s32.f32 %v619_v25  ;;  %v636_v38 = vunpack.c.1.s8 %v392_v49  ;;  %v1100_v40 = vcvt.s32.f32 %v620_v29  ;;  %v4186_v23 = vld [vmem:[#allocation7 + $0x1d8] sm:$0xff] }
  0x9c   :  { %1805 = vmatpush.bf16.msra.mxu2 %v1514_v26  ;;  %v1115_v41 = vcvt.s32.f32 %v635_v30  ;;  %v651_v43 = vunpack.c.0.s8 %v396_v22  ;;  %v652_v44 = vunpack.c.1.s8 %v396_v22  ;;  %v1497_v46 = vpack.c.bf16 %v1084_v34, %v1083_v27 }
  0x9d   :  { %1818 = vmatpush.bf16.msra.mxu3 %v1522_v2  ;;  %v1116_v24 = vcvt.s32.f32 %v636_v38  ;;  %v601_v45 = vunpack.c.2.s8 %v383_v33  ;;  %v602_v47 = vunpack.c.3.s8 %v383_v33  ;;  %v1505_v50 = vpack.c.bf16 %v1100_v40, %v1099_v36 }
  0x9e   :  { %v1131_v51 = vcvt.s32.f32 %v651_v43  ;;  %v1132_v52 = vcvt.s32.f32 %v652_v44  ;;  %v617_v42 = vunpack.c.2.s8 %v387_v35  ;;  %1780 = vmatpush.bf16.msra.mxu0 %v1497_v46  ;;  %v618_v55 = vunpack.c.3.s8 %v387_v35 }
  0x9f   :  { %v1513_v54 = vpack.c.bf16 %v1116_v24, %v1115_v41  ;;  %v1081_v18 = vcvt.s32.f32 %v601_v45  ;;  %v1082_v49 = vcvt.s32.f32 %v602_v47  ;;  %1793 = vmatpush.bf16.msra.mxu1 %v1505_v50  ;;  %v633_v59 = vunpack.c.2.s8 %v391_v48  ;;  %v414_v24 = vld [vmem:[#allocation7 + $0x1f8] sm:$0xff] }
  0xa0   :  { %v1521_v7 = vpack.c.bf16 %v1132_v52, %v1131_v51  ;;  %v1097_v56 = vcvt.s32.f32 %v617_v42  ;;  %v634_v60 = vunpack.c.3.s8 %v391_v48  ;;  %v1098_v62 = vcvt.s32.f32 %v618_v55 }
  0xa1   :  { %1806 = vmatpush.bf16.msra.mxu2 %v1513_v54  ;;  %v1496_v61 = vpack.c.bf16 %v1082_v49, %v1081_v18  ;;  %v649_v0 = vunpack.c.2.s8 %v4178_v53  ;;  %v650_v22 = vunpack.c.3.s8 %v4178_v53  ;;  %v1113_v58 = vcvt.s32.f32 %v633_v59 }
  0xa2   :  { %1819 = vmatpush.bf16.msra.mxu3 %v1521_v7  ;;  %v1114_v1 = vcvt.s32.f32 %v634_v60  ;;  %v599_v3 = vunpack.c.0.s8 %v383_v33  ;;  %v600_v4 = vunpack.c.1.s8 %v383_v33  ;;  %v1504_v5 = vpack.c.bf16 %v1098_v62, %v1097_v56 }
  0xa3   :  { %1781 = vmatpush.bf16.msra.mxu0 %v1496_v61  ;;  %v1129_v6 = vcvt.s32.f32 %v649_v0  ;;  %v1130_v9 = vcvt.s32.f32 %v650_v22  ;;  %v615_v11 = vunpack.c.0.s8 %v387_v35  ;;  %v616_v17 = vunpack.c.1.s8 %v387_v35 }
  0xa4   :  { %v1512_v10 = vpack.c.bf16 %v1114_v1, %v1113_v58  ;;  %v1079_v14 = vcvt.s32.f32 %v599_v3  ;;  %v1080_v63 = vcvt.s32.f32 %v600_v4  ;;  %1794 = vmatpush.bf16.msra.mxu1 %v1504_v5  ;;  %v631_v20 = vunpack.c.0.s8 %v391_v48 }
  0xa5   :  { %v1520_v28 = vpack.c.bf16 %v1130_v9, %v1129_v6  ;;  %v1095_v19 = vcvt.s32.f32 %v615_v11  ;;  %v632_v21 = vunpack.c.1.s8 %v391_v48  ;;  %v1096_v26 = vcvt.s32.f32 %v616_v17 }
  0xa6   :  { %1807 = vmatpush.bf16.msra.mxu2 %v1512_v10  ;;  %v1495_v25 = vpack.c.bf16 %v1080_v63, %v1079_v14  ;;  %v677_v27 = vunpack.c.2.s8 %v4182_v12  ;;  %v678_v29 = vunpack.c.3.s8 %v4182_v12  ;;  %v1111_v30 = vcvt.s32.f32 %v631_v20  ;;  %v405_v63 = vld [vmem:[#allocation7 + $0x1b0] sm:$0xff] }
  0xa7   :  { %1820 = vmatpush.bf16.msra.mxu3 %v1520_v28  ;;  %v1112_v33 = vcvt.s32.f32 %v632_v21  ;;  %v693_v2 = vunpack.c.2.s8 %v4184_v57  ;;  %v694_v34 = vunpack.c.3.s8 %v4184_v57  ;;  %v1503_v36 = vpack.c.bf16 %v1096_v26, %v1095_v19  ;;  %v409_v19 = vld [vmem:[#allocation7 + $0x1d0] sm:$0xff] }
  0xa8   :  { %1782 = vmatpush.bf16.msra.mxu0 %v1495_v25  ;;  %v1157_v38 = vcvt.s32.f32 %v677_v27  ;;  %v1158_v35 = vcvt.s32.f32 %v678_v29  ;;  %v709_v40 = vunpack.c.2.s8 %v4186_v23  ;;  %v710_v46 = vunpack.c.3.s8 %v4186_v23 }
  0xa9   :  { %v1511_v41 = vpack.c.bf16 %v1112_v33, %v1111_v30  ;;  %v1173_v43 = vcvt.s32.f32 %v693_v2  ;;  %v1174_v44 = vcvt.s32.f32 %v694_v34  ;;  %1795 = vmatpush.bf16.msra.mxu1 %v1503_v36  ;;  %v647_v48 = vunpack.c.0.s8 %v4178_v53  ;;  %v413_v33 = vld [vmem:[#allocation7 + $0x1f0] sm:$0xff] }
  0xaa   :  { %v1534_v45 = vpack.c.bf16 %v1158_v35, %v1157_v38  ;;  %v1189_v47 = vcvt.s32.f32 %v709_v40  ;;  %v648_v50 = vunpack.c.1.s8 %v4178_v53  ;;  %v1190_v52 = vcvt.s32.f32 %v710_v46 }
  0xab   :  { %1808 = vmatpush.bf16.msra.mxu2 %v1511_v41  ;;  %v1542_v51 = vpack.c.bf16 %v1174_v44, %v1173_v43  ;;  %v241_v42 = vrot.slane %v4074_v8, 7  ;;  %v245_v54 = vrot.slane %v4143_v16, 7  ;;  %v1127_v18 = vcvt.s32.f32 %v647_v48 }
  0xac   :  { %1827 = vmatpush.bf16.msrb.mxu0 %v1534_v45  ;;  %v1128_v49 = vcvt.s32.f32 %v648_v50  ;;  %v725_v55 = vunpack.c.2.s8 %v414_v24  ;;  %v726_v7 = vunpack.c.3.s8 %v414_v24  ;;  %v1550_v56 = vpack.c.bf16 %v1190_v52, %v1189_v47 }
  0xad   :  { %1840 = vmatpush.bf16.msrb.mxu1 %v1542_v51  ;;  %v242_v59 = vsel %vm212_vm0, %v241_v42, %v4072_v13  ;;  %v246_v53 = vsel %vm212_vm0, %v245_v54, %v4141_v15  ;;  %v243_v60 = vrot.slane %v4093_v37, 7  ;;  %v247_v58 = vrot.slane %v4155_v39, 7  ;;  %v401_v39 = vld [vmem:[#allocation7 + $0x190] sm:$0xff] }
  0xae   :  { %v1519_v61 = vpack.c.bf16 %v1128_v49, %v1127_v18  ;;  %v329_v62 = vpack.c.bf16 %v242_v59, %v242_v59  ;;  %v331_v8 = vpack.c.bf16 %v246_v53, %v246_v53  ;;  %v1205_v0 = vcvt.s32.f32 %v725_v55 }
  0xaf   :  { %1853 = vmatpush.bf16.msrb.mxu2 %v1550_v56  ;;  %v1206_v16 = vcvt.s32.f32 %v726_v7  ;;  %v244_v22 = vsel %vm212_vm0, %v243_v60, %v4088_v32  ;;  %v675_v1 = vunpack.c.0.s8 %v4182_v12  ;;  %v676_v15 = vunpack.c.1.s8 %v4182_v12  ;;  %v400_v56 = vld [vmem:[#allocation7 + $0x188] sm:$0xff] }
  0xb0   :  { %1821 = vmatpush.bf16.msra.mxu3 %v1519_v61  ;;  %1783 = vmatmul.bf16.vlgmr.msra.gmra.mxu0 %v329_v62  ;;  %v330_v13 = vpack.c.bf16 %v244_v22, %v244_v22  ;;  %v691_v37 = vunpack.c.0.s8 %v4184_v57  ;;  %v692_v3 = vunpack.c.1.s8 %v4184_v57  ;;  %v248_v5 = vsel %vm212_vm0, %v247_v58, %v4149_v31  ;;  %v404_v62 = vld [vmem:[#allocation7 + $0x1a8] sm:$0xff] }
  0xb1   :  { %1809 = vmatmul.bf16.vlgmr.msra.gmra.mxu2 %v331_v8  ;;  %v1558_v4 = vpack.c.bf16 %v1206_v16, %v1205_v0  ;;  %v1155_v6 = vcvt.s32.f32 %v675_v1  ;;  %v707_v32 = vunpack.c.0.s8 %v4186_v23  ;;  %v332_v9 = vpack.c.bf16 %v248_v5, %v248_v5  ;;  %v408_v58 = vld [vmem:[#allocation7 + $0x1c8] sm:$0xff] }
  0xb2   :  { %1796 = vmatmul.bf16.vlgmr.msra.gmra.mxu1 %v330_v13  ;;  %v1156_v11 = vcvt.s32.f32 %v676_v15  ;;  %v1171_v10 = vcvt.s32.f32 %v691_v37  ;;  %v1172_v14 = vcvt.s32.f32 %v692_v3  ;;  %v708_v12 = vunpack.c.1.s8 %v4186_v23 }
  0xb3   :  { %v1187_v17 = vcvt.s32.f32 %v707_v32  ;;  %v723_v57 = vunpack.c.0.s8 %v414_v24  ;;  %v724_v28 = vunpack.c.1.s8 %v414_v24  ;;  %1822 = vmatmul.bf16.vlgmr.msra.gmra.mxu3 %v332_v9  ;;  %v673_v21 = vunpack.c.2.s8 %v401_v39  ;;  %v412_v32 = vld [vmem:[#allocation7 + $0x1e8] sm:$0xff] }
  0xb4   :  { %1866 = vmatpush.bf16.msrb.mxu3 %v1558_v4  ;;  %v1533_v20 = vpack.c.bf16 %v1156_v11, %v1155_v6  ;;  %v1541_v31 = vpack.c.bf16 %v1172_v14, %v1171_v10  ;;  %v674_v25 = vunpack.c.3.s8 %v401_v39  ;;  %v1188_v26 = vcvt.s32.f32 %v708_v12 }
  0xb5   :  { %v1203_v27 = vcvt.s32.f32 %v723_v57  ;;  %v1204_v29 = vcvt.s32.f32 %v724_v28  ;;  %v689_v30 = vunpack.c.2.s8 %v405_v63  ;;  %v1153_v2 = vcvt.s32.f32 %v673_v21 }
  0xb6   :  { %1828 = vmatpush.bf16.msrb.mxu0 %v1533_v20  ;;  %1841 = vmatpush.bf16.msrb.mxu1 %v1541_v31  ;;  %v1154_v34 = vcvt.s32.f32 %v674_v25  ;;  %v690_v36 = vunpack.c.3.s8 %v405_v63  ;;  %v705_v23 = vunpack.c.2.s8 %v409_v19  ;;  %v1549_v38 = vpack.c.bf16 %v1188_v26, %v1187_v17 }
  0xb7   :  { %v1557_v35 = vpack.c.bf16 %v1204_v29, %v1203_v27  ;;  %v1169_v40 = vcvt.s32.f32 %v689_v30  ;;  %v706_v41 = vunpack.c.3.s8 %v409_v19  ;;  %v721_v24 = vunpack.c.2.s8 %v413_v33 }
  0xb8   :  { %v1532_v43 = vpack.c.bf16 %v1154_v34, %v1153_v2  ;;  %v1170_v44 = vcvt.s32.f32 %v690_v36  ;;  %v1185_v46 = vcvt.s32.f32 %v705_v23  ;;  %1854 = vmatpush.bf16.msrb.mxu2 %v1549_v38  ;;  %v722_v47 = vunpack.c.3.s8 %v413_v33  ;;  %v399_v38 = vld [vmem:[#allocation7 + $0x180] sm:$0xff] }
  0xb9   :  { %1867 = vmatpush.bf16.msrb.mxu3 %v1557_v35  ;;  %v1186_v45 = vcvt.s32.f32 %v706_v41  ;;  %v671_v48 = vunpack.c.0.s8 %v401_v39  ;;  %v672_v50 = vunpack.c.1.s8 %v401_v39  ;;  %v1201_v52 = vcvt.s32.f32 %v721_v24 }
  0xba   :  { %1829 = vmatpush.bf16.msrb.mxu0 %v1532_v43  ;;  %v1540_v51 = vpack.c.bf16 %v1170_v44, %v1169_v40  ;;  %v687_v42 = vunpack.c.0.s8 %v405_v63  ;;  %v688_v54 = vunpack.c.1.s8 %v405_v63  ;;  %v1202_v49 = vcvt.s32.f32 %v722_v47  ;;  %v403_v44 = vld [vmem:[#allocation7 + $0x1a0] sm:$0xff] }
  0xbb   :  { %v1548_v18 = vpack.c.bf16 %v1186_v45, %v1185_v46  ;;  %v1151_v55 = vcvt.s32.f32 %v671_v48  ;;  %v1152_v7 = vcvt.s32.f32 %v672_v50  ;;  %v703_v60 = vunpack.c.0.s8 %v409_v19 }
  0xbc   :  { %1842 = vmatpush.bf16.msrb.mxu1 %v1540_v51  ;;  %v1167_v59 = vcvt.s32.f32 %v687_v42  ;;  %v1168_v53 = vcvt.s32.f32 %v688_v54  ;;  %v704_v61 = vunpack.c.1.s8 %v409_v19  ;;  %v1556_v8 = vpack.c.bf16 %v1202_v49, %v1201_v52  ;;  %v407_v42 = vld [vmem:[#allocation7 + $0x1c0] sm:$0xff] }
  0xbd   :  { %1855 = vmatpush.bf16.msrb.mxu2 %v1548_v18  ;;  %v1531_v0 = vpack.c.bf16 %v1152_v7, %v1151_v55  ;;  %v719_v16 = vunpack.c.0.s8 %v413_v33  ;;  %v720_v22 = vunpack.c.1.s8 %v413_v33  ;;  %v1183_v13 = vcvt.s32.f32 %v703_v60  ;;  %v4214_v7 = vld [vmem:[#allocation7 + $0x1e0] sm:$0xff] }
  0xbe   :  { %v1539_v1 = vpack.c.bf16 %v1168_v53, %v1167_v59  ;;  %v1184_v15 = vcvt.s32.f32 %v704_v61  ;;  %v669_v37 = vunpack.c.2.s8 %v400_v56  ;;  %1868 = vmatpush.bf16.msrb.mxu3 %v1556_v8  ;;  %v670_v5 = vunpack.c.3.s8 %v400_v56 }
  0xbf   :  { %1830 = vmatpush.bf16.msrb.mxu0 %v1531_v0  ;;  %v1199_v3 = vcvt.s32.f32 %v719_v16  ;;  %v1200_v4 = vcvt.s32.f32 %v720_v22  ;;  %v685_v6 = vunpack.c.2.s8 %v404_v62  ;;  %v686_v11 = vunpack.c.3.s8 %v404_v62 }
  0xc0   :  { %1843 = vmatpush.bf16.msrb.mxu1 %v1539_v1  ;;  %v1547_v39 = vpack.c.bf16 %v1184_v15, %v1183_v13  ;;  %v1149_v9 = vcvt.s32.f32 %v669_v37  ;;  %v701_v10 = vunpack.c.2.s8 %v408_v58  ;;  %v1150_v63 = vcvt.s32.f32 %v670_v5 }
  0xc1   :  { %v1555_v14 = vpack.c.bf16 %v1200_v4, %v1199_v3  ;;  %v1165_v12 = vcvt.s32.f32 %v685_v6  ;;  %v702_v17 = vunpack.c.3.s8 %v408_v58  ;;  %v1166_v57 = vcvt.s32.f32 %v686_v11 }
  0xc2   :  { %1856 = vmatpush.bf16.msrb.mxu2 %v1547_v39  ;;  %v1181_v28 = vcvt.s32.f32 %v701_v10  ;;  %v717_v19 = vunpack.c.2.s8 %v412_v32  ;;  %v718_v20 = vunpack.c.3.s8 %v412_v32  ;;  %v1530_v31 = vpack.c.bf16 %v1150_v63, %v1149_v9  ;;  %v4218_v39 = vld [vmem:[#allocation7 + $0x218] sm:$0xff] }
  0xc3   :  { %1869 = vmatpush.bf16.msrb.mxu3 %v1555_v14  ;;  %v1182_v21 = vcvt.s32.f32 %v702_v17  ;;  %v667_v25 = vunpack.c.0.s8 %v400_v56  ;;  %v668_v26 = vunpack.c.1.s8 %v400_v56  ;;  %v1538_v27 = vpack.c.bf16 %v1166_v57, %v1165_v12  ;;  %v4220_v63 = vld [vmem:[#allocation7 + $0x238] sm:$0xff] }
  0xc4   :  { %v1197_v29 = vcvt.s32.f32 %v717_v19  ;;  %v1198_v30 = vcvt.s32.f32 %v718_v20  ;;  %v683_v33 = vunpack.c.0.s8 %v404_v62  ;;  %1831 = vmatpush.bf16.msrb.mxu0 %v1530_v31  ;;  %v684_v23 = vunpack.c.1.s8 %v404_v62  ;;  %v4222_v19 = vld [vmem:[#allocation7 + $0x258] sm:$0xff] }
  0xc5   :  { %v1546_v2 = vpack.c.bf16 %v1182_v21, %v1181_v28  ;;  %v1147_v34 = vcvt.s32.f32 %v667_v25  ;;  %v1148_v36 = vcvt.s32.f32 %v668_v26  ;;  %1844 = vmatpush.bf16.msrb.mxu1 %v1538_v27  ;;  %v699_v41 = vunpack.c.0.s8 %v408_v58 }
  0xc6   :  { %v1554_v35 = vpack.c.bf16 %v1198_v30, %v1197_v29  ;;  %v1163_v40 = vcvt.s32.f32 %v683_v33  ;;  %v700_v43 = vunpack.c.1.s8 %v408_v58  ;;  %v1164_v24 = vcvt.s32.f32 %v684_v23 }
  0xc7   :  { %1857 = vmatpush.bf16.msrb.mxu2 %v1546_v2  ;;  %v1529_v46 = vpack.c.bf16 %v1148_v36, %v1147_v34  ;;  %v715_v45 = vunpack.c.0.s8 %v412_v32  ;;  %v716_v47 = vunpack.c.1.s8 %v412_v32  ;;  %v1179_v48 = vcvt.s32.f32 %v699_v41  ;;  %v4230_v41 = vld [vmem:[#allocation7 + $0x278] sm:$0xff] }
  0xc8   :  { %1870 = vmatpush.bf16.msrb.mxu3 %v1554_v35  ;;  %v1180_v50 = vcvt.s32.f32 %v700_v43  ;;  %v665_v51 = vunpack.c.2.s8 %v399_v38  ;;  %v666_v52 = vunpack.c.3.s8 %v399_v38  ;;  %v1537_v54 = vpack.c.bf16 %v1164_v24, %v1163_v40 }
  0xc9   :  { %1832 = vmatpush.bf16.msrb.mxu0 %v1529_v46  ;;  %v1195_v18 = vcvt.s32.f32 %v715_v45  ;;  %v1196_v49 = vcvt.s32.f32 %v716_v47  ;;  %v681_v55 = vunpack.c.2.s8 %v403_v44  ;;  %v682_v60 = vunpack.c.3.s8 %v403_v44 }
  0xca   :  { %v1545_v56 = vpack.c.bf16 %v1180_v50, %v1179_v48  ;;  %v1145_v59 = vcvt.s32.f32 %v665_v51  ;;  %v1146_v53 = vcvt.s32.f32 %v666_v52  ;;  %1845 = vmatpush.bf16.msrb.mxu1 %v1537_v54  ;;  %v697_v8 = vunpack.c.2.s8 %v407_v42  ;;  %v4234_v48 = vld [vmem:[#allocation3] sm:$0xff]  ;;  %v4237_v51 = vld [vmem:[#allocation3 + $0x10] sm:$0xff] }
  0xcb   :  { %v1553_v61 = vpack.c.bf16 %v1196_v49, %v1195_v18  ;;  %v1161_v62 = vcvt.s32.f32 %v681_v55  ;;  %v698_v0 = vunpack.c.3.s8 %v407_v42  ;;  %v1162_v22 = vcvt.s32.f32 %v682_v60  ;;  %v4250_v60 = vld [vmem:[#allocation3 + $0x8] sm:$0xff] }
  0xcc   :  { %1858 = vmatpush.bf16.msrb.mxu2 %v1545_v56  ;;  %v1528_v16 = vpack.c.bf16 %v1146_v53, %v1145_v59  ;;  %v713_v58 = vunpack.c.2.s8 %v4214_v7  ;;  %v714_v1 = vunpack.c.3.s8 %v4214_v7  ;;  %v1177_v13 = vcvt.s32.f32 %v697_v8  ;;  %v4246_v59 = vld [vmem:[#allocation3 + $0x40] sm:$0xff] }
  0xcd   :  { %1871 = vmatpush.bf16.msrb.mxu3 %v1553_v61  ;;  %v1178_v15 = vcvt.s32.f32 %v698_v0  ;;  %v663_v37 = vunpack.c.0.s8 %v399_v38  ;;  %v664_v3 = vunpack.c.1.s8 %v399_v38  ;;  %v1536_v4 = vpack.c.bf16 %v1162_v22, %v1161_v62 }
  0xce   :  { %1833 = vmatpush.bf16.msrb.mxu0 %v1528_v16  ;;  %v1193_v5 = vcvt.s32.f32 %v713_v58  ;;  %v1194_v6 = vcvt.s32.f32 %v714_v1  ;;  %v679_v32 = vunpack.c.0.s8 %v403_v44  ;;  %v680_v14 = vunpack.c.1.s8 %v403_v44  ;;  %v4253_v58 = vld [vmem:[#allocation3 + $0x38] sm:$0xff] }
  0xcf   :  { %v1544_v9 = vpack.c.bf16 %v1178_v15, %v1177_v13  ;;  %v1143_v11 = vcvt.s32.f32 %v663_v37  ;;  %v1144_v10 = vcvt.s32.f32 %v664_v3  ;;  %1846 = vmatpush.bf16.msrb.mxu1 %v1536_v4  ;;  %v695_v57 = vunpack.c.0.s8 %v407_v42  ;;  %v4257_v13 = vld [vmem:[#allocation3 + $0x18] sm:$0xff] }
  0xd0   :  { %v1552_v12 = vpack.c.bf16 %v1194_v6, %v1193_v5  ;;  %v1159_v17 = vcvt.s32.f32 %v679_v32  ;;  %v696_v28 = vunpack.c.1.s8 %v407_v42  ;;  %v1160_v31 = vcvt.s32.f32 %v680_v14 }
  0xd1   :  { %1859 = vmatpush.bf16.msrb.mxu2 %v1544_v9  ;;  %v1527_v20 = vpack.c.bf16 %v1144_v10, %v1143_v11  ;;  %v741_v21 = vunpack.c.2.s8 %v4218_v39  ;;  %v742_v25 = vunpack.c.3.s8 %v4218_v39  ;;  %v1175_v26 = vcvt.s32.f32 %v695_v57  ;;  %v4264_v9 = vld [vmem:[#allocation3 + $0x48] sm:$0xff] }
  0xd2   :  { %1872 = vmatpush.bf16.msrb.mxu3 %v1552_v12  ;;  %v1176_v27 = vcvt.s32.f32 %v696_v28  ;;  %v757_v29 = vunpack.c.2.s8 %v4220_v63  ;;  %v758_v30 = vunpack.c.3.s8 %v4220_v63  ;;  %v1535_v33 = vpack.c.bf16 %v1160_v31, %v1159_v17  ;;  %v417_v12 = vld [vmem:[#allocation7 + $0x210] sm:$0xff] }
  0xd3   :  { %1834 = vmatpush.bf16.msrb.mxu0 %v1527_v20  ;;  %v1221_v2 = vcvt.s32.f32 %v741_v21  ;;  %v1222_v34 = vcvt.s32.f32 %v742_v25  ;;  %v773_v36 = vunpack.c.2.s8 %v4222_v19  ;;  %v774_v40 = vunpack.c.3.s8 %v4222_v19  ;;  %v421_v20 = vld [vmem:[#allocation7 + $0x230] sm:$0xff] }
  0xd4   :  { %v1543_v23 = vpack.c.bf16 %v1176_v27, %v1175_v26  ;;  %v1237_v38 = vcvt.s32.f32 %v757_v29  ;;  %v1238_v35 = vcvt.s32.f32 %v758_v30  ;;  %1847 = vmatpush.bf16.msrb.mxu1 %v1535_v33  ;;  %v711_v46 = vunpack.c.0.s8 %v4214_v7  ;;  %v425_v26 = vld [vmem:[#allocation7 + $0x250] sm:$0xff] }
  0xd5   :  { %v1566_v43 = vpack.c.bf16 %v1222_v34, %v1221_v2  ;;  %v1253_v44 = vcvt.s32.f32 %v773_v36  ;;  %v712_v24 = vunpack.c.1.s8 %v4214_v7  ;;  %v1254_v47 = vcvt.s32.f32 %v774_v40  ;;  %v4242_v7 = vld [vmem:[#allocation3 + $0x30] sm:$0xff] }
  0xd6   :  { %1860 = vmatpush.bf16.msrb.mxu2 %v1543_v23  ;;  %v1574_v45 = vpack.c.bf16 %v1238_v35, %v1237_v38  ;;  %v255_v50 = vrot.slane %v4234_v48, 1  ;;  %v259_v52 = vrot.slane %v4237_v51, 1  ;;  %v1191_v42 = vcvt.s32.f32 %v711_v46  ;;  %v429_v38 = vld [vmem:[#allocation7 + $0x270] sm:$0xff] }
  0xd7   :  { %1879 = vmatpush.bf16.msra.mxu0 %v1566_v43  ;;  %v1192_v54 = vcvt.s32.f32 %v712_v24  ;;  %v789_v18 = vunpack.c.2.s8 %v4230_v41  ;;  %v790_v49 = vunpack.c.3.s8 %v4230_v41  ;;  %v1582_v55 = vpack.c.bf16 %v1254_v47, %v1253_v44 }
  0xd8   :  { %1892 = vmatpush.bf16.msra.mxu1 %v1574_v45  ;;  %v256_v56 = vsel %vm212_vm0, %v4242_v7, %v255_v50  ;;  %v260_v53 = vsel %vm212_vm0, %v4246_v59, %v259_v52  ;;  %v257_v61 = vrot.slane %v4250_v60, 1  ;;  %v261_v15 = vrot.slane %v4257_v13, 1 }
  0xd9   :  { %v1551_v62 = vpack.c.bf16 %v1192_v54, %v1191_v42  ;;  %v333_v8 = vpack.c.bf16 %v256_v56, %v256_v56  ;;  %v335_v0 = vpack.c.bf16 %v260_v53, %v260_v53  ;;  %v1269_v16 = vcvt.s32.f32 %v789_v18 }
  0xda   :  { %1905 = vmatpush.bf16.msra.mxu2 %v1582_v55  ;;  %v1270_v22 = vcvt.s32.f32 %v790_v49  ;;  %v258_v1 = vsel %vm212_vm0, %v4253_v58, %v257_v61  ;;  %v739_v37 = vunpack.c.0.s8 %v4218_v39  ;;  %v740_v4 = vunpack.c.1.s8 %v4218_v39 }
  0xdb   :  { %1873 = vmatpush.bf16.msrb.mxu3 %v1551_v62  ;;  %1835 = vmatmul.bf16.vlgmr.msrb.gmra.mxu0 %v333_v8  ;;  %v334_v3 = vpack.c.bf16 %v258_v1, %v258_v1  ;;  %v755_v5 = vunpack.c.0.s8 %v4220_v63  ;;  %v756_v6 = vunpack.c.1.s8 %v4220_v63  ;;  %v262_v11 = vsel %vm212_vm0, %v4264_v9, %v261_v15 }
  0xdc   :  { %1861 = vmatmul.bf16.vlgmr.msrb.gmra.mxu2 %v335_v0  ;;  %v1590_v32 = vpack.c.bf16 %v1270_v22, %v1269_v16  ;;  %v1219_v10 = vcvt.s32.f32 %v739_v37  ;;  %v771_v14 = vunpack.c.0.s8 %v4222_v19  ;;  %v336_v17 = vpack.c.bf16 %v262_v11, %v262_v11  ;;  %v416_v22 = vld [vmem:[#allocation7 + $0x208] sm:$0xff] }
  0xdd   :  { %1848 = vmatmul.bf16.vlgmr.msrb.gmra.mxu1 %v334_v3  ;;  %v1220_v57 = vcvt.s32.f32 %v740_v4  ;;  %v1235_v28 = vcvt.s32.f32 %v755_v5  ;;  %v1236_v39 = vcvt.s32.f32 %v756_v6  ;;  %v772_v63 = vunpack.c.1.s8 %v4222_v19  ;;  %v420_v4 = vld [vmem:[#allocation7 + $0x228] sm:$0xff] }
  0xde   :  { %v1251_v31 = vcvt.s32.f32 %v771_v14  ;;  %v787_v21 = vunpack.c.0.s8 %v4230_v41  ;;  %v788_v25 = vunpack.c.1.s8 %v4230_v41  ;;  %1874 = vmatmul.bf16.vlgmr.msrb.gmra.mxu3 %v336_v17  ;;  %v737_v30 = vunpack.c.2.s8 %v417_v12 }
  0xdf   :  { %1918 = vmatpush.bf16.msra.mxu3 %v1590_v32  ;;  %v1565_v27 = vpack.c.bf16 %v1220_v57, %v1219_v10  ;;  %v1573_v29 = vpack.c.bf16 %v1236_v39, %v1235_v28  ;;  %v738_v33 = vunpack.c.3.s8 %v417_v12  ;;  %v1252_v2 = vcvt.s32.f32 %v772_v63  ;;  %v424_v10 = vld [vmem:[#allocation7 + $0x248] sm:$0xff] }
  0xe0   :  { %v1267_v34 = vcvt.s32.f32 %v787_v21  ;;  %v1268_v36 = vcvt.s32.f32 %v788_v25  ;;  %v753_v23 = vunpack.c.2.s8 %v421_v20  ;;  %v1217_v35 = vcvt.s32.f32 %v737_v30 }
  0xe1   :  { %1880 = vmatpush.bf16.msra.mxu0 %v1565_v27  ;;  %1893 = vmatpush.bf16.msra.mxu1 %v1573_v29  ;;  %v1218_v19 = vcvt.s32.f32 %v738_v33  ;;  %v754_v40 = vunpack.c.3.s8 %v421_v20  ;;  %v769_v43 = vunpack.c.2.s8 %v425_v26  ;;  %v1581_v44 = vpack.c.bf16 %v1252_v2, %v1251_v31  ;;  %v428_v31 = vld [vmem:[#allocation7 + $0x268] sm:$0xff] }
  0xe2   :  { %v1589_v46 = vpack.c.bf16 %v1268_v36, %v1267_v34  ;;  %v1233_v41 = vcvt.s32.f32 %v753_v23  ;;  %v770_v24 = vunpack.c.3.s8 %v425_v26  ;;  %v785_v52 = vunpack.c.2.s8 %v429_v38 }
  0xe3   :  { %v1564_v45 = vpack.c.bf16 %v1218_v19, %v1217_v35  ;;  %v1234_v47 = vcvt.s32.f32 %v754_v40  ;;  %v1249_v50 = vcvt.s32.f32 %v769_v43  ;;  %1906 = vmatpush.bf16.msra.mxu2 %v1581_v44  ;;  %v786_v54 = vunpack.c.3.s8 %v429_v38 }
  0xe4   :  { %1919 = vmatpush.bf16.msra.mxu3 %v1589_v46  ;;  %v1250_v42 = vcvt.s32.f32 %v770_v24  ;;  %v735_v18 = vunpack.c.0.s8 %v417_v12  ;;  %v736_v49 = vunpack.c.1.s8 %v417_v12  ;;  %v1265_v56 = vcvt.s32.f32 %v785_v52 }
  0xe5   :  { %1881 = vmatpush.bf16.msra.mxu0 %v1564_v45  ;;  %v1572_v55 = vpack.c.bf16 %v1234_v47, %v1233_v41  ;;  %v751_v53 = vunpack.c.0.s8 %v421_v20  ;;  %v752_v61 = vunpack.c.1.s8 %v421_v20  ;;  %v1266_v8 = vcvt.s32.f32 %v786_v54 }
  0xe6   :  { %v1580_v62 = vpack.c.bf16 %v1250_v42, %v1249_v50  ;;  %v1215_v0 = vcvt.s32.f32 %v735_v18  ;;  %v1216_v16 = vcvt.s32.f32 %v736_v49  ;;  %v767_v37 = vunpack.c.0.s8 %v425_v26  ;;  %v415_v42 = vld [vmem:[#allocation7 + $0x200] sm:$0xff] }
  0xe7   :  { %1894 = vmatpush.bf16.msra.mxu1 %v1572_v55  ;;  %v1231_v1 = vcvt.s32.f32 %v751_v53  ;;  %v1232_v15 = vcvt.s32.f32 %v752_v61  ;;  %v768_v3 = vunpack.c.1.s8 %v425_v26  ;;  %v1588_v5 = vpack.c.bf16 %v1266_v8, %v1265_v56  ;;  %v419_v56 = vld [vmem:[#allocation7 + $0x220] sm:$0xff] }
  0xe8   :  { %1907 = vmatpush.bf16.msra.mxu2 %v1580_v62  ;;  %v1563_v6 = vpack.c.bf16 %v1216_v16, %v1215_v0  ;;  %v783_v32 = vunpack.c.0.s8 %v429_v38  ;;  %v784_v11 = vunpack.c.1.s8 %v429_v38  ;;  %v1247_v12 = vcvt.s32.f32 %v767_v37 }
  0xe9   :  { %v1571_v14 = vpack.c.bf16 %v1232_v15, %v1231_v1  ;;  %v1248_v17 = vcvt.s32.f32 %v768_v3  ;;  %v733_v57 = vunpack.c.2.s8 %v416_v22  ;;  %1920 = vmatpush.bf16.msra.mxu3 %v1588_v5  ;;  %v734_v20 = vunpack.c.3.s8 %v416_v22  ;;  %v423_v15 = vld [vmem:[#allocation7 + $0x240] sm:$0xff] }
  0xea   :  { %1882 = vmatpush.bf16.msra.mxu0 %v1563_v6  ;;  %v1263_v28 = vcvt.s32.f32 %v783_v32  ;;  %v1264_v39 = vcvt.s32.f32 %v784_v11  ;;  %v749_v63 = vunpack.c.2.s8 %v420_v4  ;;  %v750_v26 = vunpack.c.3.s8 %v420_v4  ;;  %v4272_v6 = vld [vmem:[#allocation7 + $0x260] sm:$0xff] }
  0xeb   :  { %1895 = vmatpush.bf16.msra.mxu1 %v1571_v14  ;;  %v1579_v21 = vpack.c.bf16 %v1248_v17, %v1247_v12  ;;  %v1213_v25 = vcvt.s32.f32 %v733_v57  ;;  %v765_v27 = vunpack.c.2.s8 %v424_v10  ;;  %v1214_v30 = vcvt.s32.f32 %v734_v20 }
  0xec   :  { %v1587_v29 = vpack.c.bf16 %v1264_v39, %v1263_v28  ;;  %v1229_v33 = vcvt.s32.f32 %v749_v63  ;;  %v766_v2 = vunpack.c.3.s8 %v424_v10  ;;  %v1230_v34 = vcvt.s32.f32 %v750_v26 }
  0xed   :  { %1908 = vmatpush.bf16.msra.mxu2 %v1579_v21  ;;  %v1245_v36 = vcvt.s32.f32 %v765_v27  ;;  %v781_v23 = vunpack.c.2.s8 %v428_v31  ;;  %v782_v38 = vunpack.c.3.s8 %v428_v31  ;;  %v1562_v35 = vpack.c.bf16 %v1214_v30, %v1213_v25 }
  0xee   :  { %1921 = vmatpush.bf16.msra.mxu3 %v1587_v29  ;;  %v1246_v19 = vcvt.s32.f32 %v766_v2  ;;  %v731_v40 = vunpack.c.0.s8 %v416_v22  ;;  %v732_v43 = vunpack.c.1.s8 %v416_v22  ;;  %v1570_v44 = vpack.c.bf16 %v1230_v34, %v1229_v33  ;;  %v4276_v34 = vld [vmem:[#allocation7 + $0x298] sm:$0xff] }
  0xef   :  { %v1261_v46 = vcvt.s32.f32 %v781_v23  ;;  %v1262_v41 = vcvt.s32.f32 %v782_v38  ;;  %v747_v24 = vunpack.c.0.s8 %v420_v4  ;;  %1883 = vmatpush.bf16.msra.mxu0 %v1562_v35  ;;  %v748_v52 = vunpack.c.1.s8 %v420_v4 }
  0xf0   :  { %v1578_v45 = vpack.c.bf16 %v1246_v19, %v1245_v36  ;;  %v1211_v47 = vcvt.s32.f32 %v731_v40  ;;  %v1212_v50 = vcvt.s32.f32 %v732_v43  ;;  %1896 = vmatpush.bf16.msra.mxu1 %v1570_v44  ;;  %v763_v49 = vunpack.c.0.s8 %v424_v10  ;;  %v4278_v19 = vld [vmem:[#allocation7 + $0x2b8] sm:$0xff] }
  0xf1   :  { %v1586_v54 = vpack.c.bf16 %v1262_v41, %v1261_v46  ;;  %v1227_v18 = vcvt.s32.f32 %v747_v24  ;;  %v764_v55 = vunpack.c.1.s8 %v424_v10  ;;  %v1228_v61 = vcvt.s32.f32 %v748_v52  ;;  %v4280_v41 = vld [vmem:[#allocation7 + $0x2d8] sm:$0xff] }
  0xf2   :  { %1909 = vmatpush.bf16.msra.mxu2 %v1578_v45  ;;  %v1561_v53 = vpack.c.bf16 %v1212_v50, %v1211_v47  ;;  %v779_v62 = vunpack.c.0.s8 %v428_v31  ;;  %v780_v8 = vunpack.c.1.s8 %v428_v31  ;;  %v1243_v0 = vcvt.s32.f32 %v763_v49 }
  0xf3   :  { %1922 = vmatpush.bf16.msra.mxu3 %v1586_v54  ;;  %v1244_v16 = vcvt.s32.f32 %v764_v55  ;;  %v729_v22 = vunpack.c.2.s8 %v415_v42  ;;  %v730_v1 = vunpack.c.3.s8 %v415_v42  ;;  %v1569_v37 = vpack.c.bf16 %v1228_v61, %v1227_v18 }
  0xf4   :  { %1884 = vmatpush.bf16.msra.mxu0 %v1561_v53  ;;  %v1259_v3 = vcvt.s32.f32 %v779_v62  ;;  %v1260_v4 = vcvt.s32.f32 %v780_v8  ;;  %v745_v5 = vunpack.c.2.s8 %v419_v56  ;;  %v746_v14 = vunpack.c.3.s8 %v419_v56 }
  0xf5   :  { %v1577_v32 = vpack.c.bf16 %v1244_v16, %v1243_v0  ;;  %v1209_v11 = vcvt.s32.f32 %v729_v22  ;;  %v1210_v10 = vcvt.s32.f32 %v730_v1  ;;  %1897 = vmatpush.bf16.msra.mxu1 %v1569_v37  ;;  %v761_v57 = vunpack.c.2.s8 %v423_v15  ;;  %v4288_v16 = vld [vmem:[#allocation7 + $0x2f8] sm:$0xff] }
  0xf6   :  { %v1585_v12 = vpack.c.bf16 %v1260_v4, %v1259_v3  ;;  %v1225_v17 = vcvt.s32.f32 %v745_v5  ;;  %v762_v28 = vunpack.c.3.s8 %v423_v15  ;;  %v1226_v20 = vcvt.s32.f32 %v746_v14  ;;  %v4292_v5 = vld [vmem:[#allocation3 + $0x20] sm:$0xff] }
  0xf7   :  { %1910 = vmatpush.bf16.msra.mxu2 %v1577_v32  ;;  %v1560_v39 = vpack.c.bf16 %v1210_v10, %v1209_v11  ;;  %v777_v63 = vunpack.c.2.s8 %v4272_v6  ;;  %v778_v31 = vunpack.c.3.s8 %v4272_v6  ;;  %v1241_v21 = vcvt.s32.f32 %v761_v57 }
  0xf8   :  { %1923 = vmatpush.bf16.msra.mxu3 %v1585_v12  ;;  %v1242_v25 = vcvt.s32.f32 %v762_v28  ;;  %v727_v26 = vunpack.c.0.s8 %v415_v42  ;;  %v728_v27 = vunpack.c.1.s8 %v415_v42  ;;  %v1568_v29 = vpack.c.bf16 %v1226_v20, %v1225_v17  ;;  %v4298_v28 = vld [vmem:[#allocation3 + $0x50] sm:$0xff]  ;;  %v4303_v20 = vld [vmem:[#allocation3 + $0x28] sm:$0xff] }
  0xf9   :  { %1885 = vmatpush.bf16.msra.mxu0 %v1560_v39  ;;  %v1257_v30 = vcvt.s32.f32 %v777_v63  ;;  %v1258_v33 = vcvt.s32.f32 %v778_v31  ;;  %v743_v2 = vunpack.c.0.s8 %v419_v56  ;;  %v744_v35 = vunpack.c.1.s8 %v419_v56 }
  0xfa   :  { %v1576_v36 = vpack.c.bf16 %v1242_v25, %v1241_v21  ;;  %v1207_v23 = vcvt.s32.f32 %v727_v26  ;;  %v1208_v38 = vcvt.s32.f32 %v728_v27  ;;  %1898 = vmatpush.bf16.msra.mxu1 %v1568_v29  ;;  %v759_v44 = vunpack.c.0.s8 %v423_v15  ;;  %v4307_v27 = vld [vmem:[#allocation3 + $0x58] sm:$0xff] }
  0xfb   :  { %v1584_v40 = vpack.c.bf16 %v1258_v33, %v1257_v30  ;;  %v1223_v43 = vcvt.s32.f32 %v743_v2  ;;  %v760_v46 = vunpack.c.1.s8 %v423_v15  ;;  %v1224_v45 = vcvt.s32.f32 %v744_v35 }
  0xfc   :  { %1911 = vmatpush.bf16.msra.mxu2 %v1576_v36  ;;  %v1559_v24 = vpack.c.bf16 %v1208_v38, %v1207_v23  ;;  %v805_v47 = vunpack.c.2.s8 %v4276_v34  ;;  %v806_v50 = vunpack.c.3.s8 %v4276_v34  ;;  %v1239_v52 = vcvt.s32.f32 %v759_v44 }
  0xfd   :  { %1924 = vmatpush.bf16.msra.mxu3 %v1584_v40  ;;  %v1240_v42 = vcvt.s32.f32 %v760_v46  ;;  %v821_v54 = vunpack.c.2.s8 %v4278_v19  ;;  %v822_v18 = vunpack.c.3.s8 %v4278_v19  ;;  %v1567_v49 = vpack.c.bf16 %v1224_v45, %v1223_v43  ;;  %v437_v45 = vld [vmem:[#allocation7 + $0x2b0] sm:$0xff] }
  0xfe   :  { %1886 = vmatpush.bf16.msra.mxu0 %v1559_v24  ;;  %v1285_v55 = vcvt.s32.f32 %v805_v47  ;;  %v1286_v56 = vcvt.s32.f32 %v806_v50  ;;  %v837_v53 = vunpack.c.2.s8 %v4280_v41  ;;  %v838_v0 = vunpack.c.3.s8 %v4280_v41 }
  0xff   :  { %v1575_v61 = vpack.c.bf16 %v1240_v42, %v1239_v52  ;;  %v1301_v62 = vcvt.s32.f32 %v821_v54  ;;  %v1302_v8 = vcvt.s32.f32 %v822_v18  ;;  %1899 = vmatpush.bf16.msra.mxu1 %v1567_v49  ;;  %v775_v15 = vunpack.c.0.s8 %v4272_v6  ;;  %v4320_v42 = vpop.f32.mrf.mxu0 }
 0x100   :  { %v1598_v22 = vpack.c.bf16 %v1286_v56, %v1285_v55  ;;  %v1317_v1 = vcvt.s32.f32 %v837_v53  ;;  %v776_v37 = vunpack.c.1.s8 %v4272_v6  ;;  %v1318_v4 = vcvt.s32.f32 %v838_v0  ;;  %v441_v55 = vld [vmem:[#allocation7 + $0x2d0] sm:$0xff] }
 0x101   :  { %1912 = vmatpush.bf16.msra.mxu2 %v1575_v61  ;;  %v1606_v3 = vpack.c.bf16 %v1302_v8, %v1301_v62  ;;  %v263_v32 = vrot.slane %v4292_v5, 1  ;;  %v273_v11 = vrot.slane %v4234_v48, 6  ;;  %v1255_v10 = vcvt.s32.f32 %v775_v15  ;;  %v445_v62 = vld [vmem:[#allocation7 + $0x2f0] sm:$0xff] }
 0x102   :  { %1931 = vmatpush.bf16.msrb.mxu0 %v1598_v22  ;;  %v1256_v14 = vcvt.s32.f32 %v776_v37  ;;  %v274_v12 = vrot.slane %v4242_v7, 5  ;;  %v853_v17 = vunpack.c.2.s8 %v4288_v16  ;;  %v1614_v57 = vpack.c.bf16 %v1318_v4, %v1317_v1 }
 0x103   :  { %1944 = vmatpush.bf16.msrb.mxu1 %v1606_v3  ;;  %v264_v6 = vsel %vm212_vm0, %v4298_v28, %v263_v32  ;;  %v854_v39 = vunpack.c.3.s8 %v4288_v16  ;;  %v265_v48 = vrot.slane %v4303_v20, 1  ;;  %v276_v30 = vrot.slane %v4250_v60, 6 }
 0x104   :  { %v1583_v63 = vpack.c.bf16 %v1256_v14, %v1255_v10  ;;  %v337_v31 = vpack.c.bf16 %v264_v6, %v264_v6  ;;  %v275_v21 = vsel %vm212_vm0, %v274_v12, %v273_v11  ;;  %v1333_v7 = vcvt.s32.f32 %v853_v17 }
 0x105   :  { %1957 = vmatpush.bf16.msrb.mxu2 %v1614_v57  ;;  %v339_v25 = vpack.c.bf16 %v275_v21, %v275_v21  ;;  %v1334_v26 = vcvt.s32.f32 %v854_v39  ;;  %v266_v29 = vsel %vm212_vm0, %v4307_v27, %v265_v48  ;;  %v277_v2 = vrot.slane %v4253_v58, 5  ;;  %v433_v58 = vld [vmem:[#allocation7 + $0x290] sm:$0xff] }
 0x106   :  { %1925 = vmatpush.bf16.msra.mxu3 %v1583_v63  ;;  %1887 = vmatmul.bf16.vlgmr.msra.gmra.mxu0 %v337_v31  ;;  %v338_v33 = vpack.c.bf16 %v266_v29, %v266_v29  ;;  %v803_v36 = vunpack.c.0.s8 %v4276_v34  ;;  %v804_v23 = vunpack.c.1.s8 %v4276_v34  ;;  %v819_v35 = vunpack.c.0.s8 %v4278_v19  ;;  %v4324_v31 = vpop.f32.mrf.mxu1 }
 0x107   :  { %1913 = vmatmul.bf16.vlgmr.msra.gmra.mxu2 %v339_v25  ;;  %v1622_v38 = vpack.c.bf16 %v1334_v26, %v1333_v7  ;;  %v820_v40 = vunpack.c.1.s8 %v4278_v19  ;;  %v835_v43 = vunpack.c.0.s8 %v4280_v41  ;;  %v278_v60 = vsel %vm212_vm0, %v277_v2, %v276_v30  ;;  %v1682_v29 = vpop.f32.mrf.mxu0 }
 0x108   :  { %1900 = vmatmul.bf16.vlgmr.msra.gmra.mxu1 %v338_v33  ;;  %v1283_v44 = vcvt.s32.f32 %v803_v36  ;;  %v1284_v46 = vcvt.s32.f32 %v804_v23  ;;  %v836_v24 = vunpack.c.1.s8 %v4280_v41  ;;  %v340_v47 = vpack.c.bf16 %v278_v60, %v278_v60  ;;  %v432_v23 = vld [vmem:[#allocation7 + $0x288] sm:$0xff] }
 0x109   :  { %v1299_v34 = vcvt.s32.f32 %v819_v35  ;;  %v1300_v50 = vcvt.s32.f32 %v820_v40  ;;  %v1315_v52 = vcvt.s32.f32 %v835_v43  ;;  %v851_v18 = vunpack.c.0.s8 %v4288_v16  ;;  %v436_v60 = vld [vmem:[#allocation7 + $0x2a8] sm:$0xff] }
 0x10a   :  { %1970 = vmatpush.bf16.msrb.mxu3 %v1622_v38  ;;  %v1597_v54 = vpack.c.bf16 %v1284_v46, %v1283_v44  ;;  %v1316_v19 = vcvt.s32.f32 %v836_v24  ;;  %v852_v49 = vunpack.c.1.s8 %v4288_v16  ;;  %v801_v53 = vunpack.c.2.s8 %v433_v58 }
 0x10b   :  { %1926 = vmatmul.bf16.vlgmr.msra.gmra.mxu3 %v340_v47  ;;  %v1605_v56 = vpack.c.bf16 %v1300_v50, %v1299_v34  ;;  %v802_v41 = vunpack.c.3.s8 %v433_v58  ;;  %v817_v61 = vunpack.c.2.s8 %v437_v45  ;;  %v1331_v0 = vcvt.s32.f32 %v851_v18  ;;  %v440_v47 = vld [vmem:[#allocation7 + $0x2c8] sm:$0xff] }
 0x10c   :  { %1932 = vmatpush.bf16.msrb.mxu0 %v1597_v54  ;;  %v1613_v8 = vpack.c.bf16 %v1316_v19, %v1315_v52  ;;  %v1332_v22 = vcvt.s32.f32 %v852_v49  ;;  %v818_v1 = vunpack.c.3.s8 %v437_v45  ;;  %v1281_v15 = vcvt.s32.f32 %v801_v53  ;;  %v444_v54 = vld [vmem:[#allocation7 + $0x2e8] sm:$0xff]  ;;  %v4326_v19 = vpop.f32.mrf.mxu2 }
 0x10d   :  { %1945 = vmatpush.bf16.msrb.mxu1 %v1605_v56  ;;  %v1282_v37 = vcvt.s32.f32 %v802_v41  ;;  %v1297_v3 = vcvt.s32.f32 %v817_v61  ;;  %v833_v4 = vunpack.c.2.s8 %v441_v55  ;;  %v834_v11 = vunpack.c.3.s8 %v441_v55 }
 0x10e   :  { %1958 = vmatpush.bf16.msrb.mxu2 %v1613_v8  ;;  %v1621_v32 = vpack.c.bf16 %v1332_v22, %v1331_v0  ;;  %v1298_v16 = vcvt.s32.f32 %v818_v1  ;;  %v849_v10 = vunpack.c.2.s8 %v445_v62  ;;  %v850_v17 = vunpack.c.3.s8 %v445_v62 }
 0x10f   :  { %v1596_v14 = vpack.c.bf16 %v1282_v37, %v1281_v15  ;;  %v1313_v12 = vcvt.s32.f32 %v833_v4  ;;  %v799_v57 = vunpack.c.0.s8 %v433_v58  ;;  %v1314_v39 = vcvt.s32.f32 %v834_v11  ;;  %v1695_v15 = vpop.f32.mrf.mxu1 }
 0x110   :  { %1971 = vmatpush.bf16.msrb.mxu3 %v1621_v32  ;;  %v1604_v6 = vpack.c.bf16 %v1298_v16, %v1297_v3  ;;  %v1329_v48 = vcvt.s32.f32 %v849_v10  ;;  %v800_v63 = vunpack.c.1.s8 %v433_v58  ;;  %v1330_v21 = vcvt.s32.f32 %v850_v17 }
 0x111   :  { %1933 = vmatpush.bf16.msrb.mxu0 %v1596_v14  ;;  %v1279_v7 = vcvt.s32.f32 %v799_v57  ;;  %v815_v25 = vunpack.c.0.s8 %v437_v45  ;;  %v816_v26 = vunpack.c.1.s8 %v437_v45  ;;  %v1612_v30 = vpack.c.bf16 %v1314_v39, %v1313_v12 }
 0x112   :  { %1946 = vmatpush.bf16.msrb.mxu1 %v1604_v6  ;;  %v1280_v33 = vcvt.s32.f32 %v800_v63  ;;  %v831_v2 = vunpack.c.0.s8 %v441_v55  ;;  %v832_v36 = vunpack.c.1.s8 %v441_v55  ;;  %v1620_v38 = vpack.c.bf16 %v1330_v21, %v1329_v48 }
 0x113   :  { %v1295_v35 = vcvt.s32.f32 %v815_v25  ;;  %v1296_v40 = vcvt.s32.f32 %v816_v26  ;;  %v847_v43 = vunpack.c.0.s8 %v445_v62  ;;  %1959 = vmatpush.bf16.msrb.mxu2 %v1612_v30  ;;  %v848_v58 = vunpack.c.1.s8 %v445_v62  ;;  %v4328_v25 = vpop.f32.mrf.mxu3 }
 0x114   :  { %v1595_v44 = vpack.c.bf16 %v1280_v33, %v1279_v7  ;;  %v1311_v46 = vcvt.s32.f32 %v831_v2  ;;  %v1312_v24 = vcvt.s32.f32 %v832_v36  ;;  %1972 = vmatpush.bf16.msrb.mxu3 %v1620_v38  ;;  %v797_v50 = vunpack.c.2.s8 %v432_v23  ;;  %v431_v7 = vld [vmem:[#allocation7 + $0x280] sm:$0xff]  ;;  %v1708_v36 = vpop.f32.mrf.mxu2 }
 0x115   :  { %v1603_v45 = vpack.c.bf16 %v1296_v40, %v1295_v35  ;;  %v1327_v34 = vcvt.s32.f32 %v847_v43  ;;  %v798_v52 = vunpack.c.3.s8 %v432_v23  ;;  %v1328_v49 = vcvt.s32.f32 %v848_v58  ;;  %v435_v2 = vld [vmem:[#allocation7 + $0x2a0] sm:$0xff] }
 0x116   :  { %1934 = vmatpush.bf16.msrb.mxu0 %v1595_v44  ;;  %v1611_v18 = vpack.c.bf16 %v1312_v24, %v1311_v46  ;;  %v813_v55 = vunpack.c.2.s8 %v436_v60  ;;  %v814_v56 = vunpack.c.3.s8 %v436_v60  ;;  %v1277_v53 = vcvt.s32.f32 %v797_v50  ;;  %v439_v43 = vld [vmem:[#allocation7 + $0x2c0] sm:$0xff] }
 0x117   :  { %1947 = vmatpush.bf16.msrb.mxu1 %v1603_v45  ;;  %v1278_v41 = vcvt.s32.f32 %v798_v52  ;;  %v829_v61 = vunpack.c.2.s8 %v440_v47  ;;  %v830_v8 = vunpack.c.3.s8 %v440_v47  ;;  %v1619_v62 = vpack.c.bf16 %v1328_v49, %v1327_v34  ;;  %v4330_v58 = vld [vmem:[#allocation7 + $0x2e0] sm:$0xff] }
 0x118   :  { %1960 = vmatpush.bf16.msrb.mxu2 %v1611_v18  ;;  %v1293_v0 = vcvt.s32.f32 %v813_v55  ;;  %v1294_v22 = vcvt.s32.f32 %v814_v56  ;;  %v845_v1 = vunpack.c.2.s8 %v444_v54  ;;  %v846_v32 = vunpack.c.3.s8 %v444_v54 }
 0x119   :  { %v1594_v37 = vpack.c.bf16 %v1278_v41, %v1277_v53  ;;  %v1309_v3 = vcvt.s32.f32 %v829_v61  ;;  %v1310_v4 = vcvt.s32.f32 %v830_v8  ;;  %1973 = vmatpush.bf16.msrb.mxu3 %v1619_v62  ;;  %v795_v10 = vunpack.c.0.s8 %v432_v23 }
 0x11a   :  { %v1602_v16 = vpack.c.bf16 %v1294_v22, %v1293_v0  ;;  %v1325_v11 = vcvt.s32.f32 %v845_v1  ;;  %v796_v14 = vunpack.c.1.s8 %v432_v23  ;;  %v1326_v17 = vcvt.s32.f32 %v846_v32 }
 0x11b   :  { %1935 = vmatpush.bf16.msrb.mxu0 %v1594_v37  ;;  %v1610_v12 = vpack.c.bf16 %v1310_v4, %v1309_v3  ;;  %v811_v57 = vunpack.c.0.s8 %v436_v60  ;;  %v812_v6 = vunpack.c.1.s8 %v436_v60  ;;  %v1275_v39 = vcvt.s32.f32 %v795_v10  ;;  %v4334_v3 = vld [vmem:[#allocation7 + $0x318] sm:$0xff]  ;;  %v1721_v4 = vpop.f32.mrf.mxu3 }
 0x11c   :  { %1948 = vmatpush.bf16.msrb.mxu1 %v1602_v16  ;;  %v1276_v48 = vcvt.s32.f32 %v796_v14  ;;  %v827_v63 = vunpack.c.0.s8 %v440_v47  ;;  %v828_v21 = vunpack.c.1.s8 %v440_v47  ;;  %v1618_v26 = vpack.c.bf16 %v1326_v17, %v1325_v11 }
 0x11d   :  { %1961 = vmatpush.bf16.msrb.mxu2 %v1610_v12  ;;  %v1291_v29 = vcvt.s32.f32 %v811_v57  ;;  %v1292_v30 = vcvt.s32.f32 %v812_v6  ;;  %v843_v33 = vunpack.c.0.s8 %v444_v54  ;;  %v844_v40 = vunpack.c.1.s8 %v444_v54  ;;  %v4336_v6 = vld [vmem:[#allocation7 + $0x338] sm:$0xff] }
 0x11e   :  { %v1593_v23 = vpack.c.bf16 %v1276_v48, %v1275_v39  ;;  %v1307_v38 = vcvt.s32.f32 %v827_v63  ;;  %v1308_v35 = vcvt.s32.f32 %v828_v21  ;;  %1974 = vmatpush.bf16.msrb.mxu3 %v1618_v26  ;;  %v793_v46 = vunpack.c.2.s8 %v431_v7  ;;  %v4338_v39 = vpop.f32.mrf.mxu0  ;;  %v4341_v26 = vld [vmem:[#allocation7 + $0x358] sm:$0xff] }
 0x11f   :  { %v1601_v60 = vpack.c.bf16 %v1292_v30, %v1291_v29  ;;  %v1323_v44 = vcvt.s32.f32 %v843_v33  ;;  %v794_v24 = vunpack.c.3.s8 %v431_v7  ;;  %v1324_v45 = vcvt.s32.f32 %v844_v40 }
 0x120   :  { %1936 = vmatpush.bf16.msrb.mxu0 %v1593_v23  ;;  %v1609_v47 = vpack.c.bf16 %v1308_v35, %v1307_v38  ;;  %v809_v34 = vunpack.c.2.s8 %v435_v2  ;;  %v810_v50 = vunpack.c.3.s8 %v435_v2  ;;  %v1273_v52 = vcvt.s32.f32 %v793_v46  ;;  %v4348_v46 = vpop.f32.mrf.mxu1 }
 0x121   :  { %1949 = vmatpush.bf16.msrb.mxu1 %v1601_v60  ;;  %v1274_v18 = vcvt.s32.f32 %v794_v24  ;;  %v825_v49 = vunpack.c.2.s8 %v439_v43  ;;  %v826_v55 = vunpack.c.3.s8 %v439_v43  ;;  %v1617_v54 = vpack.c.bf16 %v1324_v45, %v1323_v44 }
 0x122   :  { %1962 = vmatpush.bf16.msrb.mxu2 %v1609_v47  ;;  %v1289_v56 = vcvt.s32.f32 %v809_v34  ;;  %v1290_v53 = vcvt.s32.f32 %v810_v50  ;;  %v841_v41 = vunpack.c.2.s8 %v4330_v58  ;;  %v842_v0 = vunpack.c.3.s8 %v4330_v58 }
 0x123   :  { %v1592_v61 = vpack.c.bf16 %v1274_v18, %v1273_v52  ;;  %v1305_v8 = vcvt.s32.f32 %v825_v49  ;;  %v1306_v62 = vcvt.s32.f32 %v826_v55  ;;  %1975 = vmatpush.bf16.msrb.mxu3 %v1617_v54  ;;  %v791_v15 = vunpack.c.0.s8 %v431_v7  ;;  %v4354_v55 = vld [vmem:[#allocation7 + $0x378] sm:$0xff]  ;;  %v4356_v54 = vpop.f32.mrf.mxu2 }
 0x124   :  { %v1600_v22 = vpack.c.bf16 %v1290_v53, %v1289_v56  ;;  %v1321_v1 = vcvt.s32.f32 %v841_v41  ;;  %v792_v37 = vunpack.c.1.s8 %v431_v7  ;;  %v1322_v16 = vcvt.s32.f32 %v842_v0 }
 0x125   :  { %1937 = vmatpush.bf16.msrb.mxu0 %v1592_v61  ;;  %v1608_v32 = vpack.c.bf16 %v1306_v62, %v1305_v8  ;;  %v807_v11 = vunpack.c.0.s8 %v435_v2  ;;  %v808_v10 = vunpack.c.1.s8 %v435_v2  ;;  %v1271_v14 = vcvt.s32.f32 %v791_v15 }
 0x126   :  { %1950 = vmatpush.bf16.msrb.mxu1 %v1600_v22  ;;  %v1272_v12 = vcvt.s32.f32 %v792_v37  ;;  %v823_v17 = vunpack.c.0.s8 %v439_v43  ;;  %v824_v57 = vunpack.c.1.s8 %v439_v43  ;;  %v1616_v48 = vpack.c.bf16 %v1322_v16, %v1321_v1  ;;  %v1734_v0 = vpop.f32.mrf.mxu0 }
 0x127   :  { %1963 = vmatpush.bf16.msrb.mxu2 %v1608_v32  ;;  %v1287_v63 = vcvt.s32.f32 %v807_v11  ;;  %v1288_v21 = vcvt.s32.f32 %v808_v10  ;;  %v869_v7 = vunpack.c.2.s8 %v4334_v3  ;;  %v870_v2 = vunpack.c.3.s8 %v4334_v3 }
 0x128   :  { %v1591_v29 = vpack.c.bf16 %v1272_v12, %v1271_v14  ;;  %v1303_v30 = vcvt.s32.f32 %v823_v17  ;;  %v1304_v33 = vcvt.s32.f32 %v824_v57  ;;  %1976 = vmatpush.bf16.msrb.mxu3 %v1616_v48  ;;  %v885_v38 = vunpack.c.2.s8 %v4336_v6  ;;  %v1747_v17 = vpop.f32.mrf.mxu1 }
 0x129   :  { %v1599_v36 = vpack.c.bf16 %v1288_v21, %v1287_v63  ;;  %v1349_v23 = vcvt.s32.f32 %v869_v7  ;;  %v886_v35 = vunpack.c.3.s8 %v4336_v6  ;;  %v1350_v43 = vcvt.s32.f32 %v870_v2 }
 0x12a   :  { %1938 = vmatpush.bf16.msrb.mxu0 %v1591_v29  ;;  %v1607_v40 = vpack.c.bf16 %v1304_v33, %v1303_v30  ;;  %v901_v60 = vunpack.c.2.s8 %v4341_v26  ;;  %v902_v44 = vunpack.c.3.s8 %v4341_v26  ;;  %v1365_v24 = vcvt.s32.f32 %v885_v38  ;;  %v449_v29 = vld [vmem:[#allocation7 + $0x310] sm:$0xff] }
 0x12b   :  { %1951 = vmatpush.bf16.msrb.mxu1 %v1599_v36  ;;  %v1366_v47 = vcvt.s32.f32 %v886_v35  ;;  %v1694_v45 = vadd.f32 %v4324_v31, %v4320_v42  ;;  %v839_v34 = vunpack.c.0.s8 %v4330_v58  ;;  %v1630_v50 = vpack.c.bf16 %v1350_v43, %v1349_v23  ;;  %v453_v36 = vld [vmem:[#allocation7 + $0x330] sm:$0xff] }
 0x12c   :  { %1964 = vmatpush.bf16.msrb.mxu2 %v1607_v40  ;;  %v1381_v52 = vcvt.s32.f32 %v901_v60  ;;  %v1382_v18 = vcvt.s32.f32 %v902_v44  ;;  %v840_v49 = vunpack.c.1.s8 %v4330_v58  ;;  %v279_v41 = vrot.slane %v4237_v51, 6  ;;  %v457_v40 = vld [vmem:[#allocation7 + $0x350] sm:$0xff] }
 0x12d   :  { %v1638_v56 = vpack.c.bf16 %v1366_v47, %v1365_v24  ;;  %v1319_v53 = vcvt.s32.f32 %v839_v34  ;;  %v280_v61 = vrot.slane %v4246_v59, 5  ;;  %v285_v8 = vrot.slane %v4292_v5, 6  ;;  %v4368_v5 = vpop.f32.mrf.mxu3 }
 0x12e   :  { %1983 = vmatpush.bf16.msra.mxu0 %v1630_v50  ;;  %v1646_v42 = vpack.c.bf16 %v1382_v18, %v1381_v52  ;;  %v1320_v31 = vcvt.s32.f32 %v840_v49  ;;  %v286_v62 = vrot.slane %v4298_v28, 5  ;;  %v917_v22 = vunpack.c.2.s8 %v4354_v55  ;;  %v461_v52 = vld [vmem:[#allocation7 + $0x370] sm:$0xff] }
 0x12f   :  { %1996 = vmatpush.bf16.msra.mxu1 %v1638_v56  ;;  %v281_v58 = vsel %vm212_vm0, %v280_v61, %v279_v41  ;;  %v918_v1 = vunpack.c.3.s8 %v4354_v55  ;;  %v1707_v15 = vadd.f32 %v4326_v19, %v1694_v45  ;;  %v282_v4 = vrot.slane %v4257_v13, 6 }
 0x130   :  { %2009 = vmatpush.bf16.msra.mxu2 %v1646_v42  ;;  %v1615_v51 = vpack.c.bf16 %v1320_v31, %v1319_v53  ;;  %v341_v59 = vpack.c.bf16 %v281_v58, %v281_v58  ;;  %v287_v37 = vsel %vm212_vm0, %v286_v62, %v285_v8  ;;  %v1397_v32 = vcvt.s32.f32 %v917_v22 }
 0x131   :  { %v343_v28 = vpack.c.bf16 %v287_v37, %v287_v37  ;;  %v1398_v16 = vcvt.s32.f32 %v918_v1  ;;  %v283_v11 = vrot.slane %v4264_v9, 5  ;;  %v288_v10 = vrot.slane %v4303_v20, 6 }
 0x132   :  { %1977 = vmatpush.bf16.msrb.mxu3 %v1615_v51  ;;  %1939 = vmatmul.bf16.vlgmr.msrb.gmra.mxu0 %v341_v59  ;;  %v289_v19 = vrot.slane %v4307_v27, 5  ;;  %v867_v14 = vunpack.c.0.s8 %v4334_v3  ;;  %v868_v12 = vunpack.c.1.s8 %v4334_v3  ;;  %v883_v48 = vunpack.c.0.s8 %v4336_v6  ;;  %v1760_v27 = vpop.f32.mrf.mxu2 }
 0x133   :  { %1965 = vmatmul.bf16.vlgmr.msrb.gmra.mxu2 %v343_v28  ;;  %v1654_v13 = vpack.c.bf16 %v1398_v16, %v1397_v32  ;;  %v284_v57 = vsel %vm212_vm0, %v283_v11, %v282_v4  ;;  %v884_v63 = vunpack.c.1.s8 %v4336_v6  ;;  %v899_v2 = vunpack.c.0.s8 %v4341_v26 }
 0x134   :  { %v342_v9 = vpack.c.bf16 %v284_v57, %v284_v57  ;;  %v290_v21 = vsel %vm212_vm0, %v289_v19, %v288_v10  ;;  %v1347_v7 = vcvt.s32.f32 %v867_v14  ;;  %v1348_v20 = vcvt.s32.f32 %v868_v12  ;;  %v448_v12 = vld [vmem:[#allocation7 + $0x308] sm:$0xff] }
 0x135   :  { %v344_v30 = vpack.c.bf16 %v290_v21, %v290_v21  ;;  %v1363_v33 = vcvt.s32.f32 %v883_v48  ;;  %v1364_v3 = vcvt.s32.f32 %v884_v63  ;;  %v900_v38 = vunpack.c.1.s8 %v4341_v26  ;;  %v1773_v18 = vpop.f32.mrf.mxu3  ;;  %v452_v63 = vld [vmem:[#allocation7 + $0x328] sm:$0xff] }
 0x136   :  { %2022 = vmatpush.bf16.msra.mxu3 %v1654_v13  ;;  %1952 = vmatmul.bf16.vlgmr.msrb.gmra.mxu1 %v342_v9  ;;  %v1629_v23 = vpack.c.bf16 %v1348_v20, %v1347_v7  ;;  %v1720_v6 = vadd.f32 %v4328_v25, %v1707_v15  ;;  %v915_v35 = vunpack.c.0.s8 %v4354_v55  ;;  %v1379_v60 = vcvt.s32.f32 %v899_v2 }
 0x137   :  { %1978 = vmatmul.bf16.vlgmr.msrb.gmra.mxu3 %v344_v30  ;;  %v1637_v43 = vpack.c.bf16 %v1364_v3, %v1363_v33  ;;  %v916_v44 = vunpack.c.1.s8 %v4354_v55  ;;  %v865_v24 = vunpack.c.2.s8 %v449_v29  ;;  %v1380_v47 = vcvt.s32.f32 %v900_v38 }
 0x138   :  { %1984 = vmatpush.bf16.msra.mxu0 %v1629_v23  ;;  %v1395_v45 = vcvt.s32.f32 %v915_v35  ;;  %v866_v34 = vunpack.c.3.s8 %v449_v29  ;;  %v881_v50 = vunpack.c.2.s8 %v453_v36  ;;  %v882_v25 = vunpack.c.3.s8 %v453_v36  ;;  %v460_v35 = vld [vmem:[#allocation7 + $0x368] sm:$0xff] }
 0x139   :  { %1997 = vmatpush.bf16.msra.mxu1 %v1637_v43  ;;  %v1396_v26 = vcvt.s32.f32 %v916_v44  ;;  %v1345_v49 = vcvt.s32.f32 %v865_v24  ;;  %v897_v56 = vunpack.c.2.s8 %v457_v40  ;;  %v1645_v53 = vpack.c.bf16 %v1380_v47, %v1379_v60 }
 0x13a   :  { %v1346_v41 = vcvt.s32.f32 %v866_v34  ;;  %v1361_v61 = vcvt.s32.f32 %v881_v50  ;;  %v898_v42 = vunpack.c.3.s8 %v457_v40  ;;  %v1362_v8 = vcvt.s32.f32 %v882_v25 }
 0x13b   :  { %v1653_v31 = vpack.c.bf16 %v1396_v26, %v1395_v45  ;;  %v1377_v55 = vcvt.s32.f32 %v897_v56  ;;  %v913_v62 = vunpack.c.2.s8 %v461_v52  ;;  %2010 = vmatpush.bf16.msra.mxu2 %v1645_v53  ;;  %v914_v22 = vunpack.c.3.s8 %v461_v52 }
 0x13c   :  { %v1628_v0 = vpack.c.bf16 %v1346_v41, %v1345_v49  ;;  %v1378_v58 = vcvt.s32.f32 %v898_v42  ;;  %v863_v1 = vunpack.c.0.s8 %v449_v29  ;;  %v1636_v15 = vpack.c.bf16 %v1362_v8, %v1361_v61 }
 0x13d   :  { %2023 = vmatpush.bf16.msra.mxu3 %v1653_v31  ;;  %v1393_v51 = vcvt.s32.f32 %v913_v62  ;;  %v864_v59 = vunpack.c.1.s8 %v449_v29  ;;  %v879_v37 = vunpack.c.0.s8 %v453_v36  ;;  %v1394_v28 = vcvt.s32.f32 %v914_v22  ;;  %v456_v29 = vld [vmem:[#allocation7 + $0x348] sm:$0xff]  ;;  %v4387_v62 = vpop.f32.mrf.mxu0 }
 0x13e   :  { %1985 = vmatpush.bf16.msra.mxu0 %v1628_v0  ;;  %v1644_v4 = vpack.c.bf16 %v1378_v58, %v1377_v55  ;;  %v1343_v32 = vcvt.s32.f32 %v863_v1  ;;  %v880_v16 = vunpack.c.1.s8 %v453_v36  ;;  %1998 = vmatpush.bf16.msra.mxu1 %v1636_v15  ;;  %v895_v19 = vunpack.c.0.s8 %v457_v40  ;;  %v447_v55 = vld [vmem:[#allocation7 + $0x300] sm:$0xff] }
 0x13f   :  { %v1344_v11 = vcvt.s32.f32 %v864_v59  ;;  %v1359_v10 = vcvt.s32.f32 %v879_v37  ;;  %v896_v14 = vunpack.c.1.s8 %v457_v40  ;;  %v1652_v17 = vpack.c.bf16 %v1394_v28, %v1393_v51  ;;  %v451_v1 = vld [vmem:[#allocation7 + $0x320] sm:$0xff] }
 0x140   :  { %2011 = vmatpush.bf16.msra.mxu2 %v1644_v4  ;;  %v1360_v13 = vcvt.s32.f32 %v880_v16  ;;  %v911_v57 = vunpack.c.0.s8 %v461_v52  ;;  %v912_v48 = vunpack.c.1.s8 %v461_v52  ;;  %v1375_v21 = vcvt.s32.f32 %v895_v19 }
 0x141   :  { %v1627_v9 = vpack.c.bf16 %v1344_v11, %v1343_v32  ;;  %v1376_v7 = vcvt.s32.f32 %v896_v14  ;;  %v1733_v20 = vadd.f32 %v4338_v39, %v1720_v6  ;;  %2024 = vmatpush.bf16.msra.mxu3 %v1652_v17  ;;  %v861_v3 = vunpack.c.2.s8 %v448_v12  ;;  %v455_v11 = vld [vmem:[#allocation7 + $0x340] sm:$0xff] }
 0x142   :  { %v1635_v27 = vpack.c.bf16 %v1360_v13, %v1359_v10  ;;  %v1391_v30 = vcvt.s32.f32 %v911_v57  ;;  %v1392_v33 = vcvt.s32.f32 %v912_v48  ;;  %v862_v36 = vunpack.c.3.s8 %v448_v12  ;;  %v4392_v10 = vpop.f32.mrf.mxu1  ;;  %v4394_v13 = vld [vmem:[#allocation7 + $0x360] sm:$0xff] }
 0x143   :  { %1986 = vmatpush.bf16.msra.mxu0 %v1627_v9  ;;  %v1643_v2 = vpack.c.bf16 %v1376_v7, %v1375_v21  ;;  %v877_v23 = vunpack.c.2.s8 %v452_v63  ;;  %v878_v38 = vunpack.c.3.s8 %v452_v63  ;;  %v1341_v43 = vcvt.s32.f32 %v861_v3  ;;  %v4398_v3 = vpop.f32.mrf.mxu2 }
 0x144   :  { %1999 = vmatpush.bf16.msra.mxu1 %v1635_v27  ;;  %v1651_v40 = vpack.c.bf16 %v1392_v33, %v1391_v30  ;;  %v893_v60 = vunpack.c.2.s8 %v456_v29  ;;  %v894_v44 = vunpack.c.3.s8 %v456_v29  ;;  %v1342_v24 = vcvt.s32.f32 %v862_v36 }
 0x145   :  { %2012 = vmatpush.bf16.msra.mxu2 %v1643_v2  ;;  %v1357_v39 = vcvt.s32.f32 %v877_v23  ;;  %v1358_v6 = vcvt.s32.f32 %v878_v38  ;;  %v1746_v47 = vadd.f32 %v4348_v46, %v1733_v20  ;;  %v909_v50 = vunpack.c.2.s8 %v460_v35  ;;  %v4400_v2 = vpop.f32.mrf.mxu3 }
 0x146   :  { %2025 = vmatpush.bf16.msra.mxu3 %v1651_v40  ;;  %v1373_v45 = vcvt.s32.f32 %v893_v60  ;;  %v1374_v34 = vcvt.s32.f32 %v894_v44  ;;  %v910_v52 = vunpack.c.3.s8 %v460_v35  ;;  %v1626_v18 = vpack.c.bf16 %v1342_v24, %v1341_v43  ;;  %v1786_v40 = vpop.f32.mrf.mxu0 }
 0x147   :  { %v1634_v26 = vpack.c.bf16 %v1358_v6, %v1357_v39  ;;  %v1759_v49 = vadd.f32 %v4356_v54, %v1746_v47  ;;  %v859_v25 = vunpack.c.0.s8 %v448_v12  ;;  %v1389_v53 = vcvt.s32.f32 %v909_v50  ;;  %v4402_v39 = vld [vmem:[#allocation7 + $0x398] sm:$0xff] }
 0x148   :  { %v1642_v56 = vpack.c.bf16 %v1374_v34, %v1373_v45  ;;  %v1390_v41 = vcvt.s32.f32 %v910_v52  ;;  %v860_v61 = vunpack.c.1.s8 %v448_v12  ;;  %1987 = vmatpush.bf16.msra.mxu0 %v1626_v18  ;;  %v875_v31 = vunpack.c.0.s8 %v452_v63  ;;  %v4404_v50 = vld [vmem:[#allocation7 + $0x3b8] sm:$0xff] }
 0x149   :  { %2000 = vmatpush.bf16.msra.mxu1 %v1634_v26  ;;  %v1339_v42 = vcvt.s32.f32 %v859_v25  ;;  %v876_v8 = vunpack.c.1.s8 %v452_v63  ;;  %v891_v46 = vunpack.c.0.s8 %v456_v29  ;;  %v892_v22 = vunpack.c.1.s8 %v456_v29 }
 0x14a   :  { %2013 = vmatpush.bf16.msra.mxu2 %v1642_v56  ;;  %v1650_v0 = vpack.c.bf16 %v1390_v41, %v1389_v53  ;;  %v1340_v58 = vcvt.s32.f32 %v860_v61  ;;  %v4390_v54 = vadd.f32 %v4368_v5, %v1759_v49  ;;  %v1355_v15 = vcvt.s32.f32 %v875_v31  ;;  %v1799_v25 = vpop.f32.mrf.mxu1 }
 0x14b   :  { %v1356_v51 = vcvt.s32.f32 %v876_v8  ;;  %v1371_v59 = vcvt.s32.f32 %v891_v46  ;;  %v907_v37 = vunpack.c.0.s8 %v460_v35  ;;  %v1372_v28 = vcvt.s32.f32 %v892_v22 }
 0x14c   :  { %2026 = vmatpush.bf16.msra.mxu3 %v1650_v0  ;;  %v1625_v4 = vpack.c.bf16 %v1340_v58, %v1339_v42  ;;  %v908_v32 = vunpack.c.1.s8 %v460_v35  ;;  %v857_v16 = vunpack.c.2.s8 %v447_v55  ;;  %v858_v12 = vunpack.c.3.s8 %v447_v55 }
 0x14d   :  { %v1633_v19 = vpack.c.bf16 %v1356_v51, %v1355_v15  ;;  %v1387_v14 = vcvt.s32.f32 %v907_v37  ;;  %v873_v17 = vunpack.c.2.s8 %v451_v1  ;;  %v1641_v5 = vpack.c.bf16 %v1372_v28, %v1371_v59  ;;  %v1812_v37 = vpop.f32.mrf.mxu2 }
 0x14e   :  { %1988 = vmatpush.bf16.msra.mxu0 %v1625_v4  ;;  %v1388_v57 = vcvt.s32.f32 %v908_v32  ;;  %v1337_v48 = vcvt.s32.f32 %v857_v16  ;;  %v874_v63 = vunpack.c.3.s8 %v451_v1  ;;  %v1338_v9 = vcvt.s32.f32 %v858_v12  ;;  %v1825_v4 = vpop.f32.mrf.mxu3  ;;  %v3831_v16 = vld [vmem:[#allocation3] sm:$0xff] }
 0x14f   :  { %2001 = vmatpush.bf16.msra.mxu1 %v1633_v19  ;;  %v1353_v21 = vcvt.s32.f32 %v873_v17  ;;  %v889_v7 = vunpack.c.2.s8 %v455_v11  ;;  %v890_v20 = vunpack.c.3.s8 %v455_v11  ;;  %2014 = vmatpush.bf16.msra.mxu2 %v1641_v5  ;;  %v905_v30 = vunpack.c.2.s8 %v4394_v13  ;;  %v3832_v19 = vld [vmem:[#allocation3 + $0x30] sm:$0xff] }
 0x150   :  { %v1649_v29 = vpack.c.bf16 %v1388_v57, %v1387_v14  ;;  %v1354_v27 = vcvt.s32.f32 %v874_v63  ;;  %v906_v33 = vunpack.c.3.s8 %v4394_v13  ;;  %v1624_v36 = vpack.c.bf16 %v1338_v9, %v1337_v48  ;;  %v3833_v5 = vld [vmem:[#allocation3 + $0x10] sm:$0xff]  ;;  %v3834_v48 = vld [vmem:[#allocation3 + $0x40] sm:$0xff] }
 0x151   :  { %v1369_v23 = vcvt.s32.f32 %v889_v7  ;;  %v1370_v38 = vcvt.s32.f32 %v890_v20  ;;  %v855_v35 = vunpack.c.0.s8 %v447_v55  ;;  %v1385_v60 = vcvt.s32.f32 %v905_v30  ;;  %v3836_v20 = vld [vmem:[#allocation3 + $0x38] sm:$0xff] }
 0x152   :  { %2027 = vmatpush.bf16.msra.mxu3 %v1649_v29  ;;  %v1632_v43 = vpack.c.bf16 %v1354_v27, %v1353_v21  ;;  %v1386_v44 = vcvt.s32.f32 %v906_v33  ;;  %v856_v24 = vunpack.c.1.s8 %v447_v55  ;;  %1989 = vmatpush.bf16.msra.mxu0 %v1624_v36  ;;  %v871_v45 = vunpack.c.0.s8 %v451_v1  ;;  %v3835_v21 = vld [vmem:[#allocation3 + $0x8] sm:$0xff]  ;;  %v3837_v36 = vld [vmem:[#allocation3 + $0x18] sm:$0xff] }
 0x153   :  { %v1640_v6 = vpack.c.bf16 %v1370_v38, %v1369_v23  ;;  %v1335_v47 = vcvt.s32.f32 %v855_v35  ;;  %v872_v34 = vunpack.c.1.s8 %v451_v1  ;;  %v887_v26 = vunpack.c.0.s8 %v455_v11  ;;  %v465_v38 = vld [vmem:[#allocation7 + $0x390] sm:$0xff] }
 0x154   :  { %2002 = vmatpush.bf16.msra.mxu1 %v1632_v43  ;;  %v1648_v52 = vpack.c.bf16 %v1386_v44, %v1385_v60  ;;  %v1336_v18 = vcvt.s32.f32 %v856_v24  ;;  %v888_v49 = vunpack.c.1.s8 %v455_v11  ;;  %v1351_v56 = vcvt.s32.f32 %v871_v45  ;;  %v3838_v43 = vld [vmem:[#allocation3 + $0x48] sm:$0xff] }
 0x155   :  { %2015 = vmatpush.bf16.msra.mxu2 %v1640_v6  ;;  %v1352_v53 = vcvt.s32.f32 %v872_v34  ;;  %v933_v41 = vunpack.c.2.s8 %v4402_v39  ;;  %v934_v61 = vunpack.c.3.s8 %v4402_v39  ;;  %v1367_v31 = vcvt.s32.f32 %v887_v26  ;;  %v469_v34 = vld [vmem:[#allocation7 + $0x3b0] sm:$0xff] }
 0x156   :  { %2028 = vmatpush.bf16.msra.mxu3 %v1648_v52  ;;  %v1623_v42 = vpack.c.bf16 %v1336_v18, %v1335_v47  ;;  %v1368_v8 = vcvt.s32.f32 %v888_v49  ;;  %v949_v46 = vunpack.c.2.s8 %v4404_v50  ;;  %v950_v22 = vunpack.c.3.s8 %v4404_v50 }
 0x157   :  { %v1631_v55 = vpack.c.bf16 %v1352_v53, %v1351_v56  ;;  %v1413_v0 = vcvt.s32.f32 %v933_v41  ;;  %v1414_v58 = vcvt.s32.f32 %v934_v61  ;;  %v903_v51 = vunpack.c.0.s8 %v4394_v13 }
 0x158   :  { %1990 = vmatpush.bf16.msra.mxu0 %v1623_v42  ;;  %v1639_v1 = vpack.c.bf16 %v1368_v8, %v1367_v31  ;;  %v1429_v15 = vcvt.s32.f32 %v949_v46  ;;  %v904_v59 = vunpack.c.1.s8 %v4394_v13  ;;  %v1430_v32 = vcvt.s32.f32 %v950_v22  ;;  %v4420_v25 = vpop.f32.mrf.mxu0 }
 0x159   :  { %2003 = vmatpush.bf16.msra.mxu1 %v1631_v55  ;;  %v1662_v28 = vpack.c.bf16 %v1414_v58, %v1413_v0  ;;  %v297_v11 = vrot.slane %v3831_v16, 7  ;;  %v298_v14 = vrot.slane %v3832_v19, 6  ;;  %v1383_v12 = vcvt.s32.f32 %v903_v51 }
 0x15a   :  { %2016 = vmatpush.bf16.msra.mxu2 %v1639_v1  ;;  %v1384_v17 = vcvt.s32.f32 %v904_v59  ;;  %v303_v57 = vrot.slane %v3833_v5, 7  ;;  %v304_v63 = vrot.slane %v3834_v48, 6  ;;  %v1670_v9 = vpack.c.bf16 %v1430_v32, %v1429_v15  ;;  %v4422_v56 = vpop.f32.mrf.mxu1  ;;  %v464_v1 = vld [vmem:[#allocation7 + $0x388] sm:$0xff] }
 0x15b   :  { %v299_v13 = vsel %vm212_vm0, %v298_v14, %v297_v11  ;;  %v300_v7 = vrot.slane %v3835_v21, 7  ;;  %v301_v29 = vrot.slane %v3836_v20, 6  ;;  %v306_v23 = vrot.slane %v3837_v36, 7  ;;  %v467_v36 = vld [vmem:[#allocation7 + $0x3a0] sm:$0xff] }
 0x15c   :  { %2035 = vmatpush.bf16.msrb.mxu0 %v1662_v28  ;;  %v1647_v27 = vpack.c.bf16 %v1384_v17, %v1383_v12  ;;  %v345_v30 = vpack.c.bf16 %v299_v13, %v299_v13  ;;  %v305_v33 = vsel %vm212_vm0, %v304_v63, %v303_v57  ;;  %v307_v60 = vrot.slane %v3838_v43, 6  ;;  %v468_v28 = vld [vmem:[#allocation7 + $0x3a8] sm:$0xff] }
 0x15d   :  { %2048 = vmatpush.bf16.msrb.mxu1 %v1670_v9  ;;  %v347_v35 = vpack.c.bf16 %v305_v33, %v305_v33  ;;  %v302_v40 = vsel %vm212_vm0, %v301_v29, %v300_v7  ;;  %v931_v44 = vunpack.c.0.s8 %v4402_v39  ;;  %v932_v6 = vunpack.c.1.s8 %v4402_v39  ;;  %v463_v7 = vld [vmem:[#allocation7 + $0x380] sm:$0xff] }
 0x15e   :  { %2029 = vmatpush.bf16.msra.mxu3 %v1647_v27  ;;  %1991 = vmatmul.bf16.vlgmr.msra.gmra.mxu0 %v345_v30  ;;  %v346_v24 = vpack.c.bf16 %v302_v40, %v302_v40  ;;  %v947_v47 = vunpack.c.0.s8 %v4404_v50  ;;  %v948_v45 = vunpack.c.1.s8 %v4404_v50  ;;  %v308_v52 = vsel %vm212_vm0, %v307_v60, %v306_v23 }
 0x15f   :  { %2017 = vmatmul.bf16.vlgmr.msra.gmra.mxu2 %v347_v35  ;;  %v1411_v18 = vcvt.s32.f32 %v931_v44  ;;  %v929_v26 = vunpack.c.2.s8 %v465_v38  ;;  %v930_v49 = vunpack.c.3.s8 %v465_v38  ;;  %v348_v53 = vpack.c.bf16 %v308_v52, %v308_v52  ;;  %v4424_v42 = vpop.f32.mrf.mxu2 }
 0x160   :  { %2004 = vmatmul.bf16.vlgmr.msra.gmra.mxu1 %v346_v24  ;;  %v1412_v41 = vcvt.s32.f32 %v932_v6  ;;  %v1427_v61 = vcvt.s32.f32 %v947_v47  ;;  %v1428_v39 = vcvt.s32.f32 %v948_v45  ;;  %v945_v8 = vunpack.c.2.s8 %v469_v34  ;;  %v1838_v20 = vpop.f32.mrf.mxu0 }
 0x161   :  { %v1409_v31 = vcvt.s32.f32 %v929_v26  ;;  %v1410_v50 = vcvt.s32.f32 %v930_v49  ;;  %v946_v46 = vunpack.c.3.s8 %v469_v34  ;;  %2030 = vmatmul.bf16.vlgmr.msra.gmra.mxu3 %v348_v53  ;;  %v1785_v58 = vadd.f32 %v4387_v62, %v4390_v54  ;;  %v4428_v15 = vpop.f32.mrf.mxu3 }
 0x162   :  { %v1661_v55 = vpack.c.bf16 %v1412_v41, %v1411_v18  ;;  %v1669_v0 = vpack.c.bf16 %v1428_v39, %v1427_v61  ;;  %v927_v22 = vunpack.c.0.s8 %v465_v38  ;;  %v1425_v59 = vcvt.s32.f32 %v945_v8  ;;  %v1851_v29 = vpop.f32.mrf.mxu1 }
 0x163   :  { %v1660_v51 = vpack.c.bf16 %v1410_v50, %v1409_v31  ;;  %v1426_v37 = vcvt.s32.f32 %v946_v46  ;;  %v928_v4 = vunpack.c.1.s8 %v465_v38  ;;  %v943_v16 = vunpack.c.0.s8 %v469_v34 }
 0x164   :  { %2036 = vmatpush.bf16.msrb.mxu0 %v1661_v55  ;;  %2049 = vmatpush.bf16.msrb.mxu1 %v1669_v0  ;;  %v1407_v32 = vcvt.s32.f32 %v927_v22  ;;  %v944_v11 = vunpack.c.1.s8 %v469_v34  ;;  %v1798_v19 = vadd.f32 %v4392_v10, %v1785_v58  ;;  %v925_v17 = vunpack.c.2.s8 %v464_v1 }
 0x165   :  { %v1668_v14 = vpack.c.bf16 %v1426_v37, %v1425_v59  ;;  %v1408_v12 = vcvt.s32.f32 %v928_v4  ;;  %v926_v62 = vunpack.c.3.s8 %v464_v1  ;;  %v1423_v54 = vcvt.s32.f32 %v943_v16  ;;  %v3839_v59 = vld [vmem:[#allocation3 + $0x20] sm:$0xff] }
 0x166   :  { %v1424_v5 = vcvt.s32.f32 %v944_v11  ;;  %v941_v57 = vunpack.c.2.s8 %v468_v28  ;;  %v942_v48 = vunpack.c.3.s8 %v468_v28  ;;  %v1405_v9 = vcvt.s32.f32 %v925_v17  ;;  %v3841_v11 = vld [vmem:[#allocation3 + $0x28] sm:$0xff] }
 0x167   :  { %v1659_v63 = vpack.c.bf16 %v1408_v12, %v1407_v32  ;;  %v1406_v13 = vcvt.s32.f32 %v926_v62  ;;  %v1811_v21 = vadd.f32 %v4398_v3, %v1798_v19  ;;  %v923_v33 = vunpack.c.0.s8 %v464_v1  ;;  %v1864_v23 = vpop.f32.mrf.mxu2  ;;  %v3840_v32 = vld [vmem:[#allocation3 + $0x50] sm:$0xff] }
 0x168   :  { %2037 = vmatpush.bf16.msrb.mxu0 %v1660_v51  ;;  %2050 = vmatpush.bf16.msrb.mxu1 %v1668_v14  ;;  %v1667_v27 = vpack.c.bf16 %v1424_v5, %v1423_v54  ;;  %v1421_v10 = vcvt.s32.f32 %v941_v57  ;;  %v1422_v30 = vcvt.s32.f32 %v942_v48  ;;  %v924_v35 = vunpack.c.1.s8 %v464_v1  ;;  %v3842_v14 = vld [vmem:[#allocation3 + $0x58] sm:$0xff] }
 0x169   :  { %v1824_v38 = vadd.f32 %v4400_v2, %v1811_v21  ;;  %v939_v40 = vunpack.c.0.s8 %v468_v28  ;;  %v1658_v43 = vpack.c.bf16 %v1406_v13, %v1405_v9  ;;  %v940_v60 = vunpack.c.1.s8 %v468_v28  ;;  %v1877_v24 = vpop.f32.mrf.mxu3 }
 0x16a   :  { %v921_v44 = vunpack.c.2.s8 %v463_v7  ;;  %v1666_v3 = vpack.c.bf16 %v1422_v30, %v1421_v10  ;;  %v1403_v6 = vcvt.s32.f32 %v923_v33  ;;  %v922_v47 = vunpack.c.3.s8 %v463_v7  ;;  %v3285_v30 = vld [vmem:[#allocation8 + $0xf0] sm:$0xf]  ;;  %v3706_v33 = vld [vmem:[#allocation8 + $0xf4] sm:$0xf0] }
 0x16b   :  { %v937_v45 = vunpack.c.2.s8 %v467_v36  ;;  %v1404_v34 = vcvt.s32.f32 %v924_v35  ;;  %v1419_v52 = vcvt.s32.f32 %v939_v40  ;;  %v1420_v18 = vcvt.s32.f32 %v940_v60  ;;  %v3704_v35 = vld [vmem:[#allocation8 + $0xe4] sm:$0xf0]  ;;  %v3413_v40 = vld [vmem:[#allocation8 + $0x1f0] sm:$0xf]  ;;  %v3738_v60 = vld [vmem:[#allocation8 + $0x1f4] sm:$0xf0] }
 0x16c   :  { %2038 = vmatpush.bf16.msrb.mxu0 %v1659_v63  ;;  %2051 = vmatpush.bf16.msrb.mxu1 %v1667_v27  ;;  %v938_v26 = vunpack.c.3.s8 %v467_v36  ;;  %v1401_v49 = vcvt.s32.f32 %v921_v44  ;;  %v1402_v53 = vcvt.s32.f32 %v922_v47  ;;  %v919_v41 = vunpack.c.0.s8 %v463_v7  ;;  %v3221_v44 = vld [vmem:[#allocation8 + $0x70] sm:$0xf]  ;;  %v3690_v24 = vld [vmem:[#allocation8 + $0x74] sm:$0xf0] }
 0x16d   :  { %v920_v2 = vunpack.c.1.s8 %v463_v7  ;;  %v1417_v61 = vcvt.s32.f32 %v937_v45  ;;  %v935_v31 = vunpack.c.0.s8 %v467_v36  ;;  %v1657_v50 = vpack.c.bf16 %v1404_v34, %v1403_v6  ;;  %v3269_v47 = vld [vmem:[#allocation8 + $0xd0] sm:$0xf]  ;;  %v3702_v45 = vld [vmem:[#allocation8 + $0xd4] sm:$0xf0]  ;;  %v3405_v34 = vld [vmem:[#allocation8 + $0x1e0] sm:$0xf] }
 0x16e   :  { %v1418_v39 = vcvt.s32.f32 %v938_v26  ;;  %v1665_v8 = vpack.c.bf16 %v1420_v18, %v1419_v52  ;;  %v936_v46 = vunpack.c.1.s8 %v467_v36  ;;  %v1837_v55 = vadd.f32 %v4420_v25, %v1824_v38  ;;  %v3277_v38 = vld [vmem:[#allocation8 + $0xe0] sm:$0xf]  ;;  %v3736_v18 = vld [vmem:[#allocation8 + $0x1e4] sm:$0xf0] }
 0x16f   :  { %v1656_v0 = vpack.c.bf16 %v1402_v53, %v1401_v49  ;;  %v1399_v58 = vcvt.s32.f32 %v919_v41  ;;  %v1400_v22 = vcvt.s32.f32 %v920_v2  ;;  %v1415_v51 = vcvt.s32.f32 %v935_v31  ;;  %v3213_v26 = vld [vmem:[#allocation8 + $0x60] sm:$0xf]  ;;  %v3688_v49 = vld [vmem:[#allocation8 + $0x64] sm:$0xf0]  ;;  %v3734_v31 = vld [vmem:[#allocation8 + $0x1d4] sm:$0xf0] }
 0x170   :  { %2039 = vmatpush.bf16.msrb.mxu0 %v1658_v43  ;;  %2052 = vmatpush.bf16.msrb.mxu1 %v1666_v3  ;;  %v1664_v1 = vpack.c.bf16 %v1418_v39, %v1417_v61  ;;  %v309_v37 = vrot.slane %v3839_v59, 7  ;;  %v1850_v4 = vadd.f32 %v4422_v56, %v1837_v55  ;;  %v1416_v28 = vcvt.s32.f32 %v936_v46  ;;  %v3261_v2 = vld [vmem:[#allocation8 + $0xc0] sm:$0xf]  ;;  %v3700_v61 = vld [vmem:[#allocation8 + $0xc4] sm:$0xf0] }
 0x171   :  { %v310_v16 = vrot.slane %v3840_v32, 6  ;;  %v312_v19 = vrot.slane %v3841_v11, 7  ;;  %v313_v12 = vrot.slane %v3842_v14, 6  ;;  %v1655_v17 = vpack.c.bf16 %v1400_v22, %v1399_v58  ;;  %v3397_v39 = vld [vmem:[#allocation8 + $0x1d0] sm:$0xf] }
 0x172   :  { %v1863_v25 = vadd.f32 %v4424_v42, %v1850_v4  ;;  %v1663_v54 = vpack.c.bf16 %v1416_v28, %v1415_v51  ;;  %v3286_v36 = vor.u32 %v3706_v33, %v3285_v30  ;;  %v3278_v43 = vor.u32 %v3704_v35, %v3277_v38  ;;  %v3349_v55 = vld [vmem:[#allocation8 + $0x170] sm:$0xf]  ;;  %v3698_v51 = vld [vmem:[#allocation8 + $0xb4] sm:$0xf0]  ;;  %v3389_v59 = vld [vmem:[#allocation8 + $0x1c0] sm:$0xf] }
 0x173   :  { %v311_v5 = vsel %vm212_vm0, %v310_v16, %v309_v37  ;;  %v314_v56 = vsel %vm212_vm0, %v313_v12, %v312_v19  ;;  %v3414_v3 = vor.u32 %v3738_v60, %v3413_v40  ;;  %v3222_v6 = vor.u32 %v3690_v24, %v3221_v44  ;;  %v3732_v4 = vld [vmem:[#allocation8 + $0x1c4] sm:$0xf0]  ;;  %v3197_v28 = vld [vmem:[#allocation8 + $0x40] sm:$0xf]  ;;  %v3718_v38 = vld [vmem:[#allocation8 + $0x154] sm:$0xf0] }
 0x174   :  { %2040 = vmatpush.bf16.msrb.mxu0 %v1657_v50  ;;  %2053 = vmatpush.bf16.msrb.mxu1 %v1665_v8  ;;  %v1876_v62 = vadd.f32 %v4428_v15, %v1863_v25  ;;  %v349_v57 = vpack.c.bf16 %v311_v5, %v311_v5  ;;  %v350_v48 = vpack.c.bf16 %v314_v56, %v314_v56  ;;  %v3205_v50 = vld [vmem:[#allocation8 + $0x50] sm:$0xf]  ;;  %v3686_v8 = vld [vmem:[#allocation8 + $0x54] sm:$0xf0]  ;;  %v3684_v32 = vld [vmem:[#allocation8 + $0x44] sm:$0xf0] }
 0x175   :  { %2806 = vmatpush.bf16.msrb.mxu3 %v3286_v36  ;;  %v3270_v52 = vor.u32 %v3702_v45, %v3269_v47  ;;  %2793 = vmatpush.bf16.msrb.mxu2 %v3222_v6  ;;  %v3406_v53 = vor.u32 %v3736_v18, %v3405_v34  ;;  %v3214_v41 = vor.u32 %v3688_v49, %v3213_v26  ;;  %v3341_v16 = vld [vmem:[#allocation8 + $0x160] sm:$0xf]  ;;  %v3720_v11 = vld [vmem:[#allocation8 + $0x164] sm:$0xf0]  ;;  %v3730_v5 = vld [vmem:[#allocation8 + $0x1b4] sm:$0xf0] }
 0x176   :  { %v3262_v46 = vor.u32 %v3700_v61, %v3261_v2  ;;  %v3398_v58 = vor.u32 %v3734_v31, %v3397_v39  ;;  %v3206_v22 = vor.u32 %v3686_v8, %v3205_v50  ;;  %v3342_v14 = vor.u32 %v3720_v11, %v3341_v16  ;;  %v3189_v56 = vld [vmem:[#allocation8 + $0x30] sm:$0xf]  ;;  %v3373_v30 = vld [vmem:[#allocation8 + $0x1a0] sm:$0xf]  ;;  %v3728_v36 = vld [vmem:[#allocation8 + $0x1a4] sm:$0xf0] }
 0x177   :  { %v3390_v12 = vor.u32 %v3732_v4, %v3389_v59  ;;  %v3198_v25 = vor.u32 %v3684_v32, %v3197_v28  ;;  %v3374_v40 = vor.u32 %v3728_v36, %v3373_v30  ;;  %v3181_v60 = vld [vmem:[#allocation8 + $0x20] sm:$0xf]  ;;  %v3680_v44 = vld [vmem:[#allocation8 + $0x24] sm:$0xf0]  ;;  %v3365_v47 = vld [vmem:[#allocation8 + $0x190] sm:$0xf] }
 0x178   :  { %2041 = vmatpush.bf16.msrb.mxu0 %v1656_v0  ;;  %2054 = vmatpush.bf16.msrb.mxu1 %v1664_v1  ;;  %v3722_v0 = vld [vmem:[#allocation8 + $0x174] sm:$0xf0]  ;;  %v3253_v1 = vld [vmem:[#allocation8 + $0xb0] sm:$0xf]  ;;  %v3229_v24 = vld [vmem:[#allocation8 + $0x80] sm:$0xf] }
 0x179   :  { %2807 = vmatpush.bf16.msrb.mxu3 %v3278_v43  ;;  %2794 = vmatpush.bf16.msrb.mxu2 %v3214_v41  ;;  %v3350_v37 = vor.u32 %v3722_v0, %v3349_v55  ;;  %v3254_v19 = vor.u32 %v3698_v51, %v3253_v1  ;;  %v3692_v6 = vld [vmem:[#allocation8 + $0x84] sm:$0xf0]  ;;  %v3726_v45 = vld [vmem:[#allocation8 + $0x194] sm:$0xf0]  ;;  %v3325_v18 = vld [vmem:[#allocation8 + $0x140] sm:$0xf] }
 0x17a   :  { %v3230_v34 = vor.u32 %v3692_v6, %v3229_v24  ;;  %v3716_v26 = vld [vmem:[#allocation8 + $0x144] sm:$0xf0]  ;;  %v3541_v49 = vld [vmem:[#allocation8 + $0x2f0] sm:$0xf]  ;;  %v3770_v41 = vld [vmem:[#allocation8 + $0x2f4] sm:$0xf0] }
 0x17b   :  { %v3542_v61 = vor.u32 %v3770_v41, %v3541_v49  ;;  %v3173_v39 = vld [vmem:[#allocation8 + $0x10] sm:$0xf]  ;;  %v3678_v31 = vld [vmem:[#allocation8 + $0x14] sm:$0xf0]  ;;  %v3357_v8 = vld [vmem:[#allocation8 + $0x180] sm:$0xf] }
 0x17c   :  { %2042 = vmatpush.bf16.msrb.mxu0 %v1655_v17  ;;  %2055 = vmatpush.bf16.msrb.mxu1 %v1663_v54  ;;  %v3245_v17 = vld [vmem:[#allocation8 + $0xa0] sm:$0xf]  ;;  %v3381_v54 = vld [vmem:[#allocation8 + $0x1b0] sm:$0xf]  ;;  %v3174_v50 = vor.u32 %v3678_v31, %v3173_v39  ;;  %v3768_v51 = vld [vmem:[#allocation8 + $0x2e4] sm:$0xf0] }
 0x17d   :  { %2808 = vmatpush.bf16.msrb.mxu3 %v3270_v52  ;;  %2795 = vmatpush.bf16.msrb.mxu2 %v3206_v22  ;;  %v3366_v52 = vor.u32 %v3726_v45, %v3365_v47  ;;  %v3317_v0 = vld [vmem:[#allocation8 + $0x130] sm:$0xf]  ;;  %v3533_v22 = vld [vmem:[#allocation8 + $0x2e0] sm:$0xf]  ;;  %v3689_v59 = vld [vmem:[#allocation8 + $0x74] sm:$0xf] }
 0x17e   :  { %v3534_v4 = vor.u32 %v3768_v51, %v3533_v22  ;;  %v3165_v32 = vld [vmem:[#allocation8] sm:$0xf]  ;;  %v3676_v16 = vld [vmem:[#allocation8 + $0x4] sm:$0xf0]  ;;  %v3477_v11 = vld [vmem:[#allocation8 + $0x270] sm:$0xf] }
 0x17f   :  { %2043 = vmatmul.bf16.vlgmr.msrb.gmra.mxu0 %v349_v57  ;;  %2056 = vmatmul.bf16.vlgmr.msrb.gmra.mxu1 %v350_v48  ;;  %v3682_v57 = vld [vmem:[#allocation8 + $0x34] sm:$0xf0]  ;;  %v3517_v30 = vld [vmem:[#allocation8 + $0x2c0] sm:$0xf]  ;;  %v3764_v36 = vld [vmem:[#allocation8 + $0x2c4] sm:$0xf0] }
 0x180   :  { %2832 = vmatpush.bf16.msra.mxu1 %v3414_v3  ;;  %2819 = vmatpush.bf16.msra.mxu0 %v3350_v37  ;;  %v3182_v3 = vor.u32 %v3680_v44, %v3181_v60  ;;  %v3223_v37 = vld [vmem:[#allocation8 + $0x78] sm:$0xf0]  ;;  %v3750_v60 = vld [vmem:[#allocation8 + $0x254] sm:$0xf0]  ;;  %v3293_v44 = vld [vmem:[#allocation8 + $0x100] sm:$0xf] }
 0x181   :  { %2809 = vmatpush.bf16.msrb.mxu3 %v3262_v46  ;;  %2796 = vmatpush.bf16.msrb.mxu2 %v3198_v25  ;;  %v3724_v46 = vld [vmem:[#allocation8 + $0x184] sm:$0xf0]  ;;  %v3226_v28 = vor.u32 %v3689_v59, %v3223_v37  ;;  %v3762_v6 = vld [vmem:[#allocation8 + $0x2b4] sm:$0xf0]  ;;  %v3683_v45 = vld [vmem:[#allocation8 + $0x44] sm:$0xf] }
 0x182   :  { %v3358_v55 = vor.u32 %v3724_v46, %v3357_v8  ;;  %v3712_v25 = vld [vmem:[#allocation8 + $0x124] sm:$0xf0]  ;;  %v3453_v49 = vld [vmem:[#allocation8 + $0x240] sm:$0xf]  ;;  %v3681_v8 = vld [vmem:[#allocation8 + $0x34] sm:$0xf] }
 0x183   :  { %v1888_v63 = vpop.f32.mrf.mxu0  ;;  %v3708_v24 = vld [vmem:[#allocation8 + $0x104] sm:$0xf0]  ;;  %v3501_v39 = vld [vmem:[#allocation8 + $0x2a0] sm:$0xf]  ;;  %v3191_v46 = vld [vmem:[#allocation8 + $0x38] sm:$0xf0] }
 0x184   :  { %v1889_v9 = vadd.f32 %v1888_v63, %v1876_v62  ;;  %2833 = vmatpush.bf16.msra.mxu1 %v3406_v53  ;;  %v3696_v62 = vld [vmem:[#allocation8 + $0xa4] sm:$0xf0]  ;;  %2820 = vmatpush.bf16.msra.mxu0 %v3342_v14  ;;  %v3382_v63 = vor.u32 %v3730_v5, %v3381_v54  ;;  %v3326_v53 = vor.u32 %v3716_v26, %v3325_v18  ;;  %v3754_v14 = vld [vmem:[#allocation8 + $0x274] sm:$0xf0]  ;;  %v3525_v54 = vld [vmem:[#allocation8 + $0x2d0] sm:$0xf] }
 0x185   :  { %v1901_v13 = vpop.f32.mrf.mxu1  ;;  %2810 = vmatpush.bf16.msrb.mxu3 %v3254_v19  ;;  %v3246_v48 = vor.u32 %v3696_v62, %v3245_v17  ;;  %v3166_v19 = vor.u32 %v3676_v16, %v3165_v32  ;;  %v3478_v17 = vor.u32 %v3754_v14, %v3477_v11  ;;  %v3766_v5 = vld [vmem:[#allocation8 + $0x2d4] sm:$0xf0]  ;;  %v3294_v18 = vor.u32 %v3708_v24, %v3293_v44  ;;  %v3760_v31 = vld [vmem:[#allocation8 + $0x2a4] sm:$0xf0]  ;;  %v3445_v22 = vld [vmem:[#allocation8 + $0x230] sm:$0xf] }
 0x186   :  { %v1902_v42 = vadd.f32 %v1901_v13, %v1889_v9  ;;  %v3190_v9 = vor.u32 %v3682_v57, %v3189_v56  ;;  %v3687_v56 = vld [vmem:[#allocation8 + $0x64] sm:$0xf]  ;;  %v3526_v57 = vor.u32 %v3766_v5, %v3525_v54  ;;  %v3786_v26 = vld [vmem:[#allocation8 + $0x374] sm:$0xf0]  ;;  %v3502_v51 = vor.u32 %v3760_v31, %v3501_v39  ;;  %v3493_v11 = vld [vmem:[#allocation8 + $0x290] sm:$0xf] }
 0x187   :  { %v3194_v59 = vor.u32 %v3681_v8, %v3191_v46  ;;  %v3679_v14 = vld [vmem:[#allocation8 + $0x24] sm:$0xf]  ;;  %v3782_v54 = vld [vmem:[#allocation8 + $0x354] sm:$0xf0]  ;;  %v3721_v44 = vld [vmem:[#allocation8 + $0x174] sm:$0xf] }
 0x188   :  { %2834 = vmatpush.bf16.msra.mxu1 %v3398_v58  ;;  %2797 = vmatpush.bf16.msrb.mxu2 %v3190_v9  ;;  %v3714_v58 = vld [vmem:[#allocation8 + $0x134] sm:$0xf0]  ;;  %v3752_v9 = vld [vmem:[#allocation8 + $0x264] sm:$0xf0]  ;;  %v3719_v39 = vld [vmem:[#allocation8 + $0x164] sm:$0xf] }
 0x189   :  { %2811 = vmatpush.bf16.msrb.mxu3 %v3246_v48  ;;  %v3318_v1 = vor.u32 %v3714_v58, %v3317_v0  ;;  %v3215_v48 = vld [vmem:[#allocation8 + $0x68] sm:$0xf0]  ;;  %v3597_v0 = vld [vmem:[#allocation8 + $0x360] sm:$0xf]  ;;  %v3784_v58 = vld [vmem:[#allocation8 + $0x364] sm:$0xf0] }
 0x18a   :  { %v1914_v21 = vpop.f32.mrf.mxu2  ;;  %v3598_v37 = vor.u32 %v3784_v58, %v3597_v0  ;;  %v3343_v8 = vld [vmem:[#allocation8 + $0x168] sm:$0xf0]  ;;  %v3421_v46 = vld [vmem:[#allocation8 + $0x200] sm:$0xf]  ;;  %vm3154_vm2 = vcmask 1024  }
 0x18b   :  { %v1915_v7 = vadd.f32 %v1914_v21, %v1902_v42  ;;  %v1890_v15 = vpop.f32.mrf.mxu0 }
 0x18c   :  { %2835 = vmatpush.bf16.msra.mxu1 %v3390_v12  ;;  %2798 = vmatpush.bf16.msrb.mxu2 %v3182_v3  ;;  %v3309_v12 = vld [vmem:[#allocation8 + $0x120] sm:$0xf]  ;;  %v3509_v3 = vld [vmem:[#allocation8 + $0x2b0] sm:$0xf] }
 0x18d   :  { %v1903_v20 = vpop.f32.mrf.mxu1  ;;  %v3310_v62 = vor.u32 %v3712_v25, %v3309_v12  ;;  %v3510_v41 = vor.u32 %v3762_v6, %v3509_v3  ;;  %v3351_v3 = vld [vmem:[#allocation8 + $0x178] sm:$0xf0]  ;;  %v3429_v6 = vld [vmem:[#allocation8 + $0x210] sm:$0xf] }
 0x18e   :  { %v1927_v29 = vpop.f32.mrf.mxu3 }
 0x18f   :  { %v4439_v27 = vadd.f32 %v1927_v29, %v1915_v7  ;;  %v3237_v29 = vld [vmem:[#allocation8 + $0x90] sm:$0xf] }
 0x190   :  { %2836 = vmatpush.bf16.msra.mxu1 %v3382_v63  ;;  %2799 = vmatpush.bf16.msrb.mxu2 %v3174_v50  ;;  %v3469_v63 = vld [vmem:[#allocation8 + $0x260] sm:$0xf] }
 0x192   :  { %v1916_v10 = vpop.f32.mrf.mxu2 }
 0x193   :  { %v3694_v10 = vld [vmem:[#allocation8 + $0x94] sm:$0xf0] }
 0x194   :  { %v3238_v33 = vor.u32 %v3694_v10, %v3237_v29  ;;  %2837 = vmatpush.bf16.msra.mxu1 %v3374_v40  ;;  %2800 = vmatpush.bf16.msrb.mxu2 %v3166_v19  ;;  %v3301_v29 = vld [vmem:[#allocation8 + $0x110] sm:$0xf]  ;;  %v3710_v10 = vld [vmem:[#allocation8 + $0x114] sm:$0xf0] }
 0x195   :  { %v3758_v19 = vld [vmem:[#allocation8 + $0x294] sm:$0xf0] }
 0x196   :  { %v1929_v23 = vpop.f32.mrf.mxu3  ;;  %2812 = vmatpush.bf16.msrb.mxu3 %v3238_v33  ;;  %v3302_v33 = vor.u32 %v3710_v10, %v3301_v29  ;;  %v3494_v25 = vor.u32 %v3758_v19, %v3493_v11  ;;  %v3756_v29 = vld [vmem:[#allocation8 + $0x284] sm:$0xf0]  ;;  %v3677_v10 = vld [vmem:[#allocation8 + $0x14] sm:$0xf] }
 0x197   :  { %v3333_v23 = vld [vmem:[#allocation8 + $0x150] sm:$0xf] }
 0x198   :  { %v3334_v43 = vor.u32 %v3718_v38, %v3333_v23  ;;  %2838 = vmatpush.bf16.msra.mxu1 %v3366_v52  ;;  %2845 = vmatpush.bf16.msra.mxu2 %v3478_v17  ;;  %v3685_v23 = vld [vmem:[#allocation8 + $0x54] sm:$0xf]  ;;  %v3207_v38 = vld [vmem:[#allocation8 + $0x58] sm:$0xf0]  ;;  %v3605_v52 = vld [vmem:[#allocation8 + $0x370] sm:$0xf] }
 0x199   :  { %v3210_v40 = vor.u32 %v3685_v23, %v3207_v38  ;;  %v3606_v50 = vor.u32 %v3786_v26, %v3605_v52  ;;  %v3183_v17 = vld [vmem:[#allocation8 + $0x28] sm:$0xf0]  ;;  %v3675_v52 = vld [vmem:[#allocation8 + $0x4] sm:$0xf] }
 0x19a   :  { %2821 = vmatpush.bf16.msra.mxu0 %v3334_v43  ;;  %2813 = vmatpush.bf16.msrb.mxu3 %v3230_v34  ;;  %v3461_v43 = vld [vmem:[#allocation8 + $0x250] sm:$0xf]  ;;  %v3199_v34 = vld [vmem:[#allocation8 + $0x48] sm:$0xf0] }
 0x19b   :  { %v3462_v47 = vor.u32 %v3750_v60, %v3461_v43  ;;  %v3581_v43 = vld [vmem:[#allocation8 + $0x340] sm:$0xf]  ;;  %v3780_v60 = vld [vmem:[#allocation8 + $0x344] sm:$0xf0] }
 0x19c   :  { %2839 = vmatpush.bf16.msra.mxu1 %v3358_v55  ;;  %v3582_v24 = vor.u32 %v3780_v60, %v3581_v43  ;;  %v3711_v60 = vld [vmem:[#allocation8 + $0x124] sm:$0xf] }
 0x19e   :  { %2822 = vmatpush.bf16.msra.mxu0 %v3326_v53  ;;  %2858 = vmatpush.bf16.msra.mxu3 %v3542_v61  ;;  %v3748_v53 = vld [vmem:[#allocation8 + $0x244] sm:$0xf0]  ;;  %v2072_v61 = vld [vmem:[#allocation5] sm:$0xff] }
 0x19f   :  { %2076 = vst [vmem:[#allocation1] ss:$4 sm:$0xff] %v2072_v61  ;;  %v3454_v55 = vor.u32 %v3748_v53, %v3453_v49  ;;  %v3354_v49 = vor.u32 %v3721_v44, %v3351_v3  ;;  %v3778_v61 = vld [vmem:[#allocation8 + $0x334] sm:$0xf0]  ;;  %v3311_v44 = vld [vmem:[#allocation8 + $0x128] sm:$0xf0] }
 0x1a0   :  { %2884 = vmatpush.bf16.msrb.mxu1 %v3226_v28  ;;  %v3407_v3 = vld [vmem:[#allocation8 + $0x1e8] sm:$0xf0] }
 0x1a2   :  { %2823 = vmatpush.bf16.msra.mxu0 %v3318_v1  ;;  %2859 = vmatpush.bf16.msra.mxu3 %v3534_v4  ;;  %v3746_v1 = vld [vmem:[#allocation8 + $0x234] sm:$0xf0] }
 0x1a3   :  { %v3446_v4 = vor.u32 %v3746_v1, %v3445_v22 }
 0x1a6   :  { %2824 = vmatpush.bf16.msra.mxu0 %v3310_v62  ;;  %2860 = vmatpush.bf16.msra.mxu3 %v3526_v57  ;;  %v2081_v28 = vld.sshfl [vmem:[#allocation1 + $0x10] sm:$0xff pattern:$0x73625140]  ;;  %v2082_v32 = vld.sshfl [vmem:[#allocation1 + $0x18] sm:$0xff pattern:$0x73625140] }
 0x1a7   :  { %v4449_v16 = vpack.c.bf16 %v2082_v32, %v2081_v28  ;;  %v3589_v62 = vld [vmem:[#allocation8 + $0x350] sm:$0xf]  ;;  %v3717_v28 = vld [vmem:[#allocation8 + $0x154] sm:$0xf]  ;;  %v3335_v32 = vld [vmem:[#allocation8 + $0x158] sm:$0xf0] }
 0x1a8   :  { %v3590_v57 = vor.u32 %v3782_v54, %v3589_v62  ;;  %v2079_v23 = vld.sshfl [vmem:[#allocation1] sm:$0xff pattern:$0x73625140]  ;;  %v3338_v19 = vor.u32 %v3717_v28, %v3335_v32  ;;  %v3715_v62 = vld [vmem:[#allocation8 + $0x144] sm:$0xf] }
 0x1a9   :  { %v2099_v5 = vunpack.c.l.b16 %v4449_v16  ;;  %v3327_v54 = vld [vmem:[#allocation8 + $0x148] sm:$0xf0]  ;;  %v3731_v28 = vld [vmem:[#allocation8 + $0x1c4] sm:$0xf] }
 0x1aa   :  { %2825 = vmatpush.bf16.msra.mxu0 %v3302_v33  ;;  %v3391_v32 = vld [vmem:[#allocation8 + $0x1c8] sm:$0xf0] }
 0x1ae   :  { %2826 = vmatpush.bf16.msra.mxu0 %v3294_v18  ;;  %v3167_v18 = vld [vmem:[#allocation8 + $0x8] sm:$0xf0] }
 0x1af   :  { %v4441_v13 = vpop.f32.mrf.mxu0 }
 0x1b0   :  { %v1941_v0 = vadd.f32 %v4441_v13, %v4439_v27 }
 0x1b2   :  { %2871 = vmatpush.bf16.msrb.mxu0 %v3606_v50 }
 0x1b3   :  { %v4443_v42 = vpop.f32.mrf.mxu1 }
 0x1b4   :  { %v1954_v11 = vadd.f32 %v4443_v42, %v1941_v0  ;;  %v3330_v42 = vor.u32 %v3715_v62, %v3327_v54  ;;  %v3815_v54 = vld [vmem:[%s4516_s4] ss:$0 sm:$0xff] }
 0x1b6   :  { %v4445_v21 = vpop.f32.mrf.mxu2  ;;  %2872 = vmatpush.bf16.msrb.mxu0 %v3598_v37  ;;  %v3776_v37 = vld [vmem:[#allocation8 + $0x324] sm:$0xf0] }
 0x1b7   :  { %v1942_v7 = vpop.f32.mrf.mxu0  ;;  %v1967_v13 = vadd.f32 %v4445_v21, %v1954_v11  ;;  %v3772_v21 = vld [vmem:[#allocation8 + $0x304] sm:$0xf0] }
 0x1b8   :  { %v3218_v7 = vor.u32 %v3687_v56, %v3215_v48  ;;  %v3186_v56 = vor.u32 %v3679_v14, %v3183_v17  ;;  %v3437_v48 = vld [vmem:[#allocation8 + $0x220] sm:$0xf]  ;;  %v3557_v14 = vld [vmem:[#allocation8 + $0x310] sm:$0xf] }
 0x1ba   :  { %v4447_v15 = vpop.f32.mrf.mxu3  ;;  %2885 = vmatpush.bf16.msrb.mxu1 %v3218_v7  ;;  %2873 = vmatpush.bf16.msrb.mxu0 %v3590_v57 }
 0x1bb   :  { %v1955_v20 = vpop.f32.mrf.mxu1 }
 0x1bc   :  { %v3470_v20 = vor.u32 %v3752_v9, %v3469_v63  ;;  %v3744_v63 = vld [vmem:[#allocation8 + $0x224] sm:$0xf0] }
 0x1bd   :  { %v3438_v7 = vor.u32 %v3744_v63, %v3437_v48  ;;  %v1980_v48 = vadd.f32 %v4447_v15, %v1967_v13  ;;  %v3549_v63 = vld [vmem:[#allocation8 + $0x300] sm:$0xf]  ;;  %v3394_v13 = vor.u32 %v3731_v28, %v3391_v32  ;;  %v3723_v28 = vld [vmem:[#allocation8 + $0x184] sm:$0xf]  ;;  %v3359_v32 = vld [vmem:[#allocation8 + $0x188] sm:$0xf0] }
 0x1be   :  { %v1968_v35 = vpop.f32.mrf.mxu2  ;;  %2846 = vmatpush.bf16.msra.mxu2 %v3470_v20  ;;  %2886 = vmatpush.bf16.msrb.mxu1 %v3210_v40  ;;  %v3485_v20 = vld [vmem:[#allocation8 + $0x280] sm:$0xf] }
 0x1bf   :  { %v3518_v35 = vor.u32 %v3764_v36, %v3517_v30  ;;  %v4456_v30 = vpack.c.b16 %v2099_v5, %v2099_v5  ;;  %v3486_v33 = vor.u32 %v3756_v29, %v3485_v20  ;;  %v3175_v36 = vld [vmem:[#allocation8 + $0x18] sm:$0xf0]  ;;  %2874 = vmatpush.bf16.msrb.mxu0 %v3582_v24  ;;  %v3550_v29 = vor.u32 %v3772_v21, %v3549_v63  ;;  %v3735_v24 = vld [vmem:[#allocation8 + $0x1e4] sm:$0xf]  ;;  %v3729_v63 = vld [vmem:[#allocation8 + $0x1b4] sm:$0xf] }
 0x1c0   :  { %v3178_v38 = vor.u32 %v3677_v10, %v3175_v36  ;;  %v3319_v10 = vld [vmem:[#allocation8 + $0x138] sm:$0xf0] }
 0x1c1   :  { %2861 = vmatpush.bf16.msra.mxu3 %v3518_v35  ;;  %v2080_v35 = vld.sshfl [vmem:[#allocation1 + $0x8] sm:$0xff pattern:$0x73625140]  ;;  %2840 = vmatmul.bf16.vlgmr.msra.gmra.mxu1 %v4456_v30  ;;  %v3415_v36 = vld [vmem:[#allocation8 + $0x1f8] sm:$0xf0] }
 0x1c2   :  { %v1981_v2 = vpop.f32.mrf.mxu3  ;;  %2847 = vmatpush.bf16.msra.mxu2 %v3462_v47  ;;  %v4459_v40 = vpack.c.bf16 %v2080_v35, %v2079_v23  ;;  %v3753_v35 = vld [vmem:[#allocation8 + $0x274] sm:$0xf]  ;;  %v3383_v21 = vld [vmem:[#allocation8 + $0x1b8] sm:$0xf0] }
 0x1c3   :  { %v3202_v2 = vor.u32 %v3683_v45, %v3199_v34  ;;  %v3742_v34 = vld [vmem:[#allocation8 + $0x214] sm:$0xf0] }
 0x1c4   :  { %v2097_v45 = vunpack.c.l.b16 %v4459_v40  ;;  %v3430_v53 = vor.u32 %v3742_v34, %v3429_v6  ;;  %v2098_v57 = vunpack.c.h.b16 %v4459_v40  ;;  %v3479_v40 = vld [vmem:[#allocation8 + $0x278] sm:$0xf0]  ;;  %v3751_v34 = vld [vmem:[#allocation8 + $0x264] sm:$0xf] }
 0x1c5   :  { %2862 = vmatpush.bf16.msra.mxu3 %v3510_v41  ;;  %2887 = vmatpush.bf16.msrb.mxu1 %v3202_v2  ;;  %v3170_v41 = vor.u32 %v3675_v52, %v3167_v18  ;;  %v3573_v2 = vld [vmem:[#allocation8 + $0x330] sm:$0xf]  ;;  %v3482_v43 = vor.u32 %v3753_v35, %v3479_v40  ;;  %v3314_v18 = vor.u32 %v3711_v60, %v3311_v44  ;;  %v3703_v44 = vld [vmem:[#allocation8 + $0xe4] sm:$0xf] }
 0x1c6   :  { %2848 = vmatpush.bf16.msra.mxu2 %v3454_v55  ;;  %v4464_v31 = vpack.c.b16 %v2097_v45, %v2097_v45  ;;  %v3574_v50 = vor.u32 %v3778_v61, %v3573_v2  ;;  %v3740_v55 = vld [vmem:[#allocation8 + $0x204] sm:$0xf0]  ;;  %v4475_v20 = vpack.c.b16 %v2098_v57, %v2098_v57  ;;  %v3410_v45 = vor.u32 %v3735_v24, %v3407_v3  ;;  %v3709_v2 = vld [vmem:[#allocation8 + $0x114] sm:$0xf]  ;;  %v3303_v61 = vld [vmem:[#allocation8 + $0x118] sm:$0xf0] }
 0x1c7   :  { %v3422_v1 = vor.u32 %v3740_v55, %v3421_v46  ;;  %v3749_v46 = vld [vmem:[#allocation8 + $0x254] sm:$0xf]  ;;  %v3463_v55 = vld [vmem:[#allocation8 + $0x258] sm:$0xf0]  ;;  %v3727_v3 = vld [vmem:[#allocation8 + $0x1a4] sm:$0xf] }
 0x1c8   :  { %2814 = vmatmul.bf16.vlgmr.msrb.gmra.mxu3 %v4464_v31  ;;  %2875 = vmatpush.bf16.msrb.mxu0 %v3574_v50  ;;  %v3399_v50 = vld [vmem:[#allocation8 + $0x1d8] sm:$0xf0]  ;;  %v3705_v57 = vld [vmem:[#allocation8 + $0xf4] sm:$0xf] }
 0x1c9   :  { %2863 = vmatpush.bf16.msra.mxu3 %v3502_v51  ;;  %2888 = vmatpush.bf16.msrb.mxu1 %v3194_v59  ;;  %v3346_v51 = vor.u32 %v3719_v39, %v3343_v8  ;;  %v3565_v59 = vld [vmem:[#allocation8 + $0x320] sm:$0xf]  ;;  %v3733_v39 = vld [vmem:[#allocation8 + $0x1d4] sm:$0xf] }
 0x1ca   :  { %2849 = vmatpush.bf16.msra.mxu2 %v3446_v4  ;;  %v3566_v4 = vor.u32 %v3776_v37, %v3565_v59  ;;  %2827 = vmatmul.bf16.vlgmr.msra.gmra.mxu0 %v4475_v20 }
 0x1cc   :  { %2876 = vmatpush.bf16.msrb.mxu0 %v3566_v4  ;;  %v3295_v4 = vld [vmem:[#allocation8 + $0x108] sm:$0xf0] }
 0x1cd   :  { %2864 = vmatpush.bf16.msra.mxu3 %v3494_v25  ;;  %2889 = vmatpush.bf16.msrb.mxu1 %v3186_v56  ;;  %v3774_v25 = vld [vmem:[#allocation8 + $0x314] sm:$0xf0]  ;;  %v2073_v56 = vld [vmem:[#allocation5 + $0x8] sm:$0xf] }
 0x1ce   :  { %2850 = vmatpush.bf16.msra.mxu2 %v3438_v7  ;;  %v3558_v17 = vor.u32 %v3774_v25, %v3557_v14  ;;  %2078 = vst [vmem:[#allocation1 + $0x20] ss:$4 sm:$0xff] %v2073_v56  ;;  %v3713_v7 = vld [vmem:[#allocation8 + $0x134] sm:$0xf]  ;;  %v3747_v14 = vld [vmem:[#allocation8 + $0x244] sm:$0xf] }
 0x1cf   :  { %v3322_v15 = vor.u32 %v3713_v7, %v3319_v10  ;;  %v3455_v25 = vld [vmem:[#allocation8 + $0x248] sm:$0xf0]  ;;  %v3386_v10 = vor.u32 %v3729_v63, %v3383_v21  ;;  %v3695_v21 = vld [vmem:[#allocation8 + $0xa4] sm:$0xf] }
 0x1d0   :  { %2877 = vmatpush.bf16.msrb.mxu0 %v3558_v17  ;;  %v3458_v56 = vor.u32 %v3747_v14, %v3455_v25  ;;  %v2100_v25 = vunpack.c.h.b16 %v4449_v16  ;;  %v3773_v16 = vld [vmem:[#allocation8 + $0x314] sm:$0xf] }
 0x1d1   :  { %2865 = vmatpush.bf16.msra.mxu3 %v3486_v33  ;;  %2890 = vmatpush.bf16.msrb.mxu1 %v3178_v38  ;;  %v3737_v33 = vld [vmem:[#allocation8 + $0x1f4] sm:$0xf] }
 0x1d2   :  { %2851 = vmatpush.bf16.msra.mxu2 %v3430_v53  ;;  %v3418_v38 = vor.u32 %v3737_v33, %v3415_v36  ;;  %v3783_v33 = vld [vmem:[#allocation8 + $0x364] sm:$0xf]  ;;  %v3599_v36 = vld [vmem:[#allocation8 + $0x368] sm:$0xf0] }
 0x1d3   :  { %v3602_v24 = vor.u32 %v3783_v33, %v3599_v36  ;;  %v3693_v33 = vld [vmem:[#allocation8 + $0x94] sm:$0xf] }
 0x1d4   :  { %2878 = vmatpush.bf16.msrb.mxu0 %v3550_v29  ;;  %v3287_v29 = vld [vmem:[#allocation8 + $0xf8] sm:$0xf0] }
 0x1d5   :  { %2891 = vmatpush.bf16.msrb.mxu1 %v3170_v41  ;;  %2910 = vmatpush.bf16.msrb.mxu3 %v3354_v49  ;;  %v2083_v49 = vld.sshfl [vmem:[#allocation1 + $0x20] sm:$0xff pattern:$0x73625140]  ;;  %v2084_v53 = vld.sshfl [vmem:[#allocation1 + $0x28] sm:$0xff pattern:$0x73625140]  ;;  %v3290_v60 = vor.u32 %v3705_v57, %v3287_v29 }
 0x1d6   :  { %2852 = vmatpush.bf16.msra.mxu2 %v3422_v1  ;;  %v2093_v41 = vpack.c.bf16 %v2084_v53, %v2083_v49  ;;  %v3707_v1 = vld [vmem:[#allocation8 + $0x104] sm:$0xf]  ;;  %v3439_v49 = vld [vmem:[#allocation8 + $0x228] sm:$0xf0]  ;;  %v3701_v53 = vld [vmem:[#allocation8 + $0xd4] sm:$0xf] }
 0x1d7   :  { %v3567_v57 = vld [vmem:[#allocation8 + $0x328] sm:$0xf0]  ;;  %v3559_v29 = vld [vmem:[#allocation8 + $0x318] sm:$0xf0] }
 0x1d8   :  { %2923 = vmatpush.bf16.msra.mxu0 %v3418_v38  ;;  %v2101_v8 = vunpack.c.l.b16 %v2093_v41  ;;  %v2102_v17 = vunpack.c.h.b16 %v2093_v41  ;;  %v3447_v38 = vld [vmem:[#allocation8 + $0x238] sm:$0xf0]  ;;  %v3562_v36 = vor.u32 %v3773_v16, %v3559_v29  ;;  %v3801_v16 = vld [vmem:[#allocation10 + $0x70] sm:$0xff] }
 0x1d9   :  { %2911 = vmatpush.bf16.msrb.mxu3 %v3346_v51  ;;  %2936 = vmatpush.bf16.msra.mxu1 %v3482_v43  ;;  %v3271_v41 = vld [vmem:[#allocation8 + $0xd8] sm:$0xf0] }
 0x1da   :  { %v4482_v37 = vpack.c.b16 %v2101_v8, %v2101_v8  ;;  %v3367_v8 = vld [vmem:[#allocation8 + $0x198] sm:$0xf0] }
 0x1db   :  { %v4451_v12 = vpop.f32.mrf.mxu0 }
 0x1dc   :  { %v1993_v23 = vadd.f32 %v4451_v12, %v1980_v48  ;;  %v3471_v12 = vld [vmem:[#allocation8 + $0x268] sm:$0xf0]  ;;  %2924 = vmatpush.bf16.msra.mxu0 %v3410_v45  ;;  %2866 = vmatmul.bf16.vlgmr.msra.gmra.mxu3 %v4482_v37 }
 0x1dd   :  { %v4454_v9 = vpop.f32.mrf.mxu1  ;;  %2912 = vmatpush.bf16.msrb.mxu3 %v3338_v19  ;;  %v3607_v19 = vld [vmem:[#allocation8 + $0x378] sm:$0xf0] }
 0x1de   :  { %v2006_v6 = vadd.f32 %v4454_v9, %v1993_v23  ;;  %v3402_v9 = vor.u32 %v3733_v39, %v3399_v50  ;;  %v3745_v23 = vld [vmem:[#allocation8 + $0x234] sm:$0xf] }
 0x1df   :  { %v3450_v40 = vor.u32 %v3745_v23, %v3447_v38  ;;  %v3725_v50 = vld [vmem:[#allocation8 + $0x194] sm:$0xf]  ;;  %v3239_v23 = vld [vmem:[#allocation8 + $0x98] sm:$0xf0]  ;;  %v3771_v38 = vld [vmem:[#allocation8 + $0x304] sm:$0xf] }
 0x1e0   :  { %2925 = vmatpush.bf16.msra.mxu0 %v3402_v9  ;;  %v3779_v9 = vld [vmem:[#allocation8 + $0x344] sm:$0xf] }
 0x1e1   :  { %2913 = vmatpush.bf16.msrb.mxu3 %v3330_v42  ;;  %v4491_v42 = vpack.c.b16 %v2102_v17, %v2102_v17 }
 0x1e2   :  { %v4461_v47 = vpop.f32.mrf.mxu2 }
 0x1e3   :  { %v1994_v26 = vpop.f32.mrf.mxu0  ;;  %v2019_v52 = vadd.f32 %v4461_v47, %v2006_v6  ;;  %v3306_v47 = vor.u32 %v3709_v2, %v3303_v61  ;;  %2879 = vmatmul.bf16.vlgmr.msrb.gmra.mxu0 %v4491_v42  ;;  %v3375_v6 = vld [vmem:[#allocation8 + $0x1a8] sm:$0xf0] }
 0x1e4   :  { %v4468_v58 = vpop.f32.mrf.mxu3  ;;  %v3474_v26 = vor.u32 %v3751_v34, %v3471_v12  ;;  %2926 = vmatpush.bf16.msra.mxu0 %v3394_v13  ;;  %v3279_v34 = vld [vmem:[#allocation8 + $0xe8] sm:$0xf0]  ;;  %v3378_v12 = vor.u32 %v3727_v3, %v3375_v6  ;;  %v3575_v13 = vld [vmem:[#allocation8 + $0x338] sm:$0xf0]  ;;  %v3767_v6 = vld [vmem:[#allocation8 + $0x2e4] sm:$0xf] }
 0x1e5   :  { %v2007_v22 = vpop.f32.mrf.mxu1  ;;  %2914 = vmatpush.bf16.msrb.mxu3 %v3322_v15  ;;  %v2032_v0 = vadd.f32 %v4468_v58, %v2019_v52  ;;  %v3785_v58 = vld [vmem:[#allocation8 + $0x374] sm:$0xf]  ;;  %v3282_v61 = vor.u32 %v3703_v44, %v3279_v34 }
 0x1e6   :  { %2937 = vmatpush.bf16.msra.mxu1 %v3474_v26  ;;  %v3466_v22 = vor.u32 %v3749_v46, %v3463_v55  ;;  %v3610_v48 = vor.u32 %v3785_v58, %v3607_v19  ;;  %v3781_v52 = vld [vmem:[#allocation8 + $0x354] sm:$0xf]  ;;  %v3743_v26 = vld [vmem:[#allocation8 + $0x224] sm:$0xf]  ;;  %v3370_v46 = vor.u32 %v3725_v50, %v3367_v8  ;;  %v3583_v55 = vld [vmem:[#allocation8 + $0x348] sm:$0xf0] }
 0x1e7   :  { %v3442_v2 = vor.u32 %v3743_v26, %v3439_v49  ;;  %v3739_v58 = vld [vmem:[#allocation8 + $0x204] sm:$0xf]  ;;  %v3423_v19 = vld [vmem:[#allocation8 + $0x208] sm:$0xf0]  ;;  %v3769_v44 = vld [vmem:[#allocation8 + $0x2f4] sm:$0xf] }
 0x1e8   :  { %2927 = vmatpush.bf16.msra.mxu0 %v3386_v10  ;;  %v3426_v14 = vor.u32 %v3739_v58, %v3423_v19  ;;  %v3763_v26 = vld [vmem:[#allocation8 + $0x2c4] sm:$0xf]  ;;  %v3519_v49 = vld [vmem:[#allocation8 + $0x2c8] sm:$0xf0]  ;;  %v3757_v8 = vld [vmem:[#allocation8 + $0x294] sm:$0xf] }
 0x1e9   :  { %2915 = vmatpush.bf16.msrb.mxu3 %v3314_v18  ;;  %v3591_v18 = vld [vmem:[#allocation8 + $0x358] sm:$0xf0]  ;;  %v3503_v50 = vld [vmem:[#allocation8 + $0x2a8] sm:$0xf0]  ;;  %v3789_v58 = vld [vmem:[#allocation10 + $0x10] sm:$0xff] }
 0x1ea   :  { %v2020_v27 = vpop.f32.mrf.mxu2  ;;  %2938 = vmatpush.bf16.msra.mxu1 %v3466_v22  ;;  %v3594_v39 = vor.u32 %v3781_v52, %v3591_v18  ;;  %v3527_v52 = vld [vmem:[#allocation8 + $0x2d8] sm:$0xf0]  ;;  %v3788_v19 = vld [vmem:[#allocation10 + $0x8] sm:$0xff] }
 0x1eb   :  { %v3814_v27 = vld [vmem:[%s4515_s3] ss:$0 sm:$0xff] }
 0x1ec   :  { %v2033_v5 = vpop.f32.mrf.mxu3  ;;  %2928 = vmatpush.bf16.msra.mxu0 %v3378_v12  ;;  %v3765_v12 = vld [vmem:[#allocation8 + $0x2d4] sm:$0xf] }
 0x1ed   :  { %2916 = vmatpush.bf16.msrb.mxu3 %v3306_v47  ;;  %v3298_v5 = vor.u32 %v3707_v1, %v3295_v4  ;;  %v3431_v47 = vld [vmem:[#allocation8 + $0x218] sm:$0xf0]  ;;  %v3699_v1 = vld [vmem:[#allocation8 + $0xc4] sm:$0xf]  ;;  %v3586_v4 = vor.u32 %v3779_v9, %v3583_v55  ;;  %v3530_v18 = vor.u32 %v3765_v12, %v3527_v52 }
 0x1ee   :  { %2939 = vmatpush.bf16.msra.mxu1 %v3458_v56  ;;  %v3775_v56 = vld [vmem:[#allocation8 + $0x324] sm:$0xf]  ;;  %v3495_v9 = vld [vmem:[#allocation8 + $0x298] sm:$0xf0] }
 0x1ef   :  { %v3755_v55 = vld [vmem:[#allocation8 + $0x284] sm:$0xf] }
 0x1f0   :  { %2929 = vmatpush.bf16.msra.mxu0 %v3370_v46  ;;  %v3498_v46 = vor.u32 %v3757_v8, %v3495_v9 }
 0x1f1   :  { %2917 = vmatpush.bf16.msrb.mxu3 %v3298_v5  ;;  %v3255_v5 = vld [vmem:[#allocation8 + $0xb8] sm:$0xf0] }
 0x1f2   :  { %2940 = vmatpush.bf16.msra.mxu1 %v3450_v40  ;;  %v3242_v40 = vor.u32 %v3693_v33, %v3239_v23  ;;  %v3800_v23 = vld [vmem:[#allocation10 + $0x68] sm:$0xff] }
 0x1f4   :  { %2918 = vmatmul.bf16.vlgmr.msrb.gmra.mxu3 %v4475_v20  ;;  %v3247_v20 = vld [vmem:[#allocation8 + $0xa8] sm:$0xf0] }
 0x1f5   :  { %2962 = vmatpush.bf16.msra.mxu3 %v3610_v48  ;;  %v2106_v48 = vpack.c.b16 %v2100_v25, %v2100_v25  ;;  %v3250_v10 = vor.u32 %v3695_v21, %v3247_v20  ;;  %v3787_v25 = vld [vmem:[#allocation10] sm:$0xff]  ;;  %v3802_v21 = vld [vmem:[#allocation10 + $0x78] sm:$0xff] }
 0x1f6   :  { %2941 = vmatpush.bf16.msra.mxu1 %v3442_v2  ;;  %v3511_v2 = vld [vmem:[#allocation8 + $0x2b8] sm:$0xf0] }
 0x1f9   :  { %2963 = vmatpush.bf16.msra.mxu3 %v3602_v24 }
 0x1fc   :  { %v2044_v51 = vpop.f32.mrf.mxu0  ;;  %v2057_v59 = vpop.f32.mrf.mxu1 }
 0x1fd   :  { %v2045_v11 = vadd.f32 %v2044_v51, %v2032_v0  ;;  %v3741_v0 = vld [vmem:[#allocation8 + $0x214] sm:$0xf]  ;;  %v3263_v51 = vld [vmem:[#allocation8 + $0xc8] sm:$0xf0]  ;;  %2964 = vmatpush.bf16.msra.mxu3 %v3594_v39  ;;  %v3759_v39 = vld [vmem:[#allocation8 + $0x2a4] sm:$0xf] }
 0x1fe   :  { %v3434_v22 = vor.u32 %v3741_v0, %v3431_v47  ;;  %v3266_v17 = vor.u32 %v3699_v1, %v3263_v51  ;;  %v3794_v1 = vld [vmem:[#allocation10 + $0x38] sm:$0xff] }
 0x1ff   :  { %v2058_v62 = vadd.f32 %v2057_v59, %v2045_v11  ;;  %v3274_v59 = vor.u32 %v3701_v53, %v3271_v41  ;;  %v3777_v11 = vld [vmem:[#allocation8 + $0x334] sm:$0xf]  ;;  %v3522_v53 = vor.u32 %v3763_v26, %v3519_v49  ;;  %v3795_v49 = vld [vmem:[#allocation10 + $0x40] sm:$0xff] }
 0x200   :  { %2942 = vmatpush.bf16.msra.mxu1 %v3434_v22  ;;  %v3761_v41 = vld [vmem:[#allocation8 + $0x2b4] sm:$0xf] }
 0x201   :  { %v2065_v7 = vmul.f32 %v3814_v27, %v2058_v62  ;;  %v3362_v27 = vor.u32 %v3723_v28, %v3359_v32  ;;  %v3697_v62 = vld [vmem:[#allocation8 + $0xb4] sm:$0xf]  ;;  %2965 = vmatpush.bf16.msra.mxu3 %v3586_v4  ;;  %v3792_v4 = vld [vmem:[#allocation10 + $0x28] sm:$0xff] }
 0x202   :  { %v3258_v63 = vor.u32 %v3697_v62, %v3255_v5 }
 0x203   :  { %v2070_v35 = vadd.f32 %v3815_v54, %v2065_v7  ;;  %v3578_v54 = vor.u32 %v3777_v11, %v3575_v13  ;;  %2930 = vmatpush.bf16.msra.mxu0 %v3362_v27  ;;  %v3570_v7 = vor.u32 %v3775_v56, %v3567_v57  ;;  %v3791_v11 = vld [vmem:[#allocation10 + $0x20] sm:$0xff]  ;;  %v3790_v27 = vld [vmem:[#allocation10 + $0x18] sm:$0xff] }
 0x204   :  { %v2046_v15 = vpop.f32.mrf.mxu0  ;;  %v2059_v43 = vpop.f32.mrf.mxu1  ;;  %2943 = vmatpush.bf16.msra.mxu1 %v3426_v14 }
 0x205   :  { %v2071_v45 = vpack.c.bf16 %v2070_v35, %v2070_v35  ;;  %2966 = vmatpush.bf16.msra.mxu3 %v3578_v54  ;;  %v3551_v35 = vld [vmem:[#allocation8 + $0x308] sm:$0xf0]  ;;  %v3691_v43 = vld [vmem:[#allocation8 + $0x84] sm:$0xf] }
 0x206   :  { %2931 = vmatmul.bf16.vlgmr.msra.gmra.mxu0 %v4456_v30  ;;  %v3554_v15 = vor.u32 %v3771_v38, %v3551_v35  ;;  %v3543_v30 = vld [vmem:[#allocation8 + $0x2f8] sm:$0xf0]  ;;  %v2227_v54 = vld [vmem:[%s4518_s6] sm:$0x3] }
 0x207   :  { %2801 = vmatmul.bf16.vlgmr.msrb.gmra.mxu2 %v2071_v45  ;;  %2892 = vmatmul.bf16.vlgmr.msrb.gmra.mxu1 %v2071_v45  ;;  %v3546_v3 = vor.u32 %v3769_v44, %v3543_v30  ;;  %v3535_v45 = vld [vmem:[#allocation8 + $0x2e8] sm:$0xf0]  ;;  %v2229_v5 = vperm.slane %v2227_v54, 0 }
 0x208   :  { %2897 = vmatpush.bf16.msrb.mxu2 %v3290_v60  ;;  %v3231_v60 = vld [vmem:[#allocation8 + $0x88] sm:$0xf0]  ;;  %v3538_v34 = vor.u32 %v3767_v6, %v3535_v45  ;;  %3111 = vmatpush.bf16.msrb.mxu0 %v3794_v1  ;;  %v3797_v45 = vld [vmem:[#allocation10 + $0x50] sm:$0xff] }
 0x209   :  { %2967 = vmatpush.bf16.msra.mxu3 %v3570_v7  ;;  %v3234_v24 = vor.u32 %v3691_v43, %v3231_v60  ;;  %3124 = vmatpush.bf16.msrb.mxu1 %v3802_v21 }
 0x20c   :  { %2898 = vmatpush.bf16.msrb.mxu2 %v3282_v61  ;;  %v3514_v61 = vor.u32 %v3761_v41, %v3511_v2  ;;  %v2230_v2 = vperm.slane %v2227_v54, 1 }
 0x20d   :  { %2968 = vmatpush.bf16.msra.mxu3 %v3562_v36  ;;  %3125 = vmatpush.bf16.msrb.mxu1 %v3801_v16 }
 0x210   :  { %2899 = vmatpush.bf16.msrb.mxu2 %v3274_v59  ;;  %v3793_v59 = vld [vmem:[#allocation10 + $0x30] sm:$0xff] }
 0x211   :  { %2969 = vmatpush.bf16.msra.mxu3 %v3554_v15  ;;  %3112 = vmatpush.bf16.msrb.mxu0 %v3793_v59 }
 0x212   :  { %3126 = vmatpush.bf16.msrb.mxu1 %v3800_v23 }
 0x214   :  { %2900 = vmatpush.bf16.msrb.mxu2 %v3266_v17  ;;  %2970 = vmatmul.bf16.vlgmr.msra.gmra.mxu3 %v4491_v42  ;;  %v3506_v42 = vor.u32 %v3759_v39, %v3503_v50 }
 0x215   :  { %3113 = vmatpush.bf16.msrb.mxu0 %v3792_v4 }
 0x217   :  { %2853 = vmatmul.bf16.vlgmr.msra.gmra.mxu2 %v2106_v48  ;;  %2944 = vmatmul.bf16.vlgmr.msra.gmra.mxu1 %v2106_v48 }
 0x218   :  { %2901 = vmatpush.bf16.msrb.mxu2 %v3258_v63 }
 0x219   :  { %3114 = vmatpush.bf16.msrb.mxu0 %v3791_v11 }
 0x21c   :  { %2902 = vmatpush.bf16.msrb.mxu2 %v3250_v10 }
 0x21d   :  { %3115 = vmatpush.bf16.msrb.mxu0 %v3790_v27 }
 0x220   :  { %2903 = vmatpush.bf16.msrb.mxu2 %v3242_v40  ;;  %v3799_v40 = vld [vmem:[#allocation10 + $0x60] sm:$0xff] }
 0x221   :  { %3116 = vmatpush.bf16.msrb.mxu0 %v3789_v58  ;;  %3127 = vmatpush.bf16.msrb.mxu1 %v3799_v40 }
 0x224   :  { %2904 = vmatpush.bf16.msrb.mxu2 %v3234_v24  ;;  %v3798_v24 = vld [vmem:[#allocation10 + $0x58] sm:$0xff] }
 0x225   :  { %3117 = vmatpush.bf16.msrb.mxu0 %v3788_v19  ;;  %3128 = vmatpush.bf16.msrb.mxu1 %v3798_v24  ;;  %v3818_v19 = vld [vmem:[#allocation2] ss:$0 sm:$0xff] }
 0x227   :  { %2905 = vmatmul.bf16.vlgmr.msrb.gmra.mxu2 %v4464_v31  ;;  %v3487_v31 = vld [vmem:[#allocation8 + $0x288] sm:$0xf0] }
 0x228   :  { %2949 = vmatpush.bf16.msra.mxu2 %v3546_v3  ;;  %v3490_v0 = vor.u32 %v3755_v55, %v3487_v31 }
 0x229   :  { %3118 = vmatpush.bf16.msrb.mxu0 %v3787_v25  ;;  %3129 = vmatpush.bf16.msrb.mxu1 %v3797_v45 }
 0x22c   :  { %2950 = vmatpush.bf16.msra.mxu2 %v3538_v34 }
 0x230   :  { %2951 = vmatpush.bf16.msra.mxu2 %v3530_v18  ;;  %v3796_v18 = vld [vmem:[#allocation10 + $0x48] sm:$0xff] }
 0x231   :  { %3130 = vmatpush.bf16.msrb.mxu1 %v3796_v18 }
 0x234   :  { %2952 = vmatpush.bf16.msra.mxu2 %v3522_v53 }
 0x235   :  { %3131 = vmatpush.bf16.msrb.mxu1 %v3795_v49 }
 0x238   :  { %2953 = vmatpush.bf16.msra.mxu2 %v3514_v61 }
 0x23c   :  { %2954 = vmatpush.bf16.msra.mxu2 %v3506_v42 }
 0x23e   :  { %v2841_v47 = vpop.f32.mrf.mxu1 }
 0x240   :  { %2955 = vmatpush.bf16.msra.mxu2 %v3498_v46 }
 0x244   :  { %2956 = vmatpush.bf16.msra.mxu2 %v3490_v0 }
 0x246   :  { %v2843_v22 = vpop.f32.mrf.mxu1 }
 0x247   :  { %2957 = vmatmul.bf16.vlgmr.msra.gmra.mxu2 %v4482_v37  ;;  %v2828_v28 = vpop.f32.mrf.mxu0 }
 0x24b   :  { %v2815_v51 = vpop.f32.mrf.mxu3 }
 0x24f   :  { %v2830_v13 = vpop.f32.mrf.mxu0 }
 0x253   :  { %v2817_v32 = vpop.f32.mrf.mxu3 }
 0x254   :  { %v3817_v32 = vld [vmem:[%s4521_s9] ss:$0 sm:$0xff] }
 0x25f   :  { %v2867_v14 = vpop.f32.mrf.mxu3 }
 0x260   :  { %v2880_v37 = vpop.f32.mrf.mxu0 }
 0x267   :  { %v2869_v56 = vpop.f32.mrf.mxu3 }
 0x268   :  { %v2882_v62 = vpop.f32.mrf.mxu0 }
 0x277   :  { %v2919_v20 = vpop.f32.mrf.mxu3 }
 0x27f   :  { %v2921_v35 = vpop.f32.mrf.mxu3 }
 0x283   :  { %v2932_v10 = vpop.f32.mrf.mxu0 }
 0x284   :  { %v2893_v17 = vpop.f32.mrf.mxu1 }
 0x285   :  { %v2894_v61 = vadd.f32 %v2893_v17, %v2230_v2 }
 0x28a   :  { %v2802_v57 = vpop.f32.mrf.mxu2 }
 0x28b   :  { %v2803_v63 = vadd.f32 %v2802_v57, %v2229_v5  ;;  %v2934_v43 = vpop.f32.mrf.mxu0 }
 0x28c   :  { %v2895_v48 = vpop.f32.mrf.mxu1 }
 0x28d   :  { %v2816_v7 = vadd.f32 %v2815_v51, %v2803_v63  ;;  %v3816_v51 = vld [vmem:[%s4520_s8] ss:$0 sm:$0xff] }
 0x28f   :  { %v2829_v36 = vadd.f32 %v2828_v28, %v2816_v7 }
 0x291   :  { %v2842_v38 = vadd.f32 %v2841_v47, %v2829_v36 }
 0x292   :  { %v2804_v29 = vpop.f32.mrf.mxu2 }
 0x294   :  { %v2945_v33 = vpop.f32.mrf.mxu1 }
 0x297   :  { %v2971_v52 = vpop.f32.mrf.mxu3 }
 0x29a   :  { %v2854_v15 = vpop.f32.mrf.mxu2 }
 0x29b   :  { %v2855_v60 = vadd.f32 %v2854_v15, %v2842_v38 }
 0x29c   :  { %v2947_v44 = vpop.f32.mrf.mxu1 }
 0x29d   :  { %v2868_v30 = vadd.f32 %v2867_v14, %v2855_v60 }
 0x29f   :  { %v2881_v3 = vadd.f32 %v2880_v37, %v2868_v30  ;;  %v2973_v53 = vpop.f32.mrf.mxu3 }
 0x2a1   :  { %v2975_v6 = vmax.f32 %v2881_v3, 0.0 }
 0x2a2   :  { %v2856_v34 = vpop.f32.mrf.mxu2 }
 0x2a3   :  { %v2977_v12 = vpack.c.bf16 %v2975_v6, %v2975_v6 }
 0x2a5   :  { %3119 = vmatmul.bf16.vlgmr.msrb.gmra.mxu0 %v2977_v12 }
 0x2aa   :  { %v2906_v26 = vpop.f32.mrf.mxu2 }
 0x2ab   :  { %v2907_v39 = vadd.f32 %v2906_v26, %v2894_v61 }
 0x2ad   :  { %v2920_v50 = vadd.f32 %v2919_v20, %v2907_v39 }
 0x2af   :  { %v2933_v42 = vadd.f32 %v2932_v10, %v2920_v50 }
 0x2b1   :  { %v2946_v8 = vadd.f32 %v2945_v33, %v2933_v42 }
 0x2b2   :  { %v2908_v41 = vpop.f32.mrf.mxu2 }
 0x2ca   :  { %v2958_v9 = vpop.f32.mrf.mxu2 }
 0x2cb   :  { %v2959_v46 = vadd.f32 %v2958_v9, %v2946_v8 }
 0x2cd   :  { %v2972_v55 = vadd.f32 %v2971_v52, %v2959_v46 }
 0x2cf   :  { %v2976_v31 = vmax.f32 %v2972_v55, 0.0 }
 0x2d1   :  { %v2978_v0 = vpack.c.bf16 %v2976_v31, %v2976_v31 }
 0x2d2   :  { %v2960_v47 = vpop.f32.mrf.mxu2 }
 0x2d3   :  { %3132 = vmatmul.bf16.vlgmr.msrb.gmra.mxu1 %v2978_v0 }
 0x322   :  { %v3120_v22 = vpop.f32.mrf.mxu0 }
 0x323   :  { %v3121_v59 = vadd.f32 %v3816_v51, %v3120_v22 }
 0x32a   :  { %v3122_v1 = vpop.f32.mrf.mxu0 }
 0x350   :  { %v3133_v4 = vpop.f32.mrf.mxu1 }
 0x351   :  { %v3134_v28 = vadd.f32 %v3133_v4, %v3121_v59 }
 0x353   :  { %v3137_v11 = vmax.f32 %v3134_v28, 0.0 }
 0x355   :  { %v3142_v27 = vmul.f32 %v3817_v32, %v3137_v11 }
 0x357   :  { %v3144_v13 = vsel %vm3143_vm1, %v3142_v27, 0.0 }
 0x358   :  { %v3135_v58 = vpop.f32.mrf.mxu1  ;;  %3145 = vadd.xlane.f32.xlu0 %v3144_v13 }
 0x3cb   :  { %v3146_v37 = vpop.xlane.xlu0 %3145 }
 0x3cc   :  { %v3151_v14 = vadd.f32 %v3818_v19, %v3146_v37 }
 0x3ce   :  { %v3152_v25 = vmax.f32 %v3151_v14, 0.0 }
 0x3d0   :  { %v3153_v17 = vmin.f32 %v3152_v25, 1.0 }
 0x3d2   :  { %3155 = vst.msk [vmem:[%s4523_s11] sm:$0x3] %vm3154_vm2, %v3153_v17 }
 0x3d3   :  { %3160 = vsyncpa [#allocation4], 1 }
 0x3d4   :  { %3161 = vsyncpa [#allocation6], 1 }
 0x3d5   :  { %3162 = vsyncpa [#allocation9], 1 }

</bundles_post_ra>
